<compile_context>
chip_gen: v7x
topology: tpu7x:2x2x1
jax: 0.10.0
libtpu: 0.0.40
codegen_flags: <defaults>
</compile_context>

<pallas_src>
import functools

import jax
import jax.numpy as jnp
from jax import lax
from jax.experimental import pallas as pl
from jax.experimental.pallas import tpu as pltpu


def _round_up(x, m):
    return ((x + m - 1) // m) * m


_CONTRACT_ROWS = (((0,), (0,)), ((), ()))   # dot_general: contract axis 0 of both


# ------------------- fused per-iteration candidate kernel -------------------

def _candidate_kernel(et_ref, x_ref, w_ref, b_ref, s_ref):
    """One (row-chunk, row-tile) grid step of candidate evaluation.

    h = sigmoid(X_tile @ W_rand + b) is computed tile-by-tile in VMEM (never
    written to HBM) and reduced into the selection statistic S = e^T h.
    W_rand / b are VMEM-resident across the whole row sweep (index map (0,0)),
    so X and e are streamed from HBM exactly once per training iteration.
    """
    @pl.when(pl.program_id(1) == 0)          # first row tile of this chunk
    def _():
        s_ref[...] = jnp.zeros_like(s_ref)

    z = jnp.dot(x_ref[...], w_ref[...],      # bf16 x bf16 -> f32 on the MXU
                preferred_element_type=jnp.float32) + b_ref[...]
    h = pl.reciprocal(1.0 + jnp.exp(-z), approx=True)   # sigmoid; recip on EUP
    s_ref[...] += jnp.dot(et_ref[...].astype(jnp.bfloat16),
                          h.astype(jnp.bfloat16),
                          preferred_element_type=jnp.float32)


def candidate_scores(et, x_bf, w_bf, b, *, tm, num_chunks):
    """Per-chunk partials S_p = e_p^T sigmoid(X_p W + b); caller sums over p."""
    C, n_pad = et.shape
    d = x_bf.shape[1]
    m_pad = w_bf.shape[1]
    assert n_pad % (num_chunks * tm) == 0
    T = n_pad // (num_chunks * tm)           # row tiles per chunk
    return pl.pallas_call(
        _candidate_kernel,
        out_shape=jax.ShapeDtypeStruct((num_chunks, C, m_pad), jnp.float32),
        grid=(num_chunks, T),                # reduction (row) axis last
        in_specs=[pl.BlockSpec((C, tm), lambda p, n: (0, p * T + n)),
                  pl.BlockSpec((tm, d), lambda p, n: (p * T + n, 0)),
                  pl.BlockSpec((d, m_pad), lambda p, n: (0, 0)),
                  pl.BlockSpec((1, m_pad), lambda p, n: (0, 0))],
        out_specs=pl.BlockSpec((None, C, m_pad), lambda p, n: (p, 0, 0)),
        compiler_params=pltpu.CompilerParams(
            dimension_semantics=("parallel", "arbitrary"),
            vmem_limit_bytes=32 * 1024 * 1024),
    )(et, x_bf, w_bf, b)


# --------------------------- fused final readout ----------------------------

def _readout_kernel(x_ref, w_ref, b_ref, y_ref, hth_ref, hty_ref, h_scr, *,
                    n_valid, n_pad, tm):
    """Accumulate HtH and HtY from H_tile = sigmoid(X_tile W + b).

    Padded rows exist only in the last row tile; masking is gated behind
    pl.when so the other tiles pay no iota/compare/select cost.
    """
    i = pl.program_id(0)

    @pl.when(i == 0)
    def _():
        hth_ref[...] = jnp.zeros_like(hth_ref)
        hty_ref[...] = jnp.zeros_like(hty_ref)

    z = jnp.dot(x_ref[...], w_ref[...],
                preferred_element_type=jnp.float32) + b_ref[...]
    h_scr[...] = jax.nn.sigmoid(z)

    if n_pad != n_valid:                     # static: padding exists at all
        @pl.when(i == pl.num_programs(0) - 1)
        def _():
            row = i * tm + lax.broadcasted_iota(jnp.int32, h_scr.shape, 0)
            h_scr[...] = jnp.where(row < n_valid, h_scr[...], 0.0)

    h = h_scr[...]
    hth_ref[...] += lax.dot_general(h, h, _CONTRACT_ROWS,
                                    preferred_element_type=jnp.float32)
    hty_ref[...] += lax.dot_general(h, y_ref[...], _CONTRACT_ROWS,
                                    preferred_element_type=jnp.float32)


def readout_stats(x_bf, w_bf, b2, y, *, n_valid, tm):
    n_pad, d = x_bf.shape
    K = w_bf.shape[1]
    C = y.shape[1]
    assert n_pad % tm == 0
    kern = functools.partial(_readout_kernel, n_valid=n_valid, n_pad=n_pad, tm=tm)
    return pl.pallas_call(
        kern,
        out_shape=(jax.ShapeDtypeStruct((K, K), jnp.float32),
                   jax.ShapeDtypeStruct((K, C), jnp.float32)),
        grid=(n_pad // tm,),
        in_specs=[pl.BlockSpec((tm, d), lambda i: (i, 0)),
                  pl.BlockSpec((d, K), lambda i: (0, 0)),
                  pl.BlockSpec((1, K), lambda i: (0, 0)),
                  pl.BlockSpec((tm, C), lambda i: (i, 0))],
        out_specs=(pl.BlockSpec((K, K), lambda i: (0, 0)),
                   pl.BlockSpec((K, C), lambda i: (0, 0))),
        scratch_shapes=[pltpu.VMEM((tm, K), jnp.float32)],
        compiler_params=pltpu.CompilerParams(
            dimension_semantics=("arbitrary",),
            vmem_limit_bytes=32 * 1024 * 1024),
    )(x_bf, w_bf, b2, y)


# ------------------------------- OSCN forward -------------------------------

def oscn_train(X, Tt, key, *, lambdas, max_neurons, reconfig_number,
               tm=512, num_row_chunks=2, eps=1e-12):
    """JAX/Pallas port of OSCNTrain.forward. Returns (W, b, beta)."""
    N, d = X.shape
    C = Tt.shape[1]
    K = max_neurons
    M = len(lambdas) * reconfig_number
    M_pad = _round_up(M, 256)                # fill the 256-wide MXU (v6e/v7x)

    P = max(1, num_row_chunks)               # 'parallel' row chunks (v7x TCs)
    tm = min(tm, _round_up(-(-N // P), 128))
    tm = max(128, _round_up(tm, 128))        # lane-dense transposed e/H tiles
    N_pad = _round_up(N, P * tm)

    Xf = X.astype(jnp.float32)
    # X is stored (and consumed) in bf16; padded rows are zero.
    Xp_bf = jnp.zeros((N_pad, d), jnp.bfloat16).at[:N].set(Xf.astype(jnp.bfloat16))
    # Residual e and basis H are kept transposed; padded columns are zero so
    # they contribute nothing to the e^T h accumulation in the kernel.
    et0 = jnp.zeros((C, N_pad), jnp.float32).at[:, :N].set(Tt.astype(jnp.float32).T)
    Hpt0 = jnp.zeros((K, N_pad), jnp.float32)
    row_mask = (jnp.arange(N_pad) < N).astype(jnp.float32)
    col_valid = jnp.arange(M_pad) < M

    W0 = jnp.zeros((d, K), jnp.float32)
    b0 = jnp.zeros((K,), jnp.float32)

    def body(k, carry):
        W, b, Hpt, et = carry

        # --- random candidate generation (matches torch rand in [-L, L]) ---
        k_key = jax.random.fold_in(key, k)
        W_parts, b_parts = [], []
        for i, L in enumerate(lambdas):
            kw, kb = jax.random.split(jax.random.fold_in(k_key, i))
            W_parts.append(L * (2.0 * jax.random.uniform(
                kw, (d, reconfig_number), jnp.float32) - 1.0))
            b_parts.append(L * (2.0 * jax.random.uniform(
                kb, (1, reconfig_number), jnp.float32) - 1.0))
        W_rand = jnp.concatenate(W_parts, axis=1)                  # (d, M)
        b_rand = jnp.concatenate(b_parts, axis=1)                  # (1, M)
        # Lane-dense padding of the candidate axis; padded columns are masked
        # out of the argmax below so they can never be selected.
        W_rand_bf = jnp.zeros((d, M_pad), jnp.bfloat16).at[:, :M].set(
            W_rand.astype(jnp.bfloat16))
        b_rand_p = jnp.zeros((1, M_pad), jnp.float32).at[:, :M].set(b_rand)

        # --- fused candidate pass (Pallas): S = e^T sigmoid(XW + b) --------
        S = candidate_scores(et, Xp_bf, W_rand_bf, b_rand_p,
                             tm=tm, num_chunks=P).sum(axis=0)      # (C, M_pad)
        # Reference criterion: mean over classes of (e^T h)^2 (no norm term).
        scores = jnp.mean(S * S, axis=0)
        scores = jnp.where(col_valid, scores, -jnp.inf)
        best = jnp.argmax(scores)

        w_c_bf = W_rand_bf[:, best]                                # (d,) bf16
        b_c = b_rand_p[0, best]                                    # ()

        # --- orthonormalize ONLY the winning column (cheap N-vector work) --
        # For k == 0, H is all zero so g == 0 and this reduces to
        # v = h_c / ||h_c||, matching the torch k == 0 branch.
        z_c = jnp.dot(Xp_bf, w_c_bf, preferred_element_type=jnp.float32) + b_c
        h_c = jax.nn.sigmoid(z_c)                                  # (N_pad,) f32
        g = jnp.dot(Hpt, h_c)                                      # (K,)  H^T h
        t = (h_c - jnp.dot(g, Hpt)) * row_mask                     # mask pad rows
        nrm = jnp.sqrt(jnp.sum(t * t))
        v_c = t / jnp.maximum(nrm, eps)                            # eps guard
        beta_c = jnp.dot(et, v_c)                                  # (C,)  e^T v

        Hpt = Hpt.at[k, :].set(v_c)
        et = et - beta_c[:, None] * v_c[None, :]
        W = W.at[:, k].set(w_c_bf.astype(jnp.float32))
        b = b.at[k].set(b_c)
        return W, b, Hpt, et

    W, b, Hpt, et = lax.fori_loop(0, K, body, (W0, b0, Hpt0, et0))

    # --- final readout: H = sigmoid(X W + b), beta = (H^T H)^{-1} H^T Y ----
    Yp = jnp.zeros((N_pad, C), jnp.float32).at[:N].set(Tt.astype(jnp.float32))
    HtH, HtY = readout_stats(Xp_bf, W.astype(jnp.bfloat16), b[None, :], Yp,
                             n_valid=N, tm=tm)
    beta = jnp.linalg.solve(HtH, HtY)          # == inv(HtH) @ HtY
    return W, b, beta


# ----------------------------------- main -----------------------------------

if __name__ == "__main__":
    key = jax.random.PRNGKey(0)
    kx, ky, kt = jax.random.split(key, 3)

    # Small synthetic stand-in for (flattened MNIST images, one-hot targets).
    # N is not a tile multiple and M is not a lane multiple, to exercise the
    # row/column padding + masking paths.
    N, d, C = 600, 64, 10
    max_neurons = 8
    reconfig_number = 100
    lambdas = (0.5, 1.0)

    X = jax.random.normal(kx, (N, d), dtype=jnp.float32)
    labels = jax.random.randint(ky, (N,), 0, C)
    Tt = jax.nn.one_hot(labels, C, dtype=jnp.float32)

    train = jax.jit(
        functools.partial(oscn_train,
                          lambdas=lambdas,
                          max_neurons=max_neurons,
                          reconfig_number=reconfig_number))

    W, b, beta = train(X, Tt, kt)
    jax.block_until_ready((W, b, beta))

    assert W.shape == (d, max_neurons)
    assert b.shape == (max_neurons,)
    assert beta.shape == (max_neurons, C)
    assert bool(jnp.all(jnp.isfinite(W)) & jnp.all(jnp.isfinite(b))
                & jnp.all(jnp.isfinite(beta)))
    print("KERNEL_OK")
</pallas_src>

<mosaic_0001>
module attributes {stable_mosaic.version = 11 : i64} {
  func.func @_candidate_kernel(%arg0: i32, %arg1: i32, %arg2: memref<10x384xf32, #tpu.memory_space<vmem>>, %arg3: memref<384x64xbf16, #tpu.memory_space<vmem>>, %arg4: memref<64x256xbf16, #tpu.memory_space<vmem>>, %arg5: memref<1x256xf32, #tpu.memory_space<vmem>>, %arg6: memref<1x10x256xf32, #tpu.memory_space<vmem>>) attributes {dimension_semantics = [#tpu.dimension_semantics<parallel>, #tpu.dimension_semantics<arbitrary>], iteration_bounds = array<i64: 2, 1>, scalar_prefetch = 0 : i64, scratch_operands = 0 : i64, tpu.core_type = #tpu.core_type<tc>, window_params = [{transform_indices = @transform_0, window_bounds = array<i64: 10, 384>}, {transform_indices = @transform_1, window_bounds = array<i64: 384, 64>}, {pipeline_mode = #tpu.pipeline_mode<synchronous>, transform_indices = @transform_2, window_bounds = array<i64: 64, 256>}, {pipeline_mode = #tpu.pipeline_mode<synchronous>, transform_indices = @transform_3, window_bounds = array<i64: 1, 256>}, {transform_indices = @transform_4, window_bounds = array<i64: 1, 10, 256>}]} {
    %c0_i32 = arith.constant 0 : i32
    %0 = arith.cmpi eq, %arg1, %c0_i32 : i32
    %1 = arith.extui %0 : i1 to i32
    %c0_i32_0 = arith.constant 0 : i32
    %2 = arith.cmpi ne, %1, %c0_i32_0 : i32
    scf.if %2 {
      %cst_17 = arith.constant 0.000000e+00 : f32
      %25 = vector.broadcast %cst_17 : f32 to vector<10x256xf32>
      %c0_18 = arith.constant 0 : index
      %c0_19 = arith.constant 0 : index
      %c0_20 = arith.constant 0 : index
      %26 = vector.load %arg6[%c0_18, %c0_19, %c0_20] : memref<1x10x256xf32, #tpu.memory_space<vmem>>, vector<1x10x256xf32>
      %27 = vector.shape_cast %26 : vector<1x10x256xf32> to vector<10x256xf32>
      %28 = vector.shape_cast %25 : vector<10x256xf32> to vector<1x10x256xf32>
      tpu.vector_store %arg6[%c0_18, %c0_19, %c0_20], %28 {strides = array<i32>} : memref<1x10x256xf32, #tpu.memory_space<vmem>>, vector<1x10x256xf32>,
    } else {
    }
    %c0 = arith.constant 0 : index
    %c0_1 = arith.constant 0 : index
    %3 = vector.load %arg3[%c0, %c0_1] : memref<384x64xbf16, #tpu.memory_space<vmem>>, vector<384x64xbf16>
    %c0_2 = arith.constant 0 : index
    %c0_3 = arith.constant 0 : index
    %4 = vector.load %arg4[%c0_2, %c0_3] : memref<64x256xbf16, #tpu.memory_space<vmem>>, vector<64x256xbf16>
    %cst = arith.constant dense<0.000000e+00> : vector<384x256xf32>
    %5 = tpu.matmul %3, %4, %cst {dimension_numbers = #tpu.dot_dimension_numbers<[1], [0], [0], [1], [0, 0, 1, 1], [], []>} : vector<384x64xbf16>, vector<64x256xbf16>, vector<384x256xf32> -> vector<384x256xf32>
    %c0_4 = arith.constant 0 : index
    %c0_5 = arith.constant 0 : index
    %6 = vector.load %arg5[%c0_4, %c0_5] : memref<1x256xf32, #tpu.memory_space<vmem>>, vector<1x256xf32>
    %7 = vector.broadcast %6 : vector<1x256xf32> to vector<384x256xf32>
    %8 = arith.addf %5, %7 : vector<384x256xf32>
    %cst_6 = arith.constant 0.000000e+00 : f32
    %9 = vector.broadcast %cst_6 : f32 to vector<384x256xf32>
    %10 = arith.subf %9, %8 : vector<384x256xf32>
    %11 = math.exp %10 : vector<384x256xf32>
    %cst_7 = arith.constant 1.000000e+00 : f32
    %12 = vector.broadcast %cst_7 : f32 to vector<384x256xf32>
    %13 = arith.addf %12, %11 : vector<384x256xf32>
    %14 = tpu.reciprocal %13 {approx = true} : vector<384x256xf32> -> vector<384x256xf32>
    %c0_8 = arith.constant 0 : index
    %c0_9 = arith.constant 0 : index
    %c0_10 = arith.constant 0 : index
    %15 = vector.load %arg6[%c0_8, %c0_9, %c0_10] : memref<1x10x256xf32, #tpu.memory_space<vmem>>, vector<1x10x256xf32>
    %16 = vector.shape_cast %15 : vector<1x10x256xf32> to vector<10x256xf32>
    %c0_11 = arith.constant 0 : index
    %c0_12 = arith.constant 0 : index
    %17 = vector.load %arg2[%c0_11, %c0_12] : memref<10x384xf32, #tpu.memory_space<vmem>>, vector<10x384xf32>
    %18 = arith.truncf %17 : vector<10x384xf32> to vector<10x384xbf16>
    %19 = arith.truncf %14 : vector<384x256xf32> to vector<384x256xbf16>
    %cst_13 = arith.constant dense<0.000000e+00> : vector<10x256xf32>
    %20 = tpu.matmul %18, %19, %cst_13 {dimension_numbers = #tpu.dot_dimension_numbers<[1], [0], [0], [1], [0, 0, 1, 1], [], []>} : vector<10x384xbf16>, vector<384x256xbf16>, vector<10x256xf32> -> vector<10x256xf32>
    %21 = arith.addf %16, %20 : vector<10x256xf32>
    %c0_14 = arith.constant 0 : index
    %c0_15 = arith.constant 0 : index
    %c0_16 = arith.constant 0 : index
    %22 = vector.load %arg6[%c0_14, %c0_15, %c0_16] : memref<1x10x256xf32, #tpu.memory_space<vmem>>, vector<1x10x256xf32>
    %23 = vector.shape_cast %22 : vector<1x10x256xf32> to vector<10x256xf32>
    %24 = vector.shape_cast %21 : vector<10x256xf32> to vector<1x10x256xf32>
    tpu.vector_store %arg6[%c0_14, %c0_15, %c0_16], %24 {strides = array<i32>} : memref<1x10x256xf32, #tpu.memory_space<vmem>>, vector<1x10x256xf32>,
    return
  }
  func.func @transform_0(%arg0: i32, %arg1: i32) -> (i32, i32) {
    %c1_i32 = arith.constant 1 : i32
    %0 = arith.muli %arg0, %c1_i32 : i32
    %1 = arith.addi %0, %arg1 : i32
    %c0_i32 = arith.constant 0 : i32
    %c0_i32_0 = arith.constant 0 : i32
    return %c0_i32, %1 : i32, i32
  }
  func.func @transform_1(%arg0: i32, %arg1: i32) -> (i32, i32) {
    %c1_i32 = arith.constant 1 : i32
    %0 = arith.muli %arg0, %c1_i32 : i32
    %1 = arith.addi %0, %arg1 : i32
    %c0_i32 = arith.constant 0 : i32
    %c0_i32_0 = arith.constant 0 : i32
    return %1, %c0_i32 : i32, i32
  }
  func.func @transform_2(%arg0: i32, %arg1: i32) -> (i32, i32) {
    %c0_i32 = arith.constant 0 : i32
    %c0_i32_0 = arith.constant 0 : i32
    %c0_i32_1 = arith.constant 0 : i32
    return %c0_i32, %c0_i32_0 : i32, i32
  }
  func.func @transform_3(%arg0: i32, %arg1: i32) -> (i32, i32) {
    %c0_i32 = arith.constant 0 : i32
    %c0_i32_0 = arith.constant 0 : i32
    %c0_i32_1 = arith.constant 0 : i32
    return %c0_i32, %c0_i32_0 : i32, i32
  }
  func.func @transform_4(%arg0: i32, %arg1: i32) -> (i32, i32, i32) {
    %c0_i32 = arith.constant 0 : i32
    %c0_i32_0 = arith.constant 0 : i32
    %c0_i32_1 = arith.constant 0 : i32
    return %arg0, %c0_i32, %c0_i32_0 : i32, i32, i32
  }
}

module attributes {stable_mosaic.version = 11 : i64} {
  func.func @_readout_kernel(%arg0: i32, %arg1: memref<384x64xbf16, #tpu.memory_space<vmem>>, %arg2: memref<64x8xbf16, #tpu.memory_space<vmem>>, %arg3: memref<1x8xf32, #tpu.memory_space<vmem>>, %arg4: memref<384x10xf32, #tpu.memory_space<vmem>>, %arg5: memref<8x8xf32, #tpu.memory_space<vmem>>, %arg6: memref<8x10xf32, #tpu.memory_space<vmem>>, %arg7: memref<384x8xf32, #tpu.memory_space<vmem>>) attributes {dimension_semantics = [#tpu.dimension_semantics<arbitrary>], iteration_bounds = array<i64: 2>, scalar_prefetch = 0 : i64, scratch_operands = 1 : i64, tpu.core_type = #tpu.core_type<tc>, window_params = [{transform_indices = @transform_0, window_bounds = array<i64: 384, 64>}, {pipeline_mode = #tpu.pipeline_mode<synchronous>, transform_indices = @transform_1, window_bounds = array<i64: 64, 8>}, {pipeline_mode = #tpu.pipeline_mode<synchronous>, transform_indices = @transform_2, window_bounds = array<i64: 1, 8>}, {transform_indices = @transform_3, window_bounds = array<i64: 384, 10>}, {pipeline_mode = #tpu.pipeline_mode<synchronous>, transform_indices = @transform_4, window_bounds = array<i64: 8, 8>}, {pipeline_mode = #tpu.pipeline_mode<synchronous>, transform_indices = @transform_5, window_bounds = array<i64: 8, 10>}]} {
    %c0_i32 = arith.constant 0 : i32
    %0 = arith.cmpi eq, %arg0, %c0_i32 : i32
    %1 = arith.extui %0 : i1 to i32
    %c0_i32_0 = arith.constant 0 : i32
    %2 = arith.cmpi ne, %1, %c0_i32_0 : i32
    scf.if %2 {
      %cst_24 = arith.constant 0.000000e+00 : f32
      %28 = vector.broadcast %cst_24 : f32 to vector<8x8xf32>
      %c0_25 = arith.constant 0 : index
      %c0_26 = arith.constant 0 : index
      %29 = vector.load %arg5[%c0_25, %c0_26] : memref<8x8xf32, #tpu.memory_space<vmem>>, vector<8x8xf32>
      tpu.vector_store %arg5[%c0_25, %c0_26], %28 {strides = array<i32>} : memref<8x8xf32, #tpu.memory_space<vmem>>, vector<8x8xf32>,
      %cst_27 = arith.constant 0.000000e+00 : f32
      %30 = vector.broadcast %cst_27 : f32 to vector<8x10xf32>
      %c0_28 = arith.constant 0 : index
      %c0_29 = arith.constant 0 : index
      %31 = vector.load %arg6[%c0_28, %c0_29] : memref<8x10xf32, #tpu.memory_space<vmem>>, vector<8x10xf32>
      tpu.vector_store %arg6[%c0_28, %c0_29], %30 {strides = array<i32>} : memref<8x10xf32, #tpu.memory_space<vmem>>, vector<8x10xf32>,
    } else {
    }
    %c0 = arith.constant 0 : index
    %c0_1 = arith.constant 0 : index
    %3 = vector.load %arg1[%c0, %c0_1] : memref<384x64xbf16, #tpu.memory_space<vmem>>, vector<384x64xbf16>
    %c0_2 = arith.constant 0 : index
    %c0_3 = arith.constant 0 : index
    %4 = vector.load %arg2[%c0_2, %c0_3] : memref<64x8xbf16, #tpu.memory_space<vmem>>, vector<64x8xbf16>
    %cst = arith.constant dense<0.000000e+00> : vector<384x8xf32>
    %5 = tpu.matmul %3, %4, %cst {dimension_numbers = #tpu.dot_dimension_numbers<[1], [0], [0], [1], [0, 0, 1, 1], [], []>} : vector<384x64xbf16>, vector<64x8xbf16>, vector<384x8xf32> -> vector<384x8xf32>
    %c0_4 = arith.constant 0 : index
    %c0_5 = arith.constant 0 : index
    %6 = vector.load %arg3[%c0_4, %c0_5] : memref<1x8xf32, #tpu.memory_space<vmem>>, vector<1x8xf32>
    %7 = vector.broadcast %6 : vector<1x8xf32> to vector<384x8xf32>
    %8 = arith.addf %5, %7 : vector<384x8xf32>
    %9 = arith.negf %8 : vector<384x8xf32>
    %10 = math.exp %9 : vector<384x8xf32>
    %cst_6 = arith.constant 1.000000e+00 : f32
    %11 = vector.broadcast %cst_6 : f32 to vector<384x8xf32>
    %12 = arith.addf %11, %10 : vector<384x8xf32>
    %13 = arith.divf %11, %12 : vector<384x8xf32>
    %c0_7 = arith.constant 0 : index
    %c0_8 = arith.constant 0 : index
    %14 = vector.load %arg7[%c0_7, %c0_8] : memref<384x8xf32, #tpu.memory_space<vmem>>, vector<384x8xf32>
    tpu.vector_store %arg7[%c0_7, %c0_8], %13 {strides = array<i32>} : memref<384x8xf32, #tpu.memory_space<vmem>>, vector<384x8xf32>,
    %c1_i32 = arith.constant 1 : i32
    %15 = arith.cmpi eq, %arg0, %c1_i32 : i32
    %16 = arith.extui %15 : i1 to i32
    %c0_i32_9 = arith.constant 0 : i32
    %17 = arith.cmpi ne, %16, %c0_i32_9 : i32
    scf.if %17 {
      %c384_i32 = arith.constant 384 : i32
      %28 = arith.muli %arg0, %c384_i32 : i32
      %29 = tpu.iota {dimensions = array<i32: 0>} : vector<384x8xi32>
      %30 = vector.broadcast %28 : i32 to vector<384x8xi32>
      %31 = arith.addi %30, %29 : vector<384x8xi32>
      %c600_i32 = arith.constant 600 : i32
      %32 = vector.broadcast %c600_i32 : i32 to vector<384x8xi32>
      %33 = arith.cmpi slt, %31, %32 : vector<384x8xi32>
      %c0_24 = arith.constant 0 : index
      %c0_25 = arith.constant 0 : index
      %34 = vector.load %arg7[%c0_24, %c0_25] : memref<384x8xf32, #tpu.memory_space<vmem>>, vector<384x8xf32>
      %cst_26 = arith.constant 0.000000e+00 : f32
      %35 = vector.broadcast %cst_26 : f32 to vector<384x8xf32>
      %36 = arith.select %33, %34, %35 : vector<384x8xi1>, vector<384x8xf32>
      %c0_27 = arith.constant 0 : index
      %c0_28 = arith.constant 0 : index
      %37 = vector.load %arg7[%c0_27, %c0_28] : memref<384x8xf32, #tpu.memory_space<vmem>>, vector<384x8xf32>
      tpu.vector_store %arg7[%c0_27, %c0_28], %36 {strides = array<i32>} : memref<384x8xf32, #tpu.memory_space<vmem>>, vector<384x8xf32>,
    } else {
    }
    %c0_10 = arith.constant 0 : index
    %c0_11 = arith.constant 0 : index
    %18 = vector.load %arg7[%c0_10, %c0_11] : memref<384x8xf32, #tpu.memory_space<vmem>>, vector<384x8xf32>
    %c0_12 = arith.constant 0 : index
    %c0_13 = arith.constant 0 : index
    %19 = vector.load %arg5[%c0_12, %c0_13] : memref<8x8xf32, #tpu.memory_space<vmem>>, vector<8x8xf32>
    %cst_14 = arith.constant dense<0.000000e+00> : vector<8x8xf32>
    %20 = tpu.matmul %18, %18, %cst_14 {dimension_numbers = #tpu.dot_dimension_numbers<[0], [0], [1], [1], [0, 1, 1, 1], [], []>} : vector<384x8xf32>, vector<384x8xf32>, vector<8x8xf32> -> vector<8x8xf32>
    %21 = arith.addf %19, %20 : vector<8x8xf32>
    %c0_15 = arith.constant 0 : index
    %c0_16 = arith.constant 0 : index
    %22 = vector.load %arg5[%c0_15, %c0_16] : memref<8x8xf32, #tpu.memory_space<vmem>>, vector<8x8xf32>
    tpu.vector_store %arg5[%c0_15, %c0_16], %21 {strides = array<i32>} : memref<8x8xf32, #tpu.memory_space<vmem>>, vector<8x8xf32>,
    %c0_17 = arith.constant 0 : index
    %c0_18 = arith.constant 0 : index
    %23 = vector.load %arg6[%c0_17, %c0_18] : memref<8x10xf32, #tpu.memory_space<vmem>>, vector<8x10xf32>
    %c0_19 = arith.constant 0 : index
    %c0_20 = arith.constant 0 : index
    %24 = vector.load %arg4[%c0_19, %c0_20] : memref<384x10xf32, #tpu.memory_space<vmem>>, vector<384x10xf32>
    %cst_21 = arith.constant dense<0.000000e+00> : vector<8x10xf32>
    %25 = tpu.matmul %18, %24, %cst_21 {dimension_numbers = #tpu.dot_dimension_numbers<[0], [0], [1], [1], [0, 1, 1, 1], [], []>} : vector<384x8xf32>, vector<384x10xf32>, vector<8x10xf32> -> vector<8x10xf32>
    %26 = arith.addf %23, %25 : vector<8x10xf32>
    %c0_22 = arith.constant 0 : index
    %c0_23 = arith.constant 0 : index
    %27 = vector.load %arg6[%c0_22, %c0_23] : memref<8x10xf32, #tpu.memory_space<vmem>>, vector<8x10xf32>
    tpu.vector_store %arg6[%c0_22, %c0_23], %26 {strides = array<i32>} : memref<8x10xf32, #tpu.memory_space<vmem>>, vector<8x10xf32>,
    return
  }
  func.func @transform_0(%arg0: i32) -> (i32, i32) {
    %c0_i32 = arith.constant 0 : i32
    %c0_i32_0 = arith.constant 0 : i32
    return %arg0, %c0_i32 : i32, i32
  }
  func.func @transform_1(%arg0: i32) -> (i32, i32) {
    %c0_i32 = arith.constant 0 : i32
    %c0_i32_0 = arith.constant 0 : i32
    %c0_i32_1 = arith.constant 0 : i32
    return %c0_i32, %c0_i32_0 : i32, i32
  }
  func.func @transform_2(%arg0: i32) -> (i32, i32) {
    %c0_i32 = arith.constant 0 : i32
    %c0_i32_0 = arith.constant 0 : i32
    %c0_i32_1 = arith.constant 0 : i32
    return %c0_i32, %c0_i32_0 : i32, i32
  }
  func.func @transform_3(%arg0: i32) -> (i32, i32) {
    %c0_i32 = arith.constant 0 : i32
    %c0_i32_0 = arith.constant 0 : i32
    return %arg0, %c0_i32 : i32, i32
  }
  func.func @transform_4(%arg0: i32) -> (i32, i32) {
    %c0_i32 = arith.constant 0 : i32
    %c0_i32_0 = arith.constant 0 : i32
    %c0_i32_1 = arith.constant 0 : i32
    return %c0_i32, %c0_i32_0 : i32, i32
  }
  func.func @transform_5(%arg0: i32) -> (i32, i32) {
    %c0_i32 = arith.constant 0 : i32
    %c0_i32_0 = arith.constant 0 : i32
    %c0_i32_1 = arith.constant 0 : i32
    return %c0_i32, %c0_i32_0 : i32, i32
  }
}

</mosaic_0001>

<bundles_post_ra>
// kernel: closed_call.24
= control target key start
LH: loop header
LB: loop body
LE: loop exit
PB: predicated region body
PF: predicated region fallthrough
CT: control target
= control target key end

     0   :  { %s2186_s15 = smov 0   ;;  %s2188_s16 = smov 0   ;;  %s2697_s0 = inlined_call_operand.vmem [shape: f32[10,768], index: 0, kind: input, shape index: {}]   ;;  %s2698_s1 = inlined_call_operand.vmem [shape: bf16[768,64], index: 1, kind: input, shape index: {}]   ;;  %s2699_s2 = inlined_call_operand.vmem [shape: bf16[64,256], index: 2, kind: input, shape index: {}]   ;;  %s2700_s3 = inlined_call_operand.vmem [shape: f32[1,256], index: 3, kind: input, shape index: {}]   ;;  %s2701_s4 = inlined_call_operand.vmem [shape: f32[2,10,256], index: 4, kind: output, shape index: {}]  }
   0x1   :  { %s2190_s17 = smov 0   ;;  %s2192_s18 = smov 0  }
   0x2   :  { %s2194_s19 = smov 0  }
   0x3 LB: > { %s26_s20 = sadd.s32 1, %s2153_s18  ;;  %p42_p1 = scmp.ne.s32.totalorder %s2145_s16, %s2141_s15  ;;  %s2157_s19 = sphi %s2194_s19, %s14_s19   ;;  %s2153_s18 = sphi %s2192_s18, %s2705_s18   ;;  %s2149_s17 = sphi %s2190_s17, %s2704_s17   ;;  %s2145_s16 = sphi %s2188_s16, %s2703_s16   ;;  %s2141_s15 = sphi %s2186_s15, %s2702_s15  }
   0x4   : > { %p28_p0 = scmp.ge.s32.totalorder %s26_s20, 2  ;;  %p43_p2 = scmp.eq.s32.totalorder %s2157_s19, 0 }
   0x5   : > { %s35_s22 = sadd.s32 1, %s2145_s16  ;;  %p1577_p5 = scmp.ge.s32.totalorder %s2157_s19, 2 }
   0x6   : > { %s2707_s20 = smov (%p28_p0, %s26_s20), 0  ;;  %p44_p3 = por %p43_p2, %p42_p1 }
   0x7   : > { %s32_s21 = ssub.s32 %s2153_s18, %s2707_s20  ;;  %170 = sbr.rel (%p1577_p5) target bundleno = 22 (0x16), region = 24 }
   0x8   : > { %p33_p4 = scmp.eq.s32.totalorder %s32_s21, 0 }
   0xa   : > { %s2221_s23 = scalar_select %p33_p4, %s2145_s16, %s35_s22  }
   0xe   : > { %173 = sbr.rel (!%p44_p3) target bundleno = 22 (0x16), region = 28  ;;  %s175_s24 = sand.u32 (%p44_p3), 1, %s2145_s16  }
   0xf   : > { %s1641_s25 = smul.u32 (%p44_p3), 24, %s2153_s18 }
  0x10   : > { %s1655_s26 = smul.u32 (%p44_p3), 48, %s175_s24 }
  0x11   : > { %s181_s29 = scalar_lea.vmem (%p44_p3), %s2697_s0, %s1641_s25 }
  0x12   : > { %v194_v0 = vld [vmem:[%s181_s29] sm:$0xff] (%p44_p3)  ;;  %v196_v1 = vld [vmem:[%s181_s29 + $0x8] sm:$0xff] (%p44_p3)  ;;  %v198_v2 = vld [vmem:[%s181_s29 + $0x10] sm:$0xff] (%p44_p3)  ;;  %s177_s30 = scalar_lea.vmem (%p44_p3), [#allocation2], %s1655_s26 }
  0x13   : > { %195 = vst [vmem:[%s177_s30] sm:$0xff] (%p44_p3), %v194_v0  ;;  %197 = vst [vmem:[%s177_s30 + $0x8] sm:$0xff] (%p44_p3), %v196_v1  ;;  %v200_v3 = vld [vmem:[%s181_s29 + $0x30] sm:$0xff] (%p44_p3)  ;;  %v202_v4 = vld [vmem:[%s181_s29 + $0x38] sm:$0xff] (%p44_p3) }
  0x14   : > { %199 = vst [vmem:[%s177_s30 + $0x10] sm:$0xff] (%p44_p3), %v198_v2  ;;  %v204_v5 = vld [vmem:[%s181_s29 + $0x40] sm:$0xff] (%p44_p3)  ;;  %201 = vst [vmem:[%s177_s30 + $0x18] sm:$0xff] (%p44_p3), %v200_v3 }
  0x15   : > { %203 = vst [vmem:[%s177_s30 + $0x20] sm:$0xff] %v202_v4  ;;  %205 = vst [vmem:[%s177_s30 + $0x28] sm:$0xff] %v204_v5 }
  0x16 PF: > { %p1579_p6 = scmp.ge.s32.totalorder %s2157_s19, 1  ;;  %p221_p7 = scmp.lt.s32.totalorder %s2157_s19, 3 }
  0x18   : > { %p222_p8 = pnand %p1579_p6, %p221_p7 }
  0x19   : > { %v1699_v6 = vld [vmem:[%s2699_s2 + $0x4] ss:$8 sps:$4 sm:$0xff] (!%p222_p8)   ;;  %s262_s7 = smul.u32 (!%p222_p8), 48, %s2149_s17  ;;  %v1701_v7 = vld [vmem:[%s2699_s2] ss:$8 sps:$4 sm:$0xff] (!%p222_p8)   ;;  %v2159_v8 = vmov (!%p222_p8), 0   ;;  %v341_v39 = vlaneseq (!%p222_p8) }
  0x1a   : > { %225 = sbr.rel (%p222_p8) target bundleno = 692 (0x2b4), region = 55  ;;  %616 = vmatprep.mubr.bf16.mxu0 (!%p222_p8), %v2159_v8  ;;  %766 = vmatprep.mubr.bf16.mxu1 (!%p222_p8), %v2159_v8  ;;  %v1702_v9 = vld [vmem:[%s2699_s2 + $0x14] ss:$8 sps:$4 sm:$0xff] (!%p222_p8)   ;;  %v1704_v10 = vld [vmem:[%s2699_s2 + $0x10] ss:$8 sps:$4 sm:$0xff] (!%p222_p8)   ;;  %vm511_vm0 = vcmask (!%p222_p8), 523264  }
  0x1b   : > { %584 = vmatprep.subr.bf16.mxu0 (!%p222_p8), %v1699_v6  ;;  %p263_p9 = scmp.lt.s32.totalorder (!%p222_p8), %s262_s7, 95  ;;  %1643 = vmatprep.subr.bf16.mxu1 (!%p222_p8), %v1699_v6  ;;  %v1705_v11 = vld [vmem:[%s2699_s2 + $0x24] ss:$8 sps:$4 sm:$0xff] (!%p222_p8)   ;;  %v1707_v12 = vld [vmem:[%s2699_s2 + $0x20] ss:$8 sps:$4 sm:$0xff] (!%p222_p8)   ;;  %v342_v40 = vshrl.u32 (!%p222_p8), %v341_v39, 7 }
  0x1c   : > { %585 = vmatpush1.bf16.msra.mxu0 (!%p222_p8), %v1701_v7  ;;  %1647 = vmatpush1.bf16.msra.mxu1 (!%p222_p8), %v1701_v7  ;;  %v1708_v13 = vld [vmem:[%s2699_s2 + $0x34] ss:$8 sps:$4 sm:$0xff] (!%p222_p8)   ;;  %v1710_v14 = vld [vmem:[%s2699_s2 + $0x30] ss:$8 sps:$4 sm:$0xff] (!%p222_p8)   ;;  %v339_v42 = vld [vmem:[%s2700_s3] sm:$0x3] (!%p222_p8) }
  0x1d   : > { %586 = vmatprep.subr.bf16.mxu0 (!%p222_p8), %v1702_v9  ;;  %1644 = vmatprep.subr.bf16.mxu1 (!%p222_p8), %v1702_v9  ;;  %v343_v41 = vsub.s32 (!%p222_p8), 0, %v342_v40  ;;  %v347_v43 = vsub.s32 (!%p222_p8), 1, %v342_v40  ;;  %s228_s9 = sand.u32 (!%p222_p8), 1, %s2141_s15   ;;  %p269_p10 = scmp.lt.s32.totalorder (!%p222_p8), %s2149_s17, 1 }
  0x1e   : > { %s2511_s15 = smul.u32 (!%p222_p8), 48, %s228_s9 }
  0x1f   : > { %v2336_v44 = vrot.slane (!%p222_p8), %v339_v42, %v343_v41  ;;  %v2338_v45 = vrot.slane (!%p222_p8), %v339_v42, %v347_v43 }
  0x20   : > { %587 = vmatpush1.bf16.msra.mxu0 (!%p222_p8), %v1704_v10  ;;  %1648 = vmatpush1.bf16.msra.mxu1 (!%p222_p8), %v1704_v10  ;;  %s2533_s10 = scalar_lea.vmem (!%p222_p8), [#allocation2], %s2511_s15 }
  0x21   : > { %s2709_s7 = smov (!%p263_p9, %s262_s7), 95  ;;  %588 = vmatprep.subr.bf16.mxu0 %v1705_v11  ;;  %1645 = vmatprep.subr.bf16.mxu1 %v1705_v11  ;;  %s2711_s17 = smov (!%p269_p10, %s2149_s17), 1 }
  0x22   : > { %s1580_s22 = sshll.u32 %s2709_s7, 2  ;;  %s1642_s11 = sshll.u32 %s2711_s17, 5 }
  0x23   : > { %s2255_s28 = scalar_lea.vmem %s2698_s1, %s1580_s22  ;;  %s2549_s13 = scalar_lea.vmem %s2701_s4, %s1642_s11 }
  0x24   : > { %589 = vmatpush1.bf16.msra.mxu0 %v1707_v12  ;;  %1649 = vmatpush1.bf16.msra.mxu1 %v1707_v12  ;;  %v1711_v15 = vld [vmem:[%s2255_s28] sm:$0xff]   ;;  %v1722_v16 = vld [vmem:[%s2255_s28 + $0x78] sm:$0xff]   ;;  %v1712_v17 = vld [vmem:[%s2255_s28 + $0x8] sm:$0xff]  }
  0x25   : > { %590 = vmatprep.subr.bf16.mxu0 %v1708_v13  ;;  %1646 = vmatprep.subr.bf16.mxu1 %v1708_v13  ;;  %v1724_v18 = vld [vmem:[%s2255_s28 + $0x80] sm:$0xff]   ;;  %v1713_v19 = vld [vmem:[%s2255_s28 + $0x10] sm:$0xff]   ;;  %v1726_v20 = vld [vmem:[%s2255_s28 + $0x88] sm:$0xff]  }
  0x26   : > { %v1714_v21 = vld [vmem:[%s2255_s28 + $0x18] sm:$0xff]   ;;  %v1728_v22 = vld [vmem:[%s2255_s28 + $0x90] sm:$0xff]   ;;  %v1715_v23 = vld [vmem:[%s2255_s28 + $0x20] sm:$0xff]  }
  0x27   : > { %v1730_v24 = vld [vmem:[%s2255_s28 + $0x98] sm:$0xff]   ;;  %v1716_v25 = vld [vmem:[%s2255_s28 + $0x28] sm:$0xff]   ;;  %v1731_v26 = vld [vmem:[%s2255_s28 + $0xa0] sm:$0xff]  }
  0x28   : > { %591 = vmatpush1.bf16.msra.mxu0 %v1710_v14  ;;  %1650 = vmatpush1.bf16.msra.mxu1 %v1710_v14  ;;  %v1717_v27 = vld [vmem:[%s2255_s28 + $0x30] sm:$0xff]   ;;  %v1732_v28 = vld [vmem:[%s2255_s28 + $0xa8] sm:$0xff]   ;;  %v1718_v29 = vld [vmem:[%s2255_s28 + $0x38] sm:$0xff]  }
  0x29   : > { %v1733_v30 = vld [vmem:[%s2255_s28 + $0xb0] sm:$0xff]   ;;  %v1719_v31 = vld [vmem:[%s2255_s28 + $0x40] sm:$0xff]   ;;  %v1734_v32 = vld [vmem:[%s2255_s28 + $0xb8] sm:$0xff]  }
  0x2a   : > { %v1720_v33 = vld [vmem:[%s2255_s28 + $0x48] sm:$0xff]   ;;  %v1721_v34 = vld [vmem:[%s2255_s28 + $0x50] sm:$0xff]   ;;  %v1723_v35 = vld [vmem:[%s2255_s28 + $0x58] sm:$0xff]  }
  0x2b   : > { %1615 = vmatmul.mubr.msk.bf16.vlgmr.msra.gmra.mrb[0].mxu0 %vm511_vm0, %v1711_v15  ;;  %1630 = vmatmul.mubr.msk.bf16.vlgmr.msra.gmra.mrb[0].mxu1 %vm511_vm0, %v1722_v16  ;;  %v1725_v36 = vld [vmem:[%s2255_s28 + $0x60] sm:$0xff]   ;;  %v1727_v37 = vld [vmem:[%s2255_s28 + $0x68] sm:$0xff]   ;;  %v1729_v38 = vld [vmem:[%s2255_s28 + $0x70] sm:$0xff]  }
  0x2c   : > { %626 = vmatprep.mubr.bf16.mxu0 %v2159_v8  ;;  %776 = vmatprep.mubr.bf16.mxu1 %v2159_v8 }
  0x33   : > { %1616 = vmatmul.mubr.msk.bf16.gmra.mrb[4].mxu0 %vm511_vm0, %v1712_v17  ;;  %1631 = vmatmul.mubr.msk.bf16.gmra.mrb[4].mxu1 %vm511_vm0, %v1724_v18 }
  0x34   : > { %636 = vmatprep.mubr.bf16.mxu0 %v2159_v8  ;;  %786 = vmatprep.mubr.bf16.mxu1 %v2159_v8 }
  0x3b   : > { %1617 = vmatmul.mubr.msk.bf16.gmra.mrb[8].mxu0 %vm511_vm0, %v1713_v19  ;;  %1632 = vmatmul.mubr.msk.bf16.gmra.mrb[8].mxu1 %vm511_vm0, %v1726_v20 }
  0x3c   : > { %646 = vmatprep.mubr.bf16.mxu0 %v2159_v8  ;;  %796 = vmatprep.mubr.bf16.mxu1 %v2159_v8 }
  0x43   : > { %1618 = vmatmul.mubr.msk.bf16.gmra.mrb[12].mxu0 %vm511_vm0, %v1714_v21  ;;  %1633 = vmatmul.mubr.msk.bf16.gmra.mrb[12].mxu1 %vm511_vm0, %v1728_v22 }
  0x44   : > { %656 = vmatprep.mubr.bf16.mxu0 %v2159_v8  ;;  %806 = vmatprep.mubr.bf16.mxu1 %v2159_v8 }
  0x4b   : > { %1619 = vmatmul.mubr.msk.bf16.gmra.mrb[16].mxu0 %vm511_vm0, %v1715_v23  ;;  %1634 = vmatmul.mubr.msk.bf16.gmra.mrb[16].mxu1 %vm511_vm0, %v1730_v24 }
  0x4c   : > { %666 = vmatprep.mubr.bf16.mxu0 %v2159_v8  ;;  %816 = vmatprep.mubr.bf16.mxu1 %v2159_v8 }
  0x53   : > { %1620 = vmatmul.mubr.msk.bf16.gmra.mrb[20].mxu0 %vm511_vm0, %v1716_v25  ;;  %1635 = vmatmul.mubr.msk.bf16.gmra.mrb[20].mxu1 %vm511_vm0, %v1731_v26 }
  0x54   : > { %676 = vmatprep.mubr.bf16.mxu0 %v2159_v8  ;;  %826 = vmatprep.mubr.bf16.mxu1 %v2159_v8 }
  0x5b   : > { %1621 = vmatmul.mubr.msk.bf16.gmra.mrb[24].mxu0 %vm511_vm0, %v1717_v27  ;;  %1636 = vmatmul.mubr.msk.bf16.gmra.mrb[24].mxu1 %vm511_vm0, %v1732_v28 }
  0x5c   : > { %686 = vmatprep.mubr.bf16.mxu0 %v2159_v8  ;;  %836 = vmatprep.mubr.bf16.mxu1 %v2159_v8 }
  0x63   : > { %1622 = vmatmul.mubr.msk.bf16.gmra.mrb[28].mxu0 %vm511_vm0, %v1718_v29  ;;  %1637 = vmatmul.mubr.msk.bf16.gmra.mrb[28].mxu1 %vm511_vm0, %v1733_v30 }
  0x64   : > { %696 = vmatprep.mubr.bf16.mxu0 %v2159_v8  ;;  %846 = vmatprep.mubr.bf16.mxu1 %v2159_v8 }
  0x6b   : > { %1623 = vmatmul.mubr.msk.bf16.gmra.mrb[32].mxu0 %vm511_vm0, %v1719_v31  ;;  %1638 = vmatmul.mubr.msk.bf16.gmra.mrb[32].mxu1 %vm511_vm0, %v1734_v32 }
  0x6c   : > { %706 = vmatprep.mubr.bf16.mxu0 %v2159_v8 }
  0x73   : > { %1624 = vmatmul.mubr.msk.bf16.gmra.mrb[36].mxu0 %vm511_vm0, %v1720_v33 }
  0x74   : > { %716 = vmatprep.mubr.bf16.mxu0 %v2159_v8 }
  0x7b   : > { %1625 = vmatmul.mubr.msk.bf16.gmra.mrb[40].mxu0 %vm511_vm0, %v1721_v34 }
  0x7c   : > { %726 = vmatprep.mubr.bf16.mxu0 %v2159_v8 }
  0x83   : > { %1626 = vmatmul.mubr.msk.bf16.gmra.mrb[44].mxu0 %vm511_vm0, %v1723_v35 }
  0x84   : > { %736 = vmatprep.mubr.bf16.mxu0 %v2159_v8 }
  0x8b   : > { %1627 = vmatmul.mubr.msk.bf16.gmra.mrb[48].mxu0 %vm511_vm0, %v1725_v36 }
  0x8c   : > { %746 = vmatprep.mubr.bf16.mxu0 %v2159_v8 }
  0x93   : > { %1628 = vmatmul.mubr.msk.bf16.gmra.mrb[52].mxu0 %vm511_vm0, %v1727_v37 }
  0x94   : > { %756 = vmatprep.mubr.bf16.mxu0 %v2159_v8 }
  0x9b   : > { %1629 = vmatmul.mubr.msk.bf16.gmra.mrb[56].mxu0 %vm511_vm0, %v1729_v38 }
  0xfe   : > { %v618_v46 = vpop.f32.mrb[0].mxu0  ;;  %v768_v54 = vpop.f32.mrb[0].mxu1 }
  0xff   : > { %v619_v47 = vadd.f32 %v618_v46, %v2336_v44  ;;  %v620_v48 = vpop.f32.mrb[1].mxu0  ;;  %v769_v57 = vadd.f32 %v768_v54, %v2336_v44  ;;  %v770_v58 = vpop.f32.mrb[1].mxu1 }
 0x100   : > { %v621_v49 = vadd.f32 %v620_v48, %v2338_v45  ;;  %v622_v50 = vpop.f32.mrb[2].mxu0  ;;  %v771_v61 = vadd.f32 %v770_v58, %v2338_v45  ;;  %v772_v62 = vpop.f32.mrb[2].mxu1 }
 0x101   : > { %v857_v51 = vsub.f32 0.0, %v619_v47  ;;  %v623_v52 = vadd.f32 %v622_v50, %v2336_v44  ;;  %v624_v53 = vpop.f32.mrb[3].mxu0  ;;  %v917_v1 = vsub.f32 0.0, %v769_v57  ;;  %v773_v2 = vadd.f32 %v772_v62, %v2336_v44  ;;  %v774_v3 = vpop.f32.mrb[3].mxu1 }
 0x102   : > { %v858_v55 = vsub.f32 0.0, %v621_v49  ;;  %v625_v56 = vadd.f32 %v624_v53, %v2338_v45  ;;  %v918_v5 = vsub.f32 0.0, %v771_v61  ;;  %v775_v6 = vadd.f32 %v774_v3, %v2338_v45 }
 0x103   : > { %v953_v59 = vmul.f32 1.442695, %v857_v51  ;;  %v859_v60 = vsub.f32 0.0, %v623_v52  ;;  %v1073_v10 = vmul.f32 1.442695, %v917_v1  ;;  %v919_v11 = vsub.f32 0.0, %v773_v2 }
 0x104   : > { %v955_v63 = vmul.f32 1.442695, %v858_v55  ;;  %v860_v0 = vsub.f32 0.0, %v625_v56  ;;  %v1075_v14 = vmul.f32 1.442695, %v918_v5  ;;  %v920_v15 = vsub.f32 0.0, %v775_v6 }
 0x105   : > { %1735 = vpow2.f32 %v953_v59  ;;  %v957_v4 = vmul.f32 1.442695, %v859_v60  ;;  %v1077_v18 = vmul.f32 1.442695, %v919_v11 }
 0x106   : > { %1737 = vpow2.f32 %v955_v63  ;;  %v959_v7 = vmul.f32 1.442695, %v860_v0  ;;  %v628_v9 = vpop.f32.mrb[4].mxu0  ;;  %v1079_v22 = vmul.f32 1.442695, %v920_v15  ;;  %v778_v23 = vpop.f32.mrb[4].mxu1 }
 0x107   : > { %1739 = vpow2.f32 %v957_v4  ;;  %v629_v12 = vadd.f32 %v628_v9, %v2336_v44  ;;  %v630_v13 = vpop.f32.mrb[5].mxu0  ;;  %v779_v26 = vadd.f32 %v778_v23, %v2336_v44  ;;  %v2353_v27 = vpop.f32.mrb[5].mxu1 }
 0x108   : > { %1741 = vpow2.f32 %v959_v7  ;;  %v631_v16 = vadd.f32 %v630_v13, %v2338_v45  ;;  %v632_v17 = vpop.f32.mrb[6].mxu0  ;;  %v2355_v30 = vpop.f32.mrb[6].mxu1 }
 0x109   : > { %v861_v19 = vsub.f32 0.0, %v629_v12  ;;  %v633_v20 = vadd.f32 %v632_v17, %v2336_v44  ;;  %v634_v21 = vpop.f32.mrb[7].mxu0  ;;  %1743 = vpow2.f32 %v1073_v10  ;;  %v921_v33 = vsub.f32 0.0, %v779_v26  ;;  %v2357_v34 = vpop.f32.mrb[7].mxu1 }
 0x10a   : > { %v862_v24 = vsub.f32 0.0, %v631_v16  ;;  %v635_v25 = vadd.f32 %v634_v21, %v2338_v45  ;;  %1745 = vpow2.f32 %v1075_v14 }
 0x10b   : > { %v961_v28 = vmul.f32 1.442695, %v861_v19  ;;  %v863_v29 = vsub.f32 0.0, %v633_v20  ;;  %1747 = vpow2.f32 %v1077_v18  ;;  %v1081_v38 = vmul.f32 1.442695, %v921_v33 }
 0x10c   : > { %v963_v31 = vmul.f32 1.442695, %v862_v24  ;;  %v864_v32 = vsub.f32 0.0, %v635_v25  ;;  %1749 = vpow2.f32 %v1079_v22 }
 0x10d   : > { %1751 = vpow2.f32 %v961_v28  ;;  %v965_v35 = vmul.f32 1.442695, %v863_v29 }
 0x10e   : > { %1753 = vpow2.f32 %v963_v31  ;;  %v967_v36 = vmul.f32 1.442695, %v864_v32  ;;  %v638_v37 = vpop.f32.mrb[8].mxu0  ;;  %v2362_v53 = vpop.f32.mrb[8].mxu1 }
 0x10f   : > { %v1736_v39 = vpop.eup %1735  ;;  %1755 = vpow2.f32 %v965_v35  ;;  %v639_v40 = vadd.f32 %v638_v37, %v2336_v44  ;;  %v640_v41 = vpop.f32.mrb[9].mxu0 }
 0x110   : > { %v1738_v42 = vpop.eup %1737  ;;  %v1145_v43 = vadd.f32 1.0, %v1736_v39  ;;  %1757 = vpow2.f32 %v967_v36  ;;  %v641_v46 = vadd.f32 %v640_v41, %v2338_v45  ;;  %v642_v47 = vpop.f32.mrb[10].mxu0 }
 0x111   : > { %v1740_v48 = vpop.eup %1739  ;;  %v1146_v49 = vadd.f32 1.0, %v1738_v42  ;;  %v865_v50 = vsub.f32 0.0, %v639_v40  ;;  %v643_v51 = vadd.f32 %v642_v47, %v2336_v44  ;;  %v644_v52 = vpop.f32.mrb[11].mxu0  ;;  %1759 = vpow2.f32 %v1081_v38 }
 0x112   : > { %v1742_v54 = vpop.eup %1741  ;;  %1761 = vrcp.f32 %v1145_v43  ;;  %v1147_v55 = vadd.f32 1.0, %v1740_v48  ;;  %v866_v56 = vsub.f32 0.0, %v641_v46  ;;  %v645_v57 = vadd.f32 %v644_v52, %v2338_v45  ;;  %v2365_v58 = vpop.f32.mrb[9].mxu1 }
 0x113   : > { %v1744_v59 = vpop.eup %1743  ;;  %1763 = vrcp.f32 %v1146_v49  ;;  %v1148_v60 = vadd.f32 1.0, %v1742_v54  ;;  %v969_v61 = vmul.f32 1.442695, %v865_v50  ;;  %v867_v62 = vsub.f32 0.0, %v643_v51  ;;  %v2367_v63 = vpop.f32.mrb[10].mxu1 }
 0x114   : > { %v2369_v0 = vpop.eup %1745  ;;  %1765 = vrcp.f32 %v1147_v55  ;;  %v971_v1 = vmul.f32 1.442695, %v866_v56  ;;  %v868_v2 = vsub.f32 0.0, %v645_v57  ;;  %v2371_v3 = vpop.f32.mrb[11].mxu1  ;;  %v1205_v47 = vadd.f32 1.0, %v1744_v59 }
 0x115   : > { %v2373_v4 = vpop.eup %1747  ;;  %1767 = vrcp.f32 %v1148_v60  ;;  %v973_v5 = vmul.f32 1.442695, %v867_v62 }
 0x116   : > { %v2375_v6 = vpop.eup %1749  ;;  %1769 = vpow2.f32 %v969_v61  ;;  %v975_v7 = vmul.f32 1.442695, %v868_v2  ;;  %v648_v9 = vpop.f32.mrb[12].mxu0 }
 0x117   : > { %v1752_v10 = vpop.eup %1751  ;;  %1771 = vpow2.f32 %v971_v1  ;;  %v649_v11 = vadd.f32 %v648_v9, %v2336_v44  ;;  %v650_v12 = vpop.f32.mrb[13].mxu0 }
 0x118   : > { %v1754_v13 = vpop.eup %1753  ;;  %v1149_v14 = vadd.f32 1.0, %v1752_v10  ;;  %1773 = vpow2.f32 %v973_v5  ;;  %v651_v15 = vadd.f32 %v650_v12, %v2338_v45  ;;  %v652_v16 = vpop.f32.mrb[14].mxu0 }
 0x119   : > { %v1756_v17 = vpop.eup %1755  ;;  %v1150_v18 = vadd.f32 1.0, %v1754_v13  ;;  %1775 = vpow2.f32 %v975_v7  ;;  %v869_v19 = vsub.f32 0.0, %v649_v11  ;;  %v653_v20 = vadd.f32 %v652_v16, %v2336_v44  ;;  %v654_v21 = vpop.f32.mrb[15].mxu0 }
 0x11a   : > { %v2380_v22 = vpop.f32.mrb[12].mxu1  ;;  %v1758_v23 = vpop.eup %1757  ;;  %1777 = vrcp.f32 %v1149_v14  ;;  %v1151_v24 = vadd.f32 1.0, %v1756_v17  ;;  %v870_v25 = vsub.f32 0.0, %v651_v15  ;;  %v655_v26 = vadd.f32 %v654_v21, %v2338_v45 }
 0x11b   : > { %v2383_v28 = vpop.f32.mrb[13].mxu1  ;;  %v2385_v29 = vpop.eup %1759  ;;  %1779 = vrcp.f32 %v1150_v18  ;;  %v1152_v31 = vadd.f32 1.0, %v1758_v23  ;;  %v977_v32 = vmul.f32 1.442695, %v869_v19  ;;  %v871_v33 = vsub.f32 0.0, %v653_v20 }
 0x11c   : > { %v2387_v35 = vpop.f32.mrb[14].mxu1  ;;  %v1762_v36 = vpop.eup %1761  ;;  %1781 = vrcp.f32 %v1151_v24  ;;  %v979_v37 = vmul.f32 1.442695, %v870_v25  ;;  %v872_v38 = vsub.f32 0.0, %v655_v26 }
 0x11d   : > { %v2389_v39 = vpop.f32.mrb[15].mxu1  ;;  %v1764_v40 = vpop.eup %1763  ;;  %1783 = vrcp.f32 %v1152_v31  ;;  %v981_v41 = vmul.f32 1.442695, %v871_v33 }
 0x11e   : > { %v1766_v42 = vpop.eup %1765  ;;  %1785 = vpow2.f32 %v977_v32  ;;  %v983_v43 = vmul.f32 1.442695, %v872_v38  ;;  %v658_v46 = vpop.f32.mrb[16].mxu0 }
 0x11f   : > { %v1768_v48 = vpop.eup %1767  ;;  %1787 = vpow2.f32 %v979_v37  ;;  %v659_v49 = vadd.f32 %v658_v46, %v2336_v44  ;;  %v660_v50 = vpop.f32.mrb[17].mxu0  ;;  %v1350_v51 = vpack.c.bf16 %v1766_v42, %v1762_v36 }
 0x120   : > { %v1770_v52 = vpop.eup %1769  ;;  %1789 = vpow2.f32 %v981_v41  ;;  %v661_v54 = vadd.f32 %v660_v50, %v2338_v45  ;;  %v662_v55 = vpop.f32.mrb[18].mxu0  ;;  %v1351_v56 = vpack.c.bf16 %v1768_v48, %v1764_v40 }
 0x121   : > { %v1772_v57 = vpop.eup %1771  ;;  %v1153_v60 = vadd.f32 1.0, %v1770_v52  ;;  %1791 = vpow2.f32 %v983_v43  ;;  %v873_v61 = vsub.f32 0.0, %v659_v49  ;;  %v663_v62 = vadd.f32 %v662_v55, %v2336_v44  ;;  %v664_v1 = vpop.f32.mrb[19].mxu0 }
 0x122   : > { %v2394_v59 = vpop.f32.mrb[16].mxu1  ;;  %v1774_v2 = vpop.eup %1773  ;;  %v1154_v5 = vadd.f32 1.0, %v1772_v57  ;;  %v874_v7 = vsub.f32 0.0, %v661_v54  ;;  %v665_v9 = vadd.f32 %v664_v1, %v2338_v45  ;;  %1398 = vmatprep.subr.bf16.mxu1 %v1351_v56  ;;  %1793 = vrcp.f32 %v1205_v47 }
 0x123   : > { %v2397_v10 = vpop.f32.mrb[17].mxu1  ;;  %v1776_v11 = vpop.eup %1775  ;;  %1795 = vrcp.f32 %v1153_v60  ;;  %v1155_v12 = vadd.f32 1.0, %v1774_v2  ;;  %v985_v13 = vmul.f32 1.442695, %v873_v61  ;;  %v875_v14 = vsub.f32 0.0, %v663_v62  ;;  %1399 = vmatpush1.bf16.msra.mxu1 %v1350_v51 }
 0x124   : > { %v2399_v15 = vpop.f32.mrb[18].mxu1  ;;  %v1778_v16 = vpop.eup %1777  ;;  %1797 = vrcp.f32 %v1154_v5  ;;  %v1156_v17 = vadd.f32 1.0, %v1776_v11  ;;  %v987_v18 = vmul.f32 1.442695, %v874_v7  ;;  %v876_v19 = vsub.f32 0.0, %v665_v9 }
 0x125   : > { %v2401_v20 = vpop.f32.mrb[19].mxu1  ;;  %v1780_v21 = vpop.eup %1779  ;;  %1799 = vrcp.f32 %v1155_v12  ;;  %v989_v23 = vmul.f32 1.442695, %v875_v14 }
 0x126   : > { %v1782_v24 = vpop.eup %1781  ;;  %1801 = vrcp.f32 %v1156_v17  ;;  %v991_v25 = vmul.f32 1.442695, %v876_v19  ;;  %v668_v26 = vpop.f32.mrb[20].mxu0 }
 0x127   : > { %v1784_v31 = vpop.eup %1783  ;;  %1803 = vpow2.f32 %v985_v13  ;;  %v669_v32 = vadd.f32 %v668_v26, %v2336_v44  ;;  %v670_v33 = vpop.f32.mrb[21].mxu0  ;;  %v1352_v36 = vpack.c.bf16 %v1782_v24, %v1778_v16 }
 0x128   : > { %v1786_v37 = vpop.eup %1785  ;;  %1805 = vpow2.f32 %v987_v18  ;;  %v671_v38 = vadd.f32 %v670_v33, %v2338_v45  ;;  %v672_v40 = vpop.f32.mrb[22].mxu0  ;;  %v1353_v41 = vpack.c.bf16 %v1784_v31, %v1780_v21  ;;  %v1206_v21 = vadd.f32 1.0, %v2369_v0 }
 0x129   : > { %v1788_v42 = vpop.eup %1787  ;;  %v1157_v43 = vadd.f32 1.0, %v1786_v37  ;;  %1807 = vpow2.f32 %v989_v23  ;;  %v877_v46 = vsub.f32 0.0, %v669_v32  ;;  %v673_v47 = vadd.f32 %v672_v40, %v2336_v44  ;;  %v674_v48 = vpop.f32.mrb[23].mxu0 }
 0x12a   : > { %v2406_v49 = vpop.f32.mrb[20].mxu1  ;;  %v1790_v50 = vpop.eup %1789  ;;  %v1158_v51 = vadd.f32 1.0, %v1788_v42  ;;  %1809 = vpow2.f32 %v991_v25  ;;  %v878_v52 = vsub.f32 0.0, %v671_v38  ;;  %v675_v54 = vadd.f32 %v674_v48, %v2338_v45  ;;  %1400 = vmatprep.subr.bf16.mxu1 %v1353_v41 }
 0x12b   : > { %v2409_v55 = vpop.f32.mrb[21].mxu1  ;;  %v1792_v56 = vpop.eup %1791  ;;  %1811 = vrcp.f32 %v1157_v43  ;;  %v1159_v57 = vadd.f32 1.0, %v1790_v50  ;;  %v993_v60 = vmul.f32 1.442695, %v877_v46  ;;  %v879_v61 = vsub.f32 0.0, %v673_v47  ;;  %1401 = vmatpush1.bf16.msra.mxu1 %v1352_v36 }
 0x12c   : > { %v2411_v62 = vpop.f32.mrb[22].mxu1  ;;  %v2413_v1 = vpop.eup %1793  ;;  %1813 = vrcp.f32 %v1158_v51  ;;  %v1160_v2 = vadd.f32 1.0, %v1792_v56  ;;  %v995_v5 = vmul.f32 1.442695, %v878_v52  ;;  %v880_v7 = vsub.f32 0.0, %v675_v54 }
 0x12d   : > { %v2415_v9 = vpop.f32.mrb[23].mxu1  ;;  %v1796_v11 = vpop.eup %1795  ;;  %1815 = vrcp.f32 %v1159_v57  ;;  %v997_v12 = vmul.f32 1.442695, %v879_v61 }
 0x12e   : > { %v1798_v13 = vpop.eup %1797  ;;  %1817 = vrcp.f32 %v1160_v2  ;;  %v999_v14 = vmul.f32 1.442695, %v880_v7  ;;  %v678_v16 = vpop.f32.mrb[24].mxu0 }
 0x12f   : > { %v1800_v17 = vpop.eup %1799  ;;  %1819 = vpow2.f32 %v993_v60  ;;  %v679_v18 = vadd.f32 %v678_v16, %v2336_v44  ;;  %v680_v19 = vpop.f32.mrb[25].mxu0 }
 0x130   : > { %v1802_v23 = vpop.eup %1801  ;;  %1821 = vpow2.f32 %v995_v5  ;;  %v681_v24 = vadd.f32 %v680_v19, %v2338_v45  ;;  %v682_v25 = vpop.f32.mrb[26].mxu0  ;;  %v1354_v26 = vpack.c.bf16 %v1800_v17, %v1796_v11 }
 0x131   : > { %v1804_v31 = vpop.eup %1803  ;;  %1823 = vpow2.f32 %v997_v12  ;;  %v881_v32 = vsub.f32 0.0, %v679_v18  ;;  %v683_v33 = vadd.f32 %v682_v25, %v2336_v44  ;;  %v684_v36 = vpop.f32.mrb[27].mxu0  ;;  %v1355_v37 = vpack.c.bf16 %v1802_v23, %v1798_v13 }
 0x132   : > { %v2421_v38 = vpop.f32.mrb[24].mxu1  ;;  %v1806_v40 = vpop.eup %1805  ;;  %v1161_v41 = vadd.f32 1.0, %v1804_v31  ;;  %1825 = vpow2.f32 %v999_v14  ;;  %v882_v42 = vsub.f32 0.0, %v681_v24  ;;  %v685_v0 = vadd.f32 %v684_v36, %v2338_v45 }
 0x133   : > { %v2424_v43 = vpop.f32.mrb[25].mxu1  ;;  %v1808_v46 = vpop.eup %1807  ;;  %v1162_v47 = vadd.f32 1.0, %v1806_v40  ;;  %v883_v48 = vsub.f32 0.0, %v683_v33  ;;  %1402 = vmatprep.subr.bf16.mxu1 %v1355_v37  ;;  %1827 = vrcp.f32 %v1206_v21  ;;  %v1001_v54 = vmul.f32 1.442695, %v881_v32 }
 0x134   : > { %v2426_v50 = vpop.f32.mrb[26].mxu1  ;;  %v1810_v51 = vpop.eup %1809  ;;  %1829 = vrcp.f32 %v1161_v41  ;;  %v1163_v52 = vadd.f32 1.0, %v1808_v46  ;;  %v884_v56 = vsub.f32 0.0, %v685_v0  ;;  %1403 = vmatpush1.bf16.msra.mxu1 %v1354_v26  ;;  %v1003_v2 = vmul.f32 1.442695, %v882_v42 }
 0x135   : > { %v2428_v57 = vpop.f32.mrb[27].mxu1  ;;  %v1812_v60 = vpop.eup %1811  ;;  %1831 = vrcp.f32 %v1162_v47  ;;  %v1164_v61 = vadd.f32 1.0, %v1810_v51  ;;  %v1005_v7 = vmul.f32 1.442695, %v883_v48 }
 0x136   : > { %v1814_v5 = vpop.eup %1813  ;;  %1833 = vrcp.f32 %v1163_v52  ;;  %v688_v11 = vpop.f32.mrb[28].mxu0  ;;  %v1007_v13 = vmul.f32 1.442695, %v884_v56 }
 0x137   : > { %v1816_v12 = vpop.eup %1815  ;;  %1835 = vrcp.f32 %v1164_v61  ;;  %v689_v14 = vadd.f32 %v688_v11, %v2336_v44  ;;  %v690_v16 = vpop.f32.mrb[29].mxu0 }
 0x138   : > { %v1818_v17 = vpop.eup %1817  ;;  %1837 = vpow2.f32 %v1001_v54  ;;  %v691_v18 = vadd.f32 %v690_v16, %v2338_v45  ;;  %v692_v19 = vpop.f32.mrb[30].mxu0  ;;  %v1356_v21 = vpack.c.bf16 %v1816_v12, %v1812_v60 }
 0x139   : > { %v1820_v23 = vpop.eup %1819  ;;  %1839 = vpow2.f32 %v1003_v2  ;;  %v885_v24 = vsub.f32 0.0, %v689_v14  ;;  %v693_v25 = vadd.f32 %v692_v19, %v2336_v44  ;;  %v694_v26 = vpop.f32.mrb[31].mxu0  ;;  %v1357_v31 = vpack.c.bf16 %v1818_v17, %v1814_v5 }
 0x13a   : > { %v2433_v32 = vpop.f32.mrb[28].mxu1  ;;  %v1822_v33 = vpop.eup %1821  ;;  %v1165_v36 = vadd.f32 1.0, %v1820_v23  ;;  %1841 = vpow2.f32 %v1005_v7  ;;  %v886_v37 = vsub.f32 0.0, %v691_v18  ;;  %v695_v40 = vadd.f32 %v694_v26, %v2338_v45 }
 0x13b   : > { %v2436_v41 = vpop.f32.mrb[29].mxu1  ;;  %v1824_v42 = vpop.eup %1823  ;;  %v1166_v0 = vadd.f32 1.0, %v1822_v33  ;;  %1843 = vpow2.f32 %v1007_v13  ;;  %v887_v46 = vsub.f32 0.0, %v693_v25  ;;  %1404 = vmatprep.subr.bf16.mxu1 %v1357_v31  ;;  %v1009_v52 = vmul.f32 1.442695, %v885_v24 }
 0x13c   : > { %v2438_v47 = vpop.f32.mrb[30].mxu1  ;;  %v1826_v48 = vpop.eup %1825  ;;  %1845 = vrcp.f32 %v1165_v36  ;;  %v1167_v51 = vadd.f32 1.0, %v1824_v42  ;;  %v888_v54 = vsub.f32 0.0, %v695_v40  ;;  %1405 = vmatpush1.bf16.msra.mxu1 %v1356_v21  ;;  %v1011_v2 = vmul.f32 1.442695, %v886_v37 }
 0x13d   : > { %v2440_v56 = vpop.f32.mrb[31].mxu1  ;;  %v2442_v60 = vpop.eup %1827  ;;  %1847 = vrcp.f32 %v1166_v0  ;;  %v1168_v61 = vadd.f32 1.0, %v1826_v48  ;;  %v1013_v7 = vmul.f32 1.442695, %v887_v46  ;;  %v1207_v21 = vadd.f32 1.0, %v2373_v4 }
 0x13e   : > { %v1830_v5 = vpop.eup %1829  ;;  %1849 = vrcp.f32 %v1167_v51  ;;  %v698_v11 = vpop.f32.mrb[32].mxu0  ;;  %v1015_v13 = vmul.f32 1.442695, %v888_v54 }
 0x13f   : > { %v1832_v12 = vpop.eup %1831  ;;  %1851 = vrcp.f32 %v1168_v61  ;;  %v699_v14 = vadd.f32 %v698_v11, %v2336_v44  ;;  %v700_v16 = vpop.f32.mrb[33].mxu0 }
 0x140   : > { %v1834_v17 = vpop.eup %1833  ;;  %1853 = vpow2.f32 %v1009_v52  ;;  %v701_v18 = vadd.f32 %v700_v16, %v2338_v45  ;;  %v702_v19 = vpop.f32.mrb[34].mxu0 }
 0x141   : > { %v1836_v23 = vpop.eup %1835  ;;  %1855 = vpow2.f32 %v1011_v2  ;;  %v889_v24 = vsub.f32 0.0, %v699_v14  ;;  %v703_v25 = vadd.f32 %v702_v19, %v2336_v44  ;;  %v704_v26 = vpop.f32.mrb[35].mxu0  ;;  %v1358_v31 = vpack.c.bf16 %v1834_v17, %v1830_v5 }
 0x142   : > { %v2448_v33 = vpop.f32.mrb[32].mxu1  ;;  %v1838_v36 = vpop.eup %1837  ;;  %1857 = vpow2.f32 %v1013_v7  ;;  %v890_v37 = vsub.f32 0.0, %v701_v18  ;;  %v705_v40 = vadd.f32 %v704_v26, %v2338_v45  ;;  %v1359_v42 = vpack.c.bf16 %v1836_v23, %v1832_v12 }
 0x143   : > { %v2451_v0 = vpop.f32.mrb[33].mxu1  ;;  %v1840_v46 = vpop.eup %1839  ;;  %v1169_v48 = vadd.f32 1.0, %v1838_v36  ;;  %1859 = vpow2.f32 %v1015_v13  ;;  %v891_v4 = vsub.f32 0.0, %v703_v25  ;;  %v1017_v11 = vmul.f32 1.442695, %v889_v24 }
 0x144   : > { %v2453_v51 = vpop.f32.mrb[34].mxu1  ;;  %v1842_v52 = vpop.eup %1841  ;;  %v1170_v54 = vadd.f32 1.0, %v1840_v46  ;;  %v892_v61 = vsub.f32 0.0, %v705_v40  ;;  %1406 = vmatprep.subr.bf16.mxu1 %v1359_v42  ;;  %1861 = vrcp.f32 %v1207_v21  ;;  %v1019_v16 = vmul.f32 1.442695, %v890_v37 }
 0x145   : > { %v2455_v2 = vpop.f32.mrb[35].mxu1  ;;  %v1844_v5 = vpop.eup %1843  ;;  %1863 = vrcp.f32 %v1169_v48  ;;  %v1171_v7 = vadd.f32 1.0, %v1842_v52  ;;  %1407 = vmatpush1.bf16.msra.mxu1 %v1358_v31  ;;  %v1021_v18 = vmul.f32 1.442695, %v891_v4 }
 0x146   : > { %v1846_v12 = vpop.eup %1845  ;;  %1865 = vrcp.f32 %v1170_v54  ;;  %v1172_v14 = vadd.f32 1.0, %v1844_v5  ;;  %v708_v13 = vpop.f32.mrb[36].mxu0  ;;  %v1023_v21 = vmul.f32 1.442695, %v892_v61 }
 0x147   : > { %v1848_v17 = vpop.eup %1847  ;;  %1867 = vrcp.f32 %v1171_v7  ;;  %v709_v19 = vadd.f32 %v708_v13, %v2336_v44  ;;  %v710_v23 = vpop.f32.mrb[37].mxu0 }
 0x148   : > { %v1850_v25 = vpop.eup %1849  ;;  %1869 = vrcp.f32 %v1172_v14  ;;  %v711_v26 = vadd.f32 %v710_v23, %v2338_v45  ;;  %v712_v36 = vpop.f32.mrb[38].mxu0 }
 0x149   : > { %v1852_v40 = vpop.eup %1851  ;;  %1871 = vpow2.f32 %v1017_v11  ;;  %v893_v24 = vsub.f32 0.0, %v709_v19  ;;  %v713_v31 = vadd.f32 %v712_v36, %v2336_v44  ;;  %v714_v42 = vpop.f32.mrb[39].mxu0  ;;  %v1360_v37 = vpack.c.bf16 %v1850_v25, %v1846_v12 }
 0x14a   : > { %v1854_v46 = vpop.eup %1853  ;;  %1873 = vpow2.f32 %v1019_v16  ;;  %v894_v48 = vsub.f32 0.0, %v711_v26  ;;  %v715_v4 = vadd.f32 %v714_v42, %v2338_v45  ;;  %v1361_v52 = vpack.c.bf16 %v1852_v40, %v1848_v17 }
 0x14b   : > { %v1856_v54 = vpop.eup %1855  ;;  %v1173_v5 = vadd.f32 1.0, %v1854_v46  ;;  %1875 = vpow2.f32 %v1021_v18  ;;  %v895_v61 = vsub.f32 0.0, %v713_v31  ;;  %v1025_v23 = vmul.f32 1.442695, %v893_v24 }
 0x14c   : > { %v1858_v7 = vpop.eup %1857  ;;  %v1174_v14 = vadd.f32 1.0, %v1856_v54  ;;  %1877 = vpow2.f32 %v1023_v21  ;;  %v896_v13 = vsub.f32 0.0, %v715_v4  ;;  %1408 = vmatprep.subr.bf16.mxu1 %v1361_v52  ;;  %v1027_v25 = vmul.f32 1.442695, %v894_v48 }
 0x14d   : > { %v1860_v11 = vpop.eup %1859  ;;  %1879 = vrcp.f32 %v1173_v5  ;;  %v1175_v19 = vadd.f32 1.0, %v1858_v7  ;;  %1409 = vmatpush1.bf16.msra.mxu1 %v1360_v37  ;;  %v1029_v18 = vmul.f32 1.442695, %v895_v61 }
 0x14e   : > { %v2461_v12 = vpop.eup %1861  ;;  %1881 = vrcp.f32 %v1174_v14  ;;  %v1176_v16 = vadd.f32 1.0, %v1860_v11  ;;  %v718_v17 = vpop.f32.mrb[40].mxu0  ;;  %v1031_v31 = vmul.f32 1.442695, %v896_v13 }
 0x14f   : > { %v1864_v26 = vpop.eup %1863  ;;  %1883 = vrcp.f32 %v1175_v19  ;;  %v719_v36 = vadd.f32 %v718_v17, %v2336_v44  ;;  %v720_v40 = vpop.f32.mrb[41].mxu0 }
 0x150   : > { %v1866_v21 = vpop.eup %1865  ;;  %1885 = vrcp.f32 %v1176_v16  ;;  %v721_v42 = vadd.f32 %v720_v40, %v2338_v45  ;;  %v722_v46 = vpop.f32.mrb[42].mxu0 }
 0x151   : > { %v1868_v24 = vpop.eup %1867  ;;  %1887 = vpow2.f32 %v1025_v23  ;;  %v897_v37 = vsub.f32 0.0, %v719_v36  ;;  %v723_v4 = vadd.f32 %v722_v46, %v2336_v44  ;;  %v724_v52 = vpop.f32.mrb[43].mxu0 }
 0x152   : > { %v1870_v48 = vpop.eup %1869  ;;  %1889 = vpow2.f32 %v1027_v25  ;;  %v898_v54 = vsub.f32 0.0, %v721_v42  ;;  %v725_v5 = vadd.f32 %v724_v52, %v2338_v45  ;;  %v1362_v61 = vpack.c.bf16 %v1868_v24, %v1864_v26 }
 0x153   : > { %v1872_v7 = vpop.eup %1871  ;;  %1891 = vpow2.f32 %v1029_v18  ;;  %v1033_v14 = vmul.f32 1.442695, %v897_v37  ;;  %v899_v11 = vsub.f32 0.0, %v723_v4  ;;  %v1363_v13 = vpack.c.bf16 %v1870_v48, %v1866_v21 }
 0x154   : > { %v1874_v19 = vpop.eup %1873  ;;  %v1177_v16 = vadd.f32 1.0, %v1872_v7  ;;  %1893 = vpow2.f32 %v1031_v31  ;;  %v900_v17 = vsub.f32 0.0, %v725_v5  ;;  %v1035_v42 = vmul.f32 1.442695, %v898_v54 }
 0x155   : > { %v1876_v23 = vpop.eup %1875  ;;  %v1178_v36 = vadd.f32 1.0, %v1874_v19  ;;  %1895 = vpow2.f32 %v1033_v14  ;;  %1410 = vmatprep.subr.bf16.mxu1 %v1363_v13  ;;  %v1037_v24 = vmul.f32 1.442695, %v899_v11  ;;  %v1208_v7 = vadd.f32 1.0, %v2375_v6 }
 0x156   : > { %v1878_v40 = vpop.eup %1877  ;;  %1897 = vrcp.f32 %v1177_v16  ;;  %v1179_v25 = vadd.f32 1.0, %v1876_v23  ;;  %1411 = vmatpush1.bf16.msra.mxu1 %v1362_v61  ;;  %v728_v46 = vpop.f32.mrb[44].mxu0  ;;  %v1039_v31 = vmul.f32 1.442695, %v900_v17  ;;  %v781_v6 = vadd.f32 %v2353_v27, %v2338_v45 }
 0x157   : > { %v1880_v26 = vpop.eup %1879  ;;  %1899 = vrcp.f32 %v1178_v36  ;;  %v1180_v18 = vadd.f32 1.0, %v1878_v40  ;;  %v729_v21 = vadd.f32 %v728_v46, %v2336_v44  ;;  %v730_v37 = vpop.f32.mrb[45].mxu0  ;;  %v783_v27 = vadd.f32 %v2355_v30, %v2336_v44 }
 0x158   : > { %v1882_v4 = vpop.eup %1881  ;;  %1901 = vrcp.f32 %v1179_v25  ;;  %v731_v52 = vadd.f32 %v730_v37, %v2338_v45  ;;  %v732_v48 = vpop.f32.mrb[46].mxu0 }
 0x159   : > { %v1884_v5 = vpop.eup %1883  ;;  %1903 = vrcp.f32 %v1180_v18  ;;  %v733_v54 = vadd.f32 %v732_v48, %v2336_v44  ;;  %v734_v61 = vpop.f32.mrb[47].mxu0  ;;  %v901_v19 = vsub.f32 0.0, %v729_v21 }
 0x15a   : > { %v1886_v14 = vpop.eup %1885  ;;  %1905 = vpow2.f32 %v1035_v42  ;;  %v1364_v13 = vpack.c.bf16 %v1884_v5, %v1880_v26  ;;  %v902_v17 = vsub.f32 0.0, %v731_v52  ;;  %v735_v26 = vadd.f32 %v734_v61, %v2338_v45 }
 0x15b   : > { %v1888_v11 = vpop.eup %1887  ;;  %1907 = vpow2.f32 %v1037_v24  ;;  %v1365_v16 = vpack.c.bf16 %v1886_v14, %v1882_v4  ;;  %v903_v46 = vsub.f32 0.0, %v733_v54  ;;  %v1041_v4 = vmul.f32 1.442695, %v901_v19 }
 0x15c   : > { %v1890_v23 = vpop.eup %1889  ;;  %v1181_v36 = vadd.f32 1.0, %v1888_v11  ;;  %1909 = vpow2.f32 %v1039_v31  ;;  %v1043_v5 = vmul.f32 1.442695, %v902_v17  ;;  %v922_v11 = vsub.f32 0.0, %v781_v6 }
 0x15d   : > { %v1892_v40 = vpop.eup %1891  ;;  %v1182_v25 = vadd.f32 1.0, %v1890_v23  ;;  %1911 = vrcp.f32 %v1208_v7  ;;  %1412 = vmatprep.subr.bf16.mxu1 %v1365_v16  ;;  %v1045_v14 = vmul.f32 1.442695, %v903_v46  ;;  %v785_v61 = vadd.f32 %v2357_v34, %v2338_v45 }
 0x15e   : > { %v1894_v18 = vpop.eup %1893  ;;  %1913 = vrcp.f32 %v1181_v36  ;;  %v1183_v42 = vadd.f32 1.0, %v1892_v40  ;;  %1413 = vmatpush1.bf16.msra.mxu1 %v1364_v13  ;;  %v738_v24 = vpop.f32.mrb[48].mxu0  ;;  %v1209_v19 = vadd.f32 1.0, %v2385_v29  ;;  %v904_v23 = vsub.f32 0.0, %v735_v26 }
 0x15f   : > { %v1896_v21 = vpop.eup %1895  ;;  %1915 = vrcp.f32 %v1182_v25  ;;  %v1184_v37 = vadd.f32 1.0, %v1894_v18  ;;  %v740_v31 = vpop.f32.mrb[49].mxu0  ;;  %v739_v36 = vadd.f32 %v738_v24, %v2336_v44  ;;  %v923_v46 = vsub.f32 0.0, %v783_v27 }
 0x160   : > { %v1898_v52 = vpop.eup %1897  ;;  %1917 = vrcp.f32 %v1183_v42  ;;  %v1185_v48 = vadd.f32 1.0, %v1896_v21  ;;  %v742_v7 = vpop.f32.mrb[50].mxu0  ;;  %v741_v30 = vadd.f32 %v740_v31, %v2338_v45  ;;  %v1083_v34 = vmul.f32 1.442695, %v922_v11 }
 0x161   : > { %v1900_v54 = vpop.eup %1899  ;;  %1919 = vrcp.f32 %v1184_v37  ;;  %v744_v13 = vpop.f32.mrb[51].mxu0  ;;  %v924_v21 = vsub.f32 0.0, %v785_v61  ;;  %v1047_v29 = vmul.f32 1.442695, %v904_v23  ;;  %v905_v26 = vsub.f32 0.0, %v739_v36 }
 0x162   : > { %v1902_v16 = vpop.eup %1901  ;;  %1921 = vrcp.f32 %v1185_v48  ;;  %v789_v11 = vadd.f32 %v2362_v53, %v2336_v44  ;;  %v745_v23 = vadd.f32 %v744_v13, %v2338_v45 }
 0x163   : > { %v1904_v17 = vpop.eup %1903  ;;  %1923 = vpow2.f32 %v1041_v4  ;;  %v1366_v40 = vpack.c.bf16 %v1902_v16, %v1898_v52  ;;  %v906_v52 = vsub.f32 0.0, %v741_v30  ;;  %v791_v30 = vadd.f32 %v2365_v58, %v2338_v45 }
 0x164   : > { %v1906_v25 = vpop.eup %1905  ;;  %1925 = vpow2.f32 %v1043_v5  ;;  %v1367_v6 = vpack.c.bf16 %v1904_v17, %v1900_v54  ;;  %v743_v5 = vadd.f32 %v742_v7, %v2336_v44  ;;  %v1049_v7 = vmul.f32 1.442695, %v905_v26 }
 0x165   : > { %v1908_v18 = vpop.eup %1907  ;;  %v1186_v42 = vadd.f32 1.0, %v1906_v25  ;;  %1927 = vpow2.f32 %v1045_v14  ;;  %v1085_v14 = vmul.f32 1.442695, %v923_v46  ;;  %v1051_v25 = vmul.f32 1.442695, %v906_v52 }
 0x166   : > { %v1910_v37 = vpop.eup %1909  ;;  %v1187_v48 = vadd.f32 1.0, %v1908_v18  ;;  %1929 = vrcp.f32 %v1209_v19  ;;  %1414 = vmatprep.subr.bf16.mxu1 %v1367_v6  ;;  %v2481_v24 = vpop.f32.mrb[52].mxu0  ;;  %v1087_v19 = vmul.f32 1.442695, %v924_v21  ;;  %v907_v53 = vsub.f32 0.0, %v743_v5 }
 0x167   : > { %v2483_v4 = vpop.eup %1911  ;;  %1931 = vrcp.f32 %v1186_v42  ;;  %v1188_v31 = vadd.f32 1.0, %v1910_v37  ;;  %1415 = vmatpush1.bf16.msra.mxu1 %v1366_v40  ;;  %v2486_v27 = vpop.f32.mrb[53].mxu0  ;;  %v925_v18 = vsub.f32 0.0, %v789_v11  ;;  %v908_v13 = vsub.f32 0.0, %v745_v23 }
 0x168   : > { %v1914_v54 = vpop.eup %1913  ;;  %1933 = vrcp.f32 %v1187_v48  ;;  %v2490_v61 = vpop.f32.mrb[54].mxu0  ;;  %v793_v52 = vadd.f32 %v2367_v63, %v2336_v44 }
 0x169   : > { %v1916_v16 = vpop.eup %1915  ;;  %1935 = vrcp.f32 %v1188_v31  ;;  %v2493_v36 = vpop.f32.mrb[55].mxu0  ;;  %v1053_v31 = vmul.f32 1.442695, %v907_v53  ;;  %v1089_v11 = vmul.f32 1.442695, %v925_v18  ;;  %v749_v53 = vadd.f32 %v2481_v24, %v2336_v44 }
 0x16a   : > { %v1918_v17 = vpop.eup %1917  ;;  %1937 = vpow2.f32 %v1047_v29  ;;  %v926_v29 = vsub.f32 0.0, %v791_v30  ;;  %v1055_v23 = vmul.f32 1.442695, %v908_v13  ;;  %v795_v30 = vadd.f32 %v2371_v3, %v2338_v45 }
 0x16b   : > { %v1920_v40 = vpop.eup %1919  ;;  %1939 = vpow2.f32 %v1083_v34  ;;  %v1368_v46 = vpack.c.bf16 %v1918_v17, %v1914_v54 }
 0x16c   : > { %v1922_v6 = vpop.eup %1921  ;;  %1941 = vpow2.f32 %v1085_v14  ;;  %v1369_v42 = vpack.c.bf16 %v1920_v40, %v1916_v16  ;;  %v928_v3 = vsub.f32 0.0, %v795_v30 }
 0x16d   : > { %v1924_v21 = vpop.eup %1923  ;;  %1943 = vpow2.f32 %v1087_v19 }
 0x16e   : > { %v1926_v37 = vpop.eup %1925  ;;  %v1189_v48 = vadd.f32 1.0, %v1924_v21  ;;  %1945 = vpow2.f32 %v1049_v7  ;;  %1416 = vmatprep.subr.bf16.mxu1 %v1369_v42  ;;  %v2497_v58 = vpop.f32.mrb[56].mxu0  ;;  %v1091_v7 = vmul.f32 1.442695, %v926_v29  ;;  %v2524_v29 = vadd.f32 %v2380_v22, %v2336_v44  ;;  %v1342_v22 = vld [vmem:[%s2533_s10 + $0x8] sm:$0xff] }
 0x16f   : > { %v1928_v34 = vpop.eup %1927  ;;  %v1190_v26 = vadd.f32 1.0, %v1926_v37  ;;  %1947 = vpow2.f32 %v1051_v25  ;;  %1417 = vmatpush1.bf16.msra.mxu1 %v1368_v46  ;;  %v2502_v5 = vpop.f32.mrb[57].mxu0  ;;  %v927_v25 = vsub.f32 0.0, %v793_v52 }
 0x170   : > { %v2504_v54 = vpop.eup %1929  ;;  %1949 = vrcp.f32 %v1189_v48  ;;  %v1191_v14 = vadd.f32 1.0, %v1928_v34  ;;  %v2506_v16 = vpop.f32.mrb[58].mxu0 }
 0x171   : > { %v1932_v19 = vpop.eup %1931  ;;  %1951 = vrcp.f32 %v1190_v26  ;;  %v2509_v17 = vpop.f32.mrb[59].mxu0  ;;  %v1093_v34 = vmul.f32 1.442695, %v927_v25  ;;  %v909_v26 = vsub.f32 0.0, %v749_v53  ;;  %v755_v25 = vadd.f32 %v2493_v36, %v2338_v45 }
 0x172   : > { %v1934_v63 = vpop.eup %1933  ;;  %1953 = vrcp.f32 %v1191_v14  ;;  %v751_v14 = vadd.f32 %v2486_v27, %v2338_v45  ;;  %v1381_v27 = vpack.c.bf16 %v2483_v4, %v2442_v60  ;;  %v803_v36 = vadd.f32 %v2387_v35, %v2336_v44 }
 0x173   : > { %v1936_v40 = vpop.eup %1935  ;;  %1955 = vpow2.f32 %v1053_v31  ;;  %v1370_v46 = vpack.c.bf16 %v1934_v63, %v1922_v6 }
 0x174   : > { %v1938_v18 = vpop.eup %1937  ;;  %1957 = vpow2.f32 %v1089_v11  ;;  %v1371_v42 = vpack.c.bf16 %v1936_v40, %v1932_v19  ;;  %v2530_v11 = vadd.f32 %v2383_v28, %v2338_v45  ;;  %v1345_v19 = vld [vmem:[%s2533_s10 + $0x20] sm:$0x3]  ;;  %v1095_v40 = vmul.f32 1.442695, %v928_v3 }
 0x175   : > { %v1940_v21 = vpop.eup %1939  ;;  %v1192_v13 = vadd.f32 1.0, %v1938_v18  ;;  %1959 = vpow2.f32 %v1055_v23  ;;  %v1380_v18 = vpack.c.bf16 %v2461_v12, %v2413_v1 }
 0x176   : > { %v1942_v37 = vpop.eup %1941  ;;  %v1210_v48 = vadd.f32 1.0, %v1940_v21  ;;  %1961 = vpow2.f32 %v1091_v7  ;;  %1418 = vmatprep.subr.bf16.mxu1 %v1371_v42  ;;  %v753_v7 = vadd.f32 %v2490_v61, %v2336_v44  ;;  %v1348_v42 = vpack.c.bf16 %v1345_v19, %v1342_v22 }
 0x177   : > { %v1944_v24 = vpop.eup %1943  ;;  %1963 = vrcp.f32 %v1192_v13  ;;  %v1211_v6 = vadd.f32 1.0, %v1942_v37  ;;  %1419 = vmatpush1.bf16.msra.mxu1 %v1370_v46  ;;  %v1057_v46 = vmul.f32 1.442695, %v909_v26  ;;  %v910_v21 = vsub.f32 0.0, %v751_v14 }
 0x178   : > { %v1946_v31 = vpop.eup %1945  ;;  %1965 = vrcp.f32 %v1210_v48  ;;  %v1212_v52 = vadd.f32 1.0, %v1944_v24  ;;  %v911_v37 = vsub.f32 0.0, %v753_v7  ;;  %1430 = vmatprep.mubr.bf16.mxu1 %v1348_v42  ;;  %v2160_v26 = vmov 0.0  }
 0x179   : > { %v1948_v23 = vpop.eup %1947  ;;  %1967 = vrcp.f32 %v1211_v6  ;;  %v1193_v63 = vadd.f32 1.0, %v1946_v31  ;;  %v929_v6 = vsub.f32 0.0, %v2524_v29  ;;  %281 = vst [vmem:[%s2549_s13 + $0x10] sm:$0x3] %v2160_v26  ;;  %282 = vst [vmem:[%s2549_s13 + $0x18] sm:$0x3] %v2160_v26 }
 0x17a   : > { %v1950_v30 = vpop.eup %1949  ;;  %1969 = vrcp.f32 %v1212_v52  ;;  %v1194_v28 = vadd.f32 1.0, %v1948_v23  ;;  %v912_v14 = vsub.f32 0.0, %v755_v25  ;;  %v930_v22 = vsub.f32 0.0, %v2530_v11 }
 0x17b   : > { %v1952_v53 = vpop.eup %1951  ;;  %1971 = vrcp.f32 %v1193_v63  ;;  %v1059_v19 = vmul.f32 1.442695, %v910_v21  ;;  %v805_v23 = vadd.f32 %v2389_v39, %v2338_v45  ;;  %v1061_v29 = vmul.f32 1.442695, %v911_v37 }
 0x17c   : > { %v1954_v61 = vpop.eup %1953  ;;  %1973 = vrcp.f32 %v1194_v28  ;;  %v759_v25 = vadd.f32 %v2497_v58, %v2336_v44  ;;  %v1063_v42 = vmul.f32 1.442695, %v912_v14  ;;  %v761_v39 = vadd.f32 %v2502_v5, %v2338_v45 }
 0x17d   : > { %v1956_v13 = vpop.eup %1955  ;;  %1975 = vpow2.f32 %v1093_v34  ;;  %v1372_v48 = vpack.c.bf16 %v1954_v61, %v1950_v30  ;;  %v931_v30 = vsub.f32 0.0, %v803_v36  ;;  %v1099_v21 = vmul.f32 1.442695, %v930_v22 }
 0x17e   : > { %v1958_v3 = vpop.eup %1957  ;;  %v1195_v24 = vadd.f32 1.0, %v1956_v13  ;;  %1977 = vpow2.f32 %v1095_v40  ;;  %v1097_v40 = vmul.f32 1.442695, %v929_v6  ;;  %v763_v36 = vadd.f32 %v2506_v16, %v2336_v44 }
 0x17f   : > { %v1960_v31 = vpop.eup %1959  ;;  %v1213_v52 = vadd.f32 1.0, %v1958_v3  ;;  %1979 = vpow2.f32 %v1057_v46  ;;  %v932_v37 = vsub.f32 0.0, %v805_v23  ;;  %v914_v26 = vsub.f32 0.0, %v761_v39 }
 0x180   : > { %v1962_v35 = vpop.eup %1961  ;;  %1981 = vrcp.f32 %v1195_v24  ;;  %v1196_v34 = vadd.f32 1.0, %v1960_v31  ;;  %v913_v24 = vsub.f32 0.0, %v759_v25  ;;  %v765_v25 = vadd.f32 %v2509_v17, %v2338_v45 }
 0x181   : > { %v1964_v63 = vpop.eup %1963  ;;  %1983 = vrcp.f32 %v1213_v52  ;;  %v1214_v7 = vadd.f32 1.0, %v1962_v35  ;;  %v915_v52 = vsub.f32 0.0, %v763_v36  ;;  %v1103_v35 = vmul.f32 1.442695, %v932_v37 }
 0x182   : > { %v2559_v28 = vpop.eup %1965  ;;  %1985 = vrcp.f32 %v1196_v34  ;;  %v1373_v11 = vpack.c.bf16 %v1964_v63, %v1952_v53  ;;  %v1101_v53 = vmul.f32 1.442695, %v931_v30  ;;  %v1067_v63 = vmul.f32 1.442695, %v914_v26 }
 0x183   : > { %v2563_v46 = vpop.eup %1967  ;;  %1987 = vrcp.f32 %v1214_v7  ;;  %v809_v7 = vadd.f32 %v2394_v59, %v2336_v44  ;;  %v916_v17 = vsub.f32 0.0, %v765_v25  ;;  %v823_v25 = vadd.f32 %v2411_v62, %v2336_v44 }
 0x184   : > { %v2567_v61 = vpop.eup %1969  ;;  %1989 = vpow2.f32 %v1059_v19  ;;  %1420 = vmatprep.subr.bf16.mxu1 %v1373_v11  ;;  %v1382_v13 = vpack.c.bf16 %v2563_v46, %v2504_v54  ;;  %v1065_v19 = vmul.f32 1.442695, %v913_v24 }
 0x185   : > { %v1972_v58 = vpop.eup %1971  ;;  %1991 = vpow2.f32 %v1061_v29  ;;  %1421 = vmatpush1.bf16.msra.mxu1 %v1372_v48  ;;  %v1383_v3 = vpack.c.bf16 %v2567_v61, %v2559_v28  ;;  %v933_v59 = vsub.f32 0.0, %v809_v7 }
 0x186   : > { %v1974_v5 = vpop.eup %1973  ;;  %1993 = vpow2.f32 %v1097_v40  ;;  %v1069_v40 = vmul.f32 1.442695, %v915_v52 }
 0x187   : > { %v1976_v6 = vpop.eup %1975  ;;  %1995 = vpow2.f32 %v1063_v42  ;;  %v811_v42 = vadd.f32 %v2397_v10, %v2338_v45 }
 0x188   : > { %v1978_v31 = vpop.eup %1977  ;;  %v1215_v16 = vadd.f32 1.0, %v1976_v6  ;;  %1997 = vpow2.f32 %v1099_v21 }
 0x189   : > { %v1980_v14 = vpop.eup %1979  ;;  %v1216_v22 = vadd.f32 1.0, %v1978_v31  ;;  %1999 = vpow2.f32 %v1101_v53  ;;  %v934_v10 = vsub.f32 0.0, %v811_v42 }
 0x18a   : > { %v1982_v34 = vpop.eup %1981  ;;  %2001 = vrcp.f32 %v1215_v16  ;;  %v1197_v48 = vadd.f32 1.0, %v1980_v14  ;;  %v815_v16 = vadd.f32 %v2401_v20, %v2338_v45  ;;  %v821_v20 = vadd.f32 %v2409_v55, %v2338_v45 }
 0x18b   : > { %v2575_v23 = vpop.eup %1983  ;;  %2003 = vrcp.f32 %v1216_v22  ;;  %v1374_v29 = vpack.c.bf16 %v1982_v34, %v1972_v58  ;;  %v813_v58 = vadd.f32 %v2399_v15, %v2336_v44  ;;  %v1105_v15 = vmul.f32 1.442695, %v933_v59 }
 0x18c   : > { %v1986_v30 = vpop.eup %1985  ;;  %2005 = vrcp.f32 %v1197_v48  ;;  %v1071_v48 = vmul.f32 1.442695, %v916_v17  ;;  %v1107_v7 = vmul.f32 1.442695, %v934_v10 }
 0x18d   : > { %v2581_v11 = vpop.eup %1987  ;;  %2007 = vpow2.f32 %v1103_v35  ;;  %v1375_v39 = vpack.c.bf16 %v1986_v30, %v1974_v5  ;;  %v935_v22 = vsub.f32 0.0, %v813_v58 }
 0x18e   : > { %v1990_v21 = vpop.eup %1989  ;;  %2009 = vpow2.f32 %v1065_v19  ;;  %v819_v19 = vadd.f32 %v2406_v49, %v2336_v44 }
 0x18f   : > { %v1992_v36 = vpop.eup %1991  ;;  %v1198_v53 = vadd.f32 1.0, %v1990_v21  ;;  %2011 = vpow2.f32 %v1067_v63  ;;  %1422 = vmatprep.subr.bf16.mxu1 %v1375_v39  ;;  %v825_v39 = vadd.f32 %v2415_v9, %v2338_v45  ;;  %v1109_v58 = vmul.f32 1.442695, %v935_v22 }
 0x190   : > { %v1994_v37 = vpop.eup %1993  ;;  %v1199_v24 = vadd.f32 1.0, %v1992_v36  ;;  %2013 = vpow2.f32 %v1069_v40  ;;  %1423 = vmatpush1.bf16.msra.mxu1 %v1374_v29  ;;  %v936_v40 = vsub.f32 0.0, %v815_v16  ;;  %v937_v55 = vsub.f32 0.0, %v819_v19 }
 0x191   : > { %v1996_v6 = vpop.eup %1995  ;;  %2015 = vrcp.f32 %v1198_v53  ;;  %v1217_v26 = vadd.f32 1.0, %v1994_v37  ;;  %v938_v37 = vsub.f32 0.0, %v821_v20  ;;  %v829_v9 = vadd.f32 %v2421_v38, %v2336_v44 }
 0x192   : > { %v1998_v5 = vpop.eup %1997  ;;  %2017 = vrcp.f32 %v1199_v24  ;;  %v1200_v31 = vadd.f32 1.0, %v1996_v6  ;;  %v1111_v17 = vmul.f32 1.442695, %v936_v40  ;;  %v939_v6 = vsub.f32 0.0, %v823_v25 }
 0x193   : > { %v2000_v52 = vpop.eup %1999  ;;  %2019 = vrcp.f32 %v1217_v26  ;;  %v1218_v14 = vadd.f32 1.0, %v1998_v5  ;;  %v940_v5 = vsub.f32 0.0, %v825_v39  ;;  %v1113_v16 = vmul.f32 1.442695, %v937_v55 }
 0x194   : > { %v2589_v35 = vpop.eup %2001  ;;  %2021 = vrcp.f32 %v1200_v31  ;;  %v1219_v34 = vadd.f32 1.0, %v2000_v52  ;;  %v831_v52 = vadd.f32 %v2424_v43, %v2338_v45  ;;  %v833_v22 = vadd.f32 %v2426_v50, %v2336_v44 }
 0x195   : > { %v2593_v63 = vpop.eup %2003  ;;  %2023 = vrcp.f32 %v1218_v14  ;;  %v1384_v29 = vpack.c.bf16 %v2589_v35, %v2575_v23  ;;  %v1117_v19 = vmul.f32 1.442695, %v939_v6  ;;  %v835_v38 = vadd.f32 %v2428_v57, %v2338_v45 }
 0x196   : > { %v2006_v30 = vpop.eup %2005  ;;  %2025 = vrcp.f32 %v1219_v34  ;;  %v1385_v42 = vpack.c.bf16 %v2593_v63, %v2581_v11  ;;  %v1119_v20 = vmul.f32 1.442695, %v940_v5  ;;  %v941_v40 = vsub.f32 0.0, %v829_v9 }
 0x197   : > { %v2008_v49 = vpop.eup %2007  ;;  %2027 = vpow2.f32 %v1105_v15  ;;  %v1115_v15 = vmul.f32 1.442695, %v938_v37  ;;  %v943_v50 = vsub.f32 0.0, %v833_v22  ;;  %v944_v57 = vsub.f32 0.0, %v835_v38 }
 0x198   : > { %v2010_v21 = vpop.eup %2009  ;;  %v1220_v36 = vadd.f32 1.0, %v2008_v49  ;;  %2029 = vpow2.f32 %v1071_v48  ;;  %v942_v49 = vsub.f32 0.0, %v831_v52  ;;  %v839_v6 = vadd.f32 %v2433_v32, %v2336_v44 }
 0x199   : > { %v2012_v53 = vpop.eup %2011  ;;  %v1201_v59 = vadd.f32 1.0, %v2010_v21  ;;  %2031 = vpow2.f32 %v1107_v7  ;;  %v1127_v5 = vmul.f32 1.442695, %v944_v57  ;;  %v841_v9 = vadd.f32 %v2436_v41, %v2338_v45 }
 0x19a   : > { %v2014_v24 = vpop.eup %2013  ;;  %2033 = vrcp.f32 %v1220_v36  ;;  %v1202_v62 = vadd.f32 1.0, %v2012_v53  ;;  %v945_v32 = vsub.f32 0.0, %v839_v6  ;;  %v855_v6 = vadd.f32 %v2455_v2, %v2338_v45 }
 0x19b   : > { %v2016_v26 = vpop.eup %2015  ;;  %2035 = vrcp.f32 %v1201_v59  ;;  %v1203_v10 = vadd.f32 1.0, %v2014_v24  ;;  %v1121_v59 = vmul.f32 1.442695, %v941_v40  ;;  %v1123_v24 = vmul.f32 1.442695, %v942_v49 }
 0x19c   : > { %v2018_v31 = vpop.eup %2017  ;;  %2037 = vrcp.f32 %v1202_v62  ;;  %v946_v38 = vsub.f32 0.0, %v841_v9 }
 0x19d   : > { %v2609_v14 = vpop.eup %2019  ;;  %2039 = vrcp.f32 %v1203_v10  ;;  %v1376_v34 = vpack.c.bf16 %v2018_v31, %v2006_v30 }
 0x19e   : > { %v2022_v48 = vpop.eup %2021  ;;  %2041 = vpow2.f32 %v1109_v58 }
 0x19f   : > { %v2615_v7 = vpop.eup %2023  ;;  %2043 = vpow2.f32 %v1111_v17  ;;  %v1377_v43 = vpack.c.bf16 %v2022_v48, %v2016_v26  ;;  %v1125_v17 = vmul.f32 1.442695, %v943_v50 }
 0x1a0   : > { %v2617_v25 = vpop.eup %2025  ;;  %2045 = vpow2.f32 %v1113_v16  ;;  %v843_v16 = vadd.f32 %v2438_v47, %v2336_v44  ;;  %v845_v47 = vadd.f32 %v2440_v56, %v2338_v45  ;;  %v853_v56 = vadd.f32 %v2453_v51, %v2336_v44 }
 0x1a1   : > { %v2028_v39 = vpop.eup %2027  ;;  %2047 = vpow2.f32 %v1115_v15  ;;  %1424 = vmatprep.subr.bf16.mxu1 %v1377_v43  ;;  %v1386_v30 = vpack.c.bf16 %v2617_v25, %v2609_v14 }
 0x1a2   : > { %v2030_v21 = vpop.eup %2029  ;;  %v1221_v36 = vadd.f32 1.0, %v2028_v39  ;;  %2049 = vpow2.f32 %v1117_v19  ;;  %1425 = vmatpush1.bf16.msra.mxu1 %v1376_v34  ;;  %v947_v41 = vsub.f32 0.0, %v843_v16  ;;  %v951_v51 = vsub.f32 0.0, %v853_v56 }
 0x1a3   : > { %v2032_v55 = vpop.eup %2031  ;;  %v1204_v53 = vadd.f32 1.0, %v2030_v21  ;;  %2051 = vpow2.f32 %v1119_v20  ;;  %v1129_v21 = vmul.f32 1.442695, %v945_v32 }
 0x1a4   : > { %v2621_v58 = vpop.eup %2033  ;;  %2053 = vrcp.f32 %v1221_v36  ;;  %v1222_v37 = vadd.f32 1.0, %v2032_v55  ;;  %v849_v36 = vadd.f32 %v2448_v33, %v2336_v44 }
 0x1a5   : > { %v2036_v62 = vpop.eup %2035  ;;  %2055 = vrcp.f32 %v1204_v53  ;;  %v1387_v26 = vpack.c.bf16 %v2621_v58, %v2615_v7  ;;  %v1131_v53 = vmul.f32 1.442695, %v946_v38 }
 0x1a6   : > { %v2038_v10 = vpop.eup %2037  ;;  %2057 = vrcp.f32 %v1222_v37  ;;  %v949_v9 = vsub.f32 0.0, %v849_v36 }
 0x1a7   : > { %v2040_v31 = vpop.eup %2039  ;;  %2059 = vpow2.f32 %v1121_v59  ;;  %v851_v59 = vadd.f32 %v2451_v0, %v2338_v45  ;;  %v952_v45 = vsub.f32 0.0, %v855_v6  ;;  %v1343_v6 = vld [vmem:[%s2533_s10 + $0x10] sm:$0xff] }
 0x1a8   : > { %v2042_v52 = vpop.eup %2041  ;;  %2061 = vpow2.f32 %v1123_v24  ;;  %v1378_v15 = vpack.c.bf16 %v2040_v31, %v2036_v62  ;;  %v1133_v24 = vmul.f32 1.442695, %v947_v41  ;;  %v1137_v38 = vmul.f32 1.442695, %v949_v9 }
 0x1a9   : > { %v2044_v22 = vpop.eup %2043  ;;  %v1223_v34 = vadd.f32 1.0, %v2042_v52  ;;  %2063 = vpow2.f32 %v1125_v17  ;;  %v948_v17 = vsub.f32 0.0, %v845_v47  ;;  %v950_v16 = vsub.f32 0.0, %v851_v59 }
 0x1aa   : > { %v2046_v48 = vpop.eup %2045  ;;  %v1224_v19 = vadd.f32 1.0, %v2044_v22  ;;  %2065 = vpow2.f32 %v1127_v5  ;;  %v1341_v22 = vld [vmem:[%s2533_s10] sm:$0xff] }
 0x1ab   : > { %v2048_v20 = vpop.eup %2047  ;;  %2067 = vrcp.f32 %v1223_v34  ;;  %v1225_v40 = vadd.f32 1.0, %v2046_v48  ;;  %v1344_v34 = vld [vmem:[%s2533_s10 + $0x18] sm:$0x3]  ;;  %v1135_v48 = vmul.f32 1.442695, %v948_v17 }
 0x1ac   : > { %v2050_v43 = vpop.eup %2049  ;;  %2069 = vrcp.f32 %v1224_v19  ;;  %v1226_v49 = vadd.f32 1.0, %v2048_v20  ;;  %v1347_v41 = vpack.c.bf16 %v1344_v34, %v1341_v22 }
 0x1ad   : > { %v2052_v39 = vpop.eup %2051  ;;  %2071 = vrcp.f32 %v1225_v40  ;;  %v1227_v50 = vadd.f32 1.0, %v2050_v43  ;;  %v1139_v40 = vmul.f32 1.442695, %v950_v16  ;;  %v1339_v16 = vld [vmem:[%s2549_s13 + $0x10] sm:$0x3] }
 0x1ae   : > { %v2635_v57 = vpop.eup %2053  ;;  %2073 = vrcp.f32 %v1226_v49  ;;  %v1228_v55 = vadd.f32 1.0, %v2052_v39  ;;  %v1141_v49 = vmul.f32 1.442695, %v951_v51 }
 0x1af   : > { %v2056_v37 = vpop.eup %2055  ;;  %2075 = vrcp.f32 %v1227_v50 }
 0x1b0   : > { %v2641_v62 = vpop.eup %2057  ;;  %2077 = vrcp.f32 %v1228_v55  ;;  %v1379_v33 = vpack.c.bf16 %v2056_v37, %v2038_v10 }
 0x1b1   : > { %v2060_v5 = vpop.eup %2059  ;;  %2079 = vpow2.f32 %v1129_v21 }
 0x1b2   : > { %v2062_v0 = vpop.eup %2061  ;;  %v1229_v31 = vadd.f32 1.0, %v2060_v5  ;;  %2081 = vpow2.f32 %v1131_v53  ;;  %1426 = vmatprep.subr.bf16.mxu1 %v1379_v33  ;;  %v1346_v5 = vld [vmem:[%s2533_s10 + $0x28] sm:$0x3] }
 0x1b3   : > { %v2064_v52 = vpop.eup %2063  ;;  %v1230_v44 = vadd.f32 1.0, %v2062_v0  ;;  %2083 = vpow2.f32 %v1133_v24  ;;  %1427 = vmatpush1.bf16.msra.mxu1 %v1378_v15  ;;  %v1349_v0 = vpack.c.bf16 %v1346_v5, %v1343_v6 }
 0x1b4   : > { %v2066_v10 = vpop.eup %2065  ;;  %2085 = vrcp.f32 %v1229_v31  ;;  %v1231_v32 = vadd.f32 1.0, %v2064_v52  ;;  %1428 = vmatprep.subr.bf16.mxu1 %v1381_v27  ;;  %v1143_v27 = vmul.f32 1.442695, %v952_v45 }
 0x1b5   : > { %v2068_v2 = vpop.eup %2067  ;;  %2087 = vrcp.f32 %v1230_v44  ;;  %v1232_v19 = vadd.f32 1.0, %v2066_v10  ;;  %v1340_v44 = vld [vmem:[%s2549_s13 + $0x18] sm:$0x3] }
 0x1b6   : > { %v2070_v20 = vpop.eup %2069  ;;  %2089 = vrcp.f32 %v1231_v32  ;;  %v1388_v15 = vpack.c.bf16 %v2068_v2, %v2635_v57 }
 0x1b7   : > { %v2072_v43 = vpop.eup %2071  ;;  %2091 = vrcp.f32 %v1232_v19  ;;  %1429 = vmatpush1.bf16.msra.mxu1 %v1380_v18  ;;  %v1389_v60 = vpack.c.bf16 %v2070_v20, %v2641_v62 }
 0x1b8   : > { %v2074_v4 = vpop.eup %2073  ;;  %2093 = vpow2.f32 %v1135_v48  ;;  %1441 = vmatprep.subr.bf16.mxu1 %v1383_v3 }
 0x1b9   : > { %v2076_v47 = vpop.eup %2075  ;;  %2095 = vpow2.f32 %v1137_v38 }
 0x1ba   : > { %v2078_v39 = vpop.eup %2077  ;;  %2097 = vpow2.f32 %v1139_v40  ;;  %1431 = vmatmul.mubr.bf16.vlgmr.msra.gmra.mrb[36].mxu1 %v1347_v41  ;;  %v1390_v50 = vpack.c.bf16 %v2076_v47, %v2072_v43 }
 0x1bb   : > { %v2080_v21 = vpop.eup %2079  ;;  %2099 = vpow2.f32 %v1141_v49  ;;  %1442 = vmatpush1.bf16.msra.mxu1 %v1382_v13  ;;  %v1391_v1 = vpack.c.bf16 %v2078_v39, %v2074_v4  ;;  %1473 = vmatprep.mubr.bf16.mxu1 %v2159_v8 }
 0x1bc   : > { %v2082_v12 = vpop.eup %2081  ;;  %v1233_v18 = vadd.f32 1.0, %v2080_v21  ;;  %2101 = vpow2.f32 %v1143_v27  ;;  %1443 = vmatprep.subr.bf16.mxu1 %v1385_v42 }
 0x1bd   : > { %v2084_v28 = vpop.eup %2083  ;;  %v1234_v57 = vadd.f32 1.0, %v2082_v12 }
 0x1be   : > { %v2086_v61 = vpop.eup %2085  ;;  %2103 = vrcp.f32 %v1233_v18  ;;  %v1235_v3 = vadd.f32 1.0, %v2084_v28 }
 0x1bf   : > { %v2088_v36 = vpop.eup %2087  ;;  %1444 = vmatpush1.bf16.msra.mxu1 %v1384_v29 }
 0x1c0   : > { %v2090_v54 = vpop.eup %2089  ;;  %2105 = vrcp.f32 %v1235_v3  ;;  %1445 = vmatprep.subr.bf16.mxu1 %v1387_v26 }
 0x1c1   : > { %v2092_v8 = vpop.eup %2091  ;;  %v1392_v46 = vpack.c.bf16 %v2090_v54, %v2086_v61  ;;  %2107 = vrcp.f32 %v1234_v57 }
 0x1c2   : > { %v2094_v13 = vpop.eup %2093  ;;  %v1393_v11 = vpack.c.bf16 %v2092_v8, %v2088_v36 }
 0x1c3   : > { %v2096_v63 = vpop.eup %2095  ;;  %v1236_v42 = vadd.f32 1.0, %v2094_v13  ;;  %1446 = vmatpush1.bf16.msra.mxu1 %v1386_v30 }
 0x1c4   : > { %v2098_v55 = vpop.eup %2097  ;;  %v1237_v23 = vadd.f32 1.0, %v2096_v63  ;;  %1447 = vmatprep.subr.bf16.mxu1 %v1389_v60 }
 0x1c5   : > { %v2100_v35 = vpop.eup %2099  ;;  %2109 = vrcp.f32 %v1236_v42  ;;  %v1238_v29 = vadd.f32 1.0, %v2098_v55 }
 0x1c6   : > { %v2102_v53 = vpop.eup %2101  ;;  %2111 = vrcp.f32 %v1237_v23  ;;  %v1239_v7 = vadd.f32 1.0, %v2100_v35 }
 0x1c7   : > { %2113 = vrcp.f32 %v1238_v29  ;;  %v1240_v58 = vadd.f32 1.0, %v2102_v53  ;;  %1448 = vmatpush1.bf16.msra.mxu1 %v1388_v15 }
 0x1c8   : > { %v2104_v26 = vpop.eup %2103  ;;  %2115 = vrcp.f32 %v1239_v7  ;;  %1449 = vmatprep.subr.bf16.mxu1 %v1391_v1 }
 0x1c9   : > { %2117 = vrcp.f32 %v1240_v58 }
 0x1ca   : > { %v2106_v59 = vpop.eup %2105 }
 0x1cb   : > { %1450 = vmatpush1.bf16.msra.mxu1 %v1390_v50  ;;  %v1394_v14 = vpack.c.bf16 %v2106_v59, %v2104_v26  ;;  %v2108_v25 = vpop.eup %2107 }
 0x1cc   : > { %1451 = vmatprep.subr.bf16.mxu1 %v1393_v11 }
 0x1cf   : > { %v2110_v30 = vpop.eup %2109  ;;  %1452 = vmatpush1.bf16.msra.mxu1 %v1392_v46 }
 0x1d0   : > { %v2112_v37 = vpop.eup %2111  ;;  %v1395_v24 = vpack.c.bf16 %v2110_v30, %v2108_v25 }
 0x1d1   : > { %v2114_v56 = vpop.eup %2113 }
 0x1d2   : > { %v2116_v62 = vpop.eup %2115  ;;  %1453 = vmatprep.subr.bf16.mxu1 %v1395_v24 }
 0x1d3   : > { %v2118_v17 = vpop.eup %2117  ;;  %1454 = vmatpush1.bf16.msra.mxu1 %v1394_v14  ;;  %v1396_v33 = vpack.c.bf16 %v2116_v62, %v2112_v37 }
 0x1d4   : > { %v1397_v9 = vpack.c.bf16 %v2118_v17, %v2114_v56 }
 0x1d6   : > { %1455 = vmatprep.subr.bf16.mxu1 %v1397_v9 }
 0x1d7   : > { %1456 = vmatpush1.bf16.msra.mxu1 %v1396_v33 }
 0x1da   : > { %1474 = vmatmul.mubr.bf16.vlgmr.msra.gmra.mrb[36].mxu1 %v1349_v0 }
 0x2ad   : > { %v1475_v31 = vpop.f32.mrb[36].mxu1 }
 0x2ae   : > { %v1477_v52 = vpop.f32.mrb[37].mxu1  ;;  %1488 = vst [vmem:[%s2549_s13] sm:$0xff] %v1475_v31 }
 0x2af   : > { %v1479_v51 = vpop.f32.mrb[38].mxu1  ;;  %1489 = vst [vmem:[%s2549_s13 + $0x8] sm:$0xff] %v1477_v52 }
 0x2b0   : > { %v1486_v22 = vadd.f32 %v1479_v51, %v1339_v16  ;;  %v1481_v34 = vpop.f32.mrb[39].mxu1 }
 0x2b1   : > { %v1487_v10 = vadd.f32 %v1481_v34, %v1340_v44 }
 0x2b2   : > { %1490 = vst [vmem:[%s2549_s13 + $0x10] sm:$0x3] %v1486_v22 }
 0x2b3   : > { %1491 = vst [vmem:[%s2549_s13 + $0x18] sm:$0x3] %v1487_v10 }
 0x2b4 PF: > { %s14_s19 = sadd.s32 1, %s2157_s19   ;;  %s2702_s15 = smov %s2145_s16 }
 0x2b5   : > { %p11_p11 = scmp.ge.s32.totalorder %s14_s19, 4   ;;  %s2703_s16 = smov %s2221_s23 }
 0x2b6   : > { %s2704_s17 = smov %s2153_s18  ;;  %s2705_s18 = smov %s2707_s20 }
 0x2b7   :  { %13 = sbr.rel (!%p11_p11) target bundleno = 3 (0x3), region = 101 }

// kernel: custom-call.8
= control target key start
LH: loop header
LB: loop body
LE: loop exit
PB: predicated region body
PF: predicated region fallthrough
CT: control target
= control target key end

     0   :  { %5 = vsyncpa [#allocation4], 0  ;;  %s682_s12 = smov [#allocation0]   ;;  %s783_s0 = inlined_call_operand.vmem [shape: f32[8,8], index: 0, kind: input, shape index: {}]   ;;  %s784_s1 = inlined_call_operand.vmem [shape: f32[8,8], index: 1, kind: output, shape index: {0}]   ;;  %s785_s2 = inlined_call_operand.hbm [shape: s32[8], index: 2, kind: output, shape index: {1}]   ;;  %s786_s3 = inlined_call_operand.vmem [shape: s32[8], index: 3, kind: output, shape index: {2}]  }
   0x1   :  { %s686_s15 = smov %s783_s0  }
   0x2 LB: > { %v53_v0 = vld [vmem:[%s688_s15] sm:$0xff]  ;;  %s55_s15 = scalar_lea.vmem %s688_s15, 8   ;;  %s688_s15 = sphi %s686_s15, %s55_s15   ;;  %s684_s12 = sphi %s682_s12, %s56_s12  }
   0x3   : > { %54 = vst [vmem:[%s684_s12] sm:$0xff] %v53_v0  ;;  %s56_s12 = scalar_lea.vmem %s684_s12, 8   ;;  %p50_p0 = scmp.gt.s32.totalorder %s55_s15, %s783_s0 }
   0x4   :  { %v71_v2 = vlaneseq (%p50_p0)  ;;  %v702_v3 = vmov (%p50_p0), 0   ;;  %s734_s18 = smov (%p50_p0), 0  }
   0x5   :  { %52 = sbr.rel (!%p50_p0) target bundleno = 2 (0x2), region = 152  ;;  %70 = vst [vmem:[#allocation2] sm:$0x1] (%p50_p0), %v702_v3 }
   0x6   :  { %v731_v4 = vshrl.u32 (%p50_p0), %v71_v2, 7 }
   0x8   :  { %75 = vst [vmem:[#allocation7] sm:$0xff] (%p50_p0), %v731_v4 }
   0xa   :  { %v68_v1 = vld [vmem:[#allocation0] sm:$0xff] (%p50_p0) }
   0xb   :  { %69 = vst [vmem:[#allocation1] sm:$0xff] (%p50_p0), %v68_v1 }
   0xc LB: > { %v740_v7 = vstv %s692_s18  ;;  %s132_s0 = ssub.s32 128, %s692_s18  ;;  %v138_v37 = vand.u32 127, %v71_v2  ;;  %v141_v39 = vld [vmem:[#allocation2] ss:$0 sm:$0xff]  ;;  %s144_s19 = scalar_lea.vmem [#allocation1], %s692_s18  ;;  %s692_s18 = sphi %s734_s18, %s81_s18  }
   0xd   : > { %vm90_vm0 = vcmp.ge.s32.totalorder %v731_v4, %v740_v7  ;;  %s150_s21 = scalar_lea.vmem [#allocation7], %s692_s18  ;;  %vm170_vm13 = vcmp.gt.s32.totalorder %v731_v4, %v740_v7  ;;  %s81_s18 = sadd.s32 1, %s692_s18  }
   0xe   : > { %vm162_vm10 = vcmp.gt.s32.totalorder %v138_v37, %v740_v7  ;;  %vm139_vm11 = vcmp.eq.s32.totalorder %v138_v37, %v740_v7  ;;  %p78_p1 = scmp.ge.s32.totalorder %s81_s18, 8  }
   0xf   : > { %v152_v41 = vld [vmem:[%s150_s21] ss:$0 sm:$0xff]  ;;  %vm174_vm15 = vmand %vm170_vm13, %vm139_vm11  ;;  %s694_s26 = smov (%p78_p1), %s784_s1   ;;  %s698_s27 = smov (%p78_p1), [#allocation1]  }
  0x12   : > { %v86_v5 = vld [vmem:[#allocation1] sm:$0xff]  ;;  %v146_v40 = vld [vmem:[%s144_s19] ss:$0 sm:$0xff] }
  0x13   : > { %v87_v6 = vand.u32 2147483647, %v86_v5 }
  0x15   : > { %vm463_vm1 = vcmp.gt.f32.partialorder %v87_v6, -inf }
  0x16   : > { %vm94_vm2 = vmand %vm90_vm0, %vm463_vm1 }
  0x17   : > { %v95_v8 = vsel %vm94_vm2, %v731_v4, %v740_v7  ;;  %v96_v9 = vsel %vm94_vm2, %v87_v6, -inf }
  0x18   : > { %v97_v10 = vrot.slane %v96_v9, 1  ;;  %v98_v11 = vrot.slane %v95_v8, 1 }
  0x1a   : > { %vm99_vm3 = vcmp.ge.f32.partialorder %v97_v10, %v96_v9  ;;  %v102_v12 = vrot.slane %v97_v10, 1  ;;  %v103_v13 = vrot.slane %v98_v11, 1 }
  0x1b   : > { %v100_v14 = vsel %vm99_vm3, %v97_v10, %v96_v9  ;;  %v101_v15 = vsel %vm99_vm3, %v98_v11, %v95_v8 }
  0x1c   : > { %vm104_vm4 = vcmp.ge.f32.partialorder %v102_v12, %v100_v14  ;;  %v107_v16 = vrot.slane %v102_v12, 1  ;;  %v108_v17 = vrot.slane %v103_v13, 1 }
  0x1d   : > { %v105_v18 = vsel %vm104_vm4, %v102_v12, %v100_v14  ;;  %v106_v19 = vsel %vm104_vm4, %v103_v13, %v101_v15 }
  0x1e   : > { %vm109_vm5 = vcmp.ge.f32.partialorder %v107_v16, %v105_v18  ;;  %v112_v20 = vrot.slane %v107_v16, 1  ;;  %v113_v21 = vrot.slane %v108_v17, 1 }
  0x1f   : > { %v110_v22 = vsel %vm109_vm5, %v107_v16, %v105_v18  ;;  %v111_v23 = vsel %vm109_vm5, %v108_v17, %v106_v19 }
  0x20   : > { %vm114_vm6 = vcmp.ge.f32.partialorder %v112_v20, %v110_v22  ;;  %v117_v24 = vrot.slane %v112_v20, 1  ;;  %v118_v25 = vrot.slane %v113_v21, 1 }
  0x21   : > { %v115_v26 = vsel %vm114_vm6, %v112_v20, %v110_v22  ;;  %v116_v27 = vsel %vm114_vm6, %v113_v21, %v111_v23 }
  0x22   : > { %vm119_vm7 = vcmp.ge.f32.partialorder %v117_v24, %v115_v26  ;;  %v122_v28 = vrot.slane %v117_v24, 1  ;;  %v123_v29 = vrot.slane %v118_v25, 1 }
  0x23   : > { %v120_v30 = vsel %vm119_vm7, %v117_v24, %v115_v26  ;;  %v121_v31 = vsel %vm119_vm7, %v118_v25, %v116_v27 }
  0x24   : > { %vm124_vm8 = vcmp.ge.f32.partialorder %v122_v28, %v120_v30  ;;  %v127_v32 = vrot.slane %v122_v28, 1  ;;  %v128_v33 = vrot.slane %v123_v29, 1 }
  0x25   : > { %v125_v34 = vsel %vm124_vm8, %v122_v28, %v120_v30  ;;  %v126_v35 = vsel %vm124_vm8, %v123_v29, %v121_v31 }
  0x26   : > { %vm129_vm9 = vcmp.ge.f32.partialorder %v127_v32, %v125_v34 }
  0x27   : > { %v131_v36 = vsel %vm129_vm9, %v128_v33, %v126_v35 }
  0x28   : > { %133 = vrot.lane.b32.xlu0 %v131_v36, %s132_s0 }
  0x9a   : > { %v134_v38 = vpop.permute.xlu0 %133 }
  0x9b   : > { %471 = vpush %v134_v38 }
  0xcc   : > { %s472_s20 = spop %471 }
  0xcd   : > { %v140_v42 = vstv %s472_s20  ;;  %s145_s22 = scalar_lea.vmem [#allocation1], %s472_s20  ;;  %s151_s23 = scalar_lea.vmem [#allocation7], %s472_s20 }
  0xce   : > { %v147_v43 = vld [vmem:[%s145_s22] ss:$0 sm:$0xff]  ;;  %v142_v45 = vsel %vm139_vm11, %v140_v42, %v141_v39 }
  0xcf   : > { %v153_v44 = vld [vmem:[%s151_s23] ss:$0 sm:$0xff]  ;;  %148 = vst [vmem:[%s145_s22] sm:$0x1] %v146_v40  ;;  %vm156_vm12 = vcmp.ne.f32.partialorder %v147_v43, 0.0  ;;  %143 = vst [vmem:[#allocation2] sm:$0x1] %v142_v45 }
  0xd0   : > { %154 = vst [vmem:[%s151_s23] sm:$0x1] %v152_v41  ;;  %149 = vst [vmem:[%s144_s19] sm:$0x1] %v147_v43  ;;  %v163_v52 = vsel %vm162_vm10, %v147_v43, 0.0 }
  0xd1   : > { %155 = vst [vmem:[%s150_s21] sm:$0x1] %v153_v44  ;;  %vm157_vm14 = vmand %vm139_vm11, %vm156_vm12 }
  0xd2   : > { %v158_v46 = vsel %vm157_vm14, %v147_v43, 1.0 }
  0xd3   : > { %v171_v47 = vsel %vm170_vm13, %v158_v46, 1.0 }
  0xd4   : > { %596 = vrcp.f32 %v171_v47 }
  0xd6   :  { %v233_v57 = vld [vmem:[#allocation2] sm:$0x1] (%p78_p1) }
  0xd7   : > { %v167_v49 = vld [vmem:[#allocation1] sm:$0xff]  ;;  %235 = vst [vmem:[#allocation3] sm:$0x1] (%p78_p1), %v233_v57 }
  0xd8   :  { %v181_v56 = vld [vmem:[#allocation7] sm:$0xff] (%p78_p1) }
  0xde   : > { %v597_v48 = vpop.eup %596 }
  0xdf   : > { %v173_v50 = vmul.f32 %v597_v48, %v167_v49 }
  0xe1   : > { %v175_v51 = vsel %vm174_vm15, %v173_v50, 0.0 }
  0xe2   : > { %176 = vadd.xlane.f32.xlu0 %v175_v51 }
 0x10f   :  { %197 = vxpose.xlu0.b32.start.end [1/1] (short) (narrow) (%p78_p1), %v181_v56, 8 }
 0x16e   :  { %80 = sbr.rel (!%p78_p1) target bundleno = 12 (0xc), region = 163 }
 0x16f   : > { %v177_v53 = vpop.xlane.xlu0 %176 }
 0x170   : > { %v178_v54 = vmul.f32 %v177_v53, %v163_v52 }
 0x172   : > { %v179_v55 = vsub.f32 %v173_v50, %v178_v54 }
 0x174   : > { %180 = vst [vmem:[#allocation1] sm:$0xff] %v179_v55 }
 0x18f   :  { %v213_v58 = vpop.trf.xlu0 }
 0x190   :  { %229 = vst [vmem:[#allocation5] sm:$0x1] %v213_v58 }
 0x197   :  { %v239_v59 = vld [vmem:[#allocation5] sm:$0x1] }
 0x198   :  { %241 = vst [vmem:[#allocation6] sm:$0x1] %v239_v59 }
 0x199 LB: > { %v289_v60 = vld [vmem:[%s700_s27] sm:$0xff]  ;;  %s291_s27 = scalar_lea.vmem %s700_s27, 8   ;;  %s700_s27 = sphi %s698_s27, %s291_s27   ;;  %s696_s26 = sphi %s694_s26, %s292_s26  }
 0x19a   : > { %290 = vst [vmem:[%s696_s26] sm:$0xff] %v289_v60  ;;  %s292_s26 = scalar_lea.vmem %s696_s26, 8   ;;  %p286_p2 = scmp.gt.s32.totalorder %s291_s27, [#allocation1] }
 0x19b   :  { %s703_s28 = smov (%p286_p2), [#allocation3]  }
 0x19c   :  { %288 = sbr.rel (!%p286_p2) target bundleno = 409 (0x199), region = 185  ;;  %s309_s29 = sshll.u32 (%p286_p2), %s703_s28, 4  ;;  %s310_s29 = int_to_ptr.vmem [resolvable:$true] %s309_s29 }
 0x19d   :  { %s598_s1 = scalar_lea.vmem (%p286_p2), %s310_s29, 16  ;;  %s602_s5 = scalar_lea.vmem (%p286_p2), %s310_s29, 32 }
 0x19e   :  { %p599_p3 = scmp.ne.s32.totalorder (%p286_p2), %s310_s29, %s598_s1  ;;  %p603_p4 = scmp.lt.s32.totalorder (%p286_p2), %s310_s29, %s310_s29 }
 0x19f   :  { %v375_v61 = vld [vmem:[#allocation6] sm:$0x1] (%p286_p2)  ;;  %p604_p5 = scmp.lt.s32.totalorder (%p286_p2), %s602_s5, %s598_s1 }
 0x1a0   :  { %376 = vst [vmem:[%s786_s3] sm:$0x1] (%p286_p2), %v375_v61 }
 0x1a1   :  { %p605_p6 = por (%p286_p2), %p604_p5, %p603_p4 }
 0x1a3   :  { %p606_p7 = pnand %p605_p6, %p599_p3 }
 0x1a5   :  { %609 = shalt.err (!%p606_p7)
}
 0x1a6   :  { %s610_s8 = scalar_lea.hbm %s785_s2, 16 }
 0x1a7   :  { %p611_p8 = scmp.ne.s32.totalorder %s785_s2, %s610_s8  ;;  %p614_p9 = scmp.lt.u32.totalorder %s610_s8, %s785_s2 }
 0x1a9   :  { %p616_p10 = pnand %p614_p9, %p611_p8 }
 0x1ab   :  { %619 = shalt.err (!%p616_p10)
}
 0x1ac   :  { %312 = dma.vmem_to_hbm [thread:$0]  %s310_s29, 16, %s785_s2, [#allocation4]  }
 0x1ad   :  { %680 = dma.done.wait [#allocation4], 16  }
 0x1ae   :  { %681 = vsyncadd [#allocation4], 4294967280 }
 0x1af   :  { %382 = vsyncpa [#allocation4], 1 }

// kernel: custom-call.10
= control target key start
LH: loop header
LB: loop body
LE: loop exit
PB: predicated region body
PF: predicated region fallthrough
CT: control target
= control target key end

     0   :  { %v34_v0 = vlaneseq  ;;  %v180_v9 = vmov -1.0   ;;  %s215_s0 = inlined_call_operand.vmem [shape: f32[1,8,8], index: 0, kind: input, shape index: {}]   ;;  %s216_s1 = inlined_call_operand.vmem [shape: f32[1,8,8], index: 1, kind: output, shape index: {}]  }
   0x1   :  { %v29_v1 = vld [vmem:[%s215_s0] sm:$0xff] }
   0x2   :  { %v194_v2 = vand.u32 127, %v34_v0  ;;  %v38_v3 = vshrl.u32 %v34_v0, 7 }
   0x4   :  { %vm36_vm0 = vcmp.lt.s32.totalorder %v194_v2, 8  ;;  %vm40_vm1 = vcmp.eq.s32.totalorder %v38_v3, %v194_v2  ;;  %vm45_vm2 = vcmp.ge.s32.totalorder %v38_v3, %v194_v2  ;;  %vm59_vm4 = vcmp.eq.s32.totalorder %v194_v2, 0 }
   0x5   :  { %v42_v4 = vsel %vm40_vm1, %v29_v1, 0.0  ;;  %vm46_vm3 = vmand %vm45_vm2, %vm36_vm0  ;;  %vm56_vm5 = vcmp.eq.s32.totalorder %v194_v2, %v38_v3  ;;  %v60_v10 = vsel %vm59_vm4, 1.0, %v180_v9  ;;  %vm67_vm6 = vcmp.eq.s32.totalorder %v194_v2, 1 }
   0x6   :  { %v47_v5 = vsel %vm46_vm3, %v29_v1, 0.0  ;;  %43 = vadd.xlane.f32.xlu0 %v42_v4  ;;  %v61_v11 = vsel %vm56_vm5, %v60_v10, 0.0  ;;  %vm77_vm7 = vcmp.eq.s32.totalorder %v194_v2, 2  ;;  %vm87_vm8 = vcmp.eq.s32.totalorder %v194_v2, 3 }
   0x7   :  { %vm97_vm9 = vcmp.eq.s32.totalorder %v194_v2, 4  ;;  %vm107_vm10 = vcmp.eq.s32.totalorder %v194_v2, 5  ;;  %vm117_vm11 = vcmp.eq.s32.totalorder %v194_v2, 6  ;;  %vm127_vm12 = vcmp.eq.s32.totalorder %v194_v2, 7 }
  0x93   :  { %v199_v6 = vpop.xlane.xlu0 %43 }
  0x94   :  { %178 = vrcp.f32 %v199_v6  ;;  %vm134_vm13 = vweird.f32 %v199_v6 }
  0x9e   :  { %v179_v7 = vpop.eup %178 }
  0x9f   :  { %v49_v8 = vmul.f32 %v179_v7, %v47_v5 }
  0xa1   :  { %50 = vst [vmem:[#allocation2] sm:$0xff] %v49_v8 }
  0xa8   :  { %v63_v12 = vld [vmem:[#allocation2 + $0x1] ss:$0 sm:$0xff]  ;;  %v73_v15 = vld [vmem:[#allocation2 + $0x2] ss:$0 sm:$0xff]  ;;  %v83_v20 = vld [vmem:[#allocation2 + $0x3] ss:$0 sm:$0xff] }
  0xa9   :  { %v64_v13 = vxor.u32 2147483648, %v63_v12  ;;  %v74_v17 = vxor.u32 2147483648, %v73_v15  ;;  %v84_v22 = vxor.u32 2147483648, %v83_v20  ;;  %v93_v25 = vld [vmem:[#allocation2 + $0x4] ss:$0 sm:$0xff] }
  0xaa   :  { %v94_v27 = vxor.u32 2147483648, %v93_v25  ;;  %v103_v30 = vld [vmem:[#allocation2 + $0x5] ss:$0 sm:$0xff]  ;;  %v113_v35 = vld [vmem:[#allocation2 + $0x6] ss:$0 sm:$0xff] }
  0xab   :  { %v68_v14 = vmul.f32 %v64_v13, %v61_v11  ;;  %v104_v32 = vxor.u32 2147483648, %v103_v30  ;;  %v114_v37 = vxor.u32 2147483648, %v113_v35  ;;  %v123_v40 = vld [vmem:[#allocation2 + $0x7] ss:$0 sm:$0xff] }
  0xac   :  { %v124_v42 = vxor.u32 2147483648, %v123_v40 }
  0xad   :  { %69 = vadd.xlane.f32.xlu0 %v68_v14 }
 0x13a   :  { %v70_v16 = vpop.xlane.xlu0 %69 }
 0x13b   :  { %v71_v18 = vsel %vm67_vm6, %v70_v16, %v61_v11 }
 0x13c   :  { %v78_v19 = vmul.f32 %v74_v17, %v71_v18 }
 0x13e   :  { %79 = vadd.xlane.f32.xlu1 %v78_v19 }
 0x1cb   :  { %v80_v21 = vpop.xlane.xlu1 %79 }
 0x1cc   :  { %v81_v23 = vsel %vm77_vm7, %v80_v21, %v71_v18 }
 0x1cd   :  { %v88_v24 = vmul.f32 %v84_v22, %v81_v23 }
 0x1cf   :  { %89 = vadd.xlane.f32.xlu1 %v88_v24 }
 0x25c   :  { %v90_v26 = vpop.xlane.xlu1 %89 }
 0x25d   :  { %v91_v28 = vsel %vm87_vm8, %v90_v26, %v81_v23 }
 0x25e   :  { %v98_v29 = vmul.f32 %v94_v27, %v91_v28 }
 0x260   :  { %99 = vadd.xlane.f32.xlu0 %v98_v29 }
 0x2ed   :  { %v100_v31 = vpop.xlane.xlu0 %99 }
 0x2ee   :  { %v101_v33 = vsel %vm97_vm9, %v100_v31, %v91_v28 }
 0x2ef   :  { %v108_v34 = vmul.f32 %v104_v32, %v101_v33 }
 0x2f1   :  { %109 = vadd.xlane.f32.xlu1 %v108_v34 }
 0x37e   :  { %v110_v36 = vpop.xlane.xlu1 %109 }
 0x37f   :  { %v111_v38 = vsel %vm107_vm10, %v110_v36, %v101_v33 }
 0x380   :  { %v118_v39 = vmul.f32 %v114_v37, %v111_v38 }
 0x382   :  { %119 = vadd.xlane.f32.xlu0 %v118_v39 }
 0x40f   :  { %v120_v41 = vpop.xlane.xlu0 %119 }
 0x410   :  { %v121_v43 = vsel %vm117_vm11, %v120_v41, %v111_v38 }
 0x411   :  { %v128_v44 = vmul.f32 %v124_v42, %v121_v43 }
 0x413   :  { %129 = vadd.xlane.f32.xlu1 %v128_v44 }
 0x4a0   :  { %v130_v45 = vpop.xlane.xlu1 %129 }
 0x4a1   :  { %v131_v46 = vsel %vm127_vm12, %v130_v45, %v121_v43 }
 0x4a2   :  { %v133_v47 = vmul.f32 %v179_v7, %v131_v46 }
 0x4a4   :  { %v135_v48 = vsel %vm134_vm13, %v131_v46, %v133_v47 }
 0x4a5   :  { %165 = vst [vmem:[%s216_s1] sm:$0xff] %v135_v48 }

// kernel: custom-call.9
= control target key start
LH: loop header
LB: loop body
LE: loop exit
PB: predicated region body
PF: predicated region fallthrough
CT: control target
= control target key end

     0   :  { %v34_v0 = vlaneseq  ;;  %v179_v9 = vmov -1.0   ;;  %s214_s0 = inlined_call_operand.vmem [shape: f32[1,8,8], index: 0, kind: input, shape index: {}]   ;;  %s215_s1 = inlined_call_operand.vmem [shape: f32[1,8,8], index: 1, kind: output, shape index: {}]  }
   0x1   :  { %v29_v1 = vld [vmem:[%s214_s0] sm:$0xff] }
   0x2   :  { %v193_v2 = vand.u32 127, %v34_v0  ;;  %v38_v3 = vshrl.u32 %v34_v0, 7 }
   0x4   :  { %vm36_vm0 = vcmp.lt.s32.totalorder %v193_v2, 8  ;;  %vm40_vm1 = vcmp.eq.s32.totalorder %v38_v3, %v193_v2  ;;  %vm45_vm2 = vcmp.le.s32.totalorder %v38_v3, %v193_v2  ;;  %vm59_vm4 = vcmp.eq.s32.totalorder %v193_v2, 7 }
   0x5   :  { %v42_v4 = vsel %vm40_vm1, %v29_v1, 0.0  ;;  %vm46_vm3 = vmand %vm45_vm2, %vm36_vm0  ;;  %vm56_vm5 = vcmp.eq.s32.totalorder %v193_v2, %v38_v3  ;;  %v60_v10 = vsel %vm59_vm4, 1.0, %v179_v9  ;;  %vm67_vm6 = vcmp.eq.s32.totalorder %v193_v2, 6 }
   0x6   :  { %v47_v5 = vsel %vm46_vm3, %v29_v1, 0.0  ;;  %43 = vadd.xlane.f32.xlu0 %v42_v4  ;;  %v61_v11 = vsel %vm56_vm5, %v60_v10, 0.0  ;;  %vm77_vm7 = vcmp.eq.s32.totalorder %v193_v2, 5  ;;  %vm87_vm8 = vcmp.eq.s32.totalorder %v193_v2, 4 }
   0x7   :  { %vm97_vm9 = vcmp.eq.s32.totalorder %v193_v2, 3  ;;  %vm107_vm10 = vcmp.eq.s32.totalorder %v193_v2, 2  ;;  %vm117_vm11 = vcmp.eq.s32.totalorder %v193_v2, 1  ;;  %vm126_vm12 = vcmp.eq.s32.totalorder %v193_v2, 0 }
  0x93   :  { %v198_v6 = vpop.xlane.xlu0 %43 }
  0x94   :  { %177 = vrcp.f32 %v198_v6  ;;  %vm133_vm13 = vweird.f32 %v198_v6 }
  0x9e   :  { %v178_v7 = vpop.eup %177 }
  0x9f   :  { %v49_v8 = vmul.f32 %v178_v7, %v47_v5 }
  0xa1   :  { %50 = vst [vmem:[#allocation2] sm:$0xff] %v49_v8 }
  0xa8   :  { %v63_v12 = vld [vmem:[#allocation2 + $0x6] ss:$0 sm:$0xff]  ;;  %v73_v15 = vld [vmem:[#allocation2 + $0x5] ss:$0 sm:$0xff]  ;;  %v83_v20 = vld [vmem:[#allocation2 + $0x4] ss:$0 sm:$0xff] }
  0xa9   :  { %v64_v13 = vxor.u32 2147483648, %v63_v12  ;;  %v74_v17 = vxor.u32 2147483648, %v73_v15  ;;  %v84_v22 = vxor.u32 2147483648, %v83_v20  ;;  %v93_v25 = vld [vmem:[#allocation2 + $0x3] ss:$0 sm:$0xff] }
  0xaa   :  { %v94_v27 = vxor.u32 2147483648, %v93_v25  ;;  %v103_v30 = vld [vmem:[#allocation2 + $0x2] ss:$0 sm:$0xff]  ;;  %v113_v35 = vld [vmem:[#allocation2 + $0x1] ss:$0 sm:$0xff] }
  0xab   :  { %v68_v14 = vmul.f32 %v64_v13, %v61_v11  ;;  %v104_v32 = vxor.u32 2147483648, %v103_v30  ;;  %v114_v37 = vxor.u32 2147483648, %v113_v35  ;;  %v122_v40 = vld [vmem:[#allocation2] ss:$0 sm:$0xff] }
  0xac   :  { %v123_v42 = vxor.u32 2147483648, %v122_v40 }
  0xad   :  { %69 = vadd.xlane.f32.xlu0 %v68_v14 }
 0x13a   :  { %v70_v16 = vpop.xlane.xlu0 %69 }
 0x13b   :  { %v71_v18 = vsel %vm67_vm6, %v70_v16, %v61_v11 }
 0x13c   :  { %v78_v19 = vmul.f32 %v74_v17, %v71_v18 }
 0x13e   :  { %79 = vadd.xlane.f32.xlu1 %v78_v19 }
 0x1cb   :  { %v80_v21 = vpop.xlane.xlu1 %79 }
 0x1cc   :  { %v81_v23 = vsel %vm77_vm7, %v80_v21, %v71_v18 }
 0x1cd   :  { %v88_v24 = vmul.f32 %v84_v22, %v81_v23 }
 0x1cf   :  { %89 = vadd.xlane.f32.xlu1 %v88_v24 }
 0x25c   :  { %v90_v26 = vpop.xlane.xlu1 %89 }
 0x25d   :  { %v91_v28 = vsel %vm87_vm8, %v90_v26, %v81_v23 }
 0x25e   :  { %v98_v29 = vmul.f32 %v94_v27, %v91_v28 }
 0x260   :  { %99 = vadd.xlane.f32.xlu0 %v98_v29 }
 0x2ed   :  { %v100_v31 = vpop.xlane.xlu0 %99 }
 0x2ee   :  { %v101_v33 = vsel %vm97_vm9, %v100_v31, %v91_v28 }
 0x2ef   :  { %v108_v34 = vmul.f32 %v104_v32, %v101_v33 }
 0x2f1   :  { %109 = vadd.xlane.f32.xlu1 %v108_v34 }
 0x37e   :  { %v110_v36 = vpop.xlane.xlu1 %109 }
 0x37f   :  { %v111_v38 = vsel %vm107_vm10, %v110_v36, %v101_v33 }
 0x380   :  { %v118_v39 = vmul.f32 %v114_v37, %v111_v38 }
 0x382   :  { %119 = vadd.xlane.f32.xlu0 %v118_v39 }
 0x40f   :  { %v120_v41 = vpop.xlane.xlu0 %119 }
 0x410   :  { %v121_v43 = vsel %vm117_vm11, %v120_v41, %v111_v38 }
 0x411   :  { %v127_v44 = vmul.f32 %v123_v42, %v121_v43 }
 0x413   :  { %128 = vadd.xlane.f32.xlu1 %v127_v44 }
 0x4a0   :  { %v129_v45 = vpop.xlane.xlu1 %128 }
 0x4a1   :  { %v130_v46 = vsel %vm126_vm12, %v129_v45, %v121_v43 }
 0x4a2   :  { %v132_v47 = vmul.f32 %v178_v7, %v130_v46 }
 0x4a4   :  { %v134_v48 = vsel %vm133_vm13, %v130_v46, %v132_v47 }
 0x4a5   :  { %164 = vst [vmem:[%s215_s1] sm:$0xff] %v134_v48 }

// kernel: oscn_train.1
= control target key start
LH: loop header
LB: loop body
LE: loop exit
PB: predicated region body
PF: predicated region fallthrough
CT: control target
= control target key end

     0   :  { %s2695_s18 = smov 0   ;;  %s3296_s0 = inlined_call_operand.vmem [shape: bf16[768,64], index: 0, kind: input, shape index: {}]   ;;  %s3297_s1 = inlined_call_operand.vmem [shape: bf16[64,8], index: 1, kind: input, shape index: {}]   ;;  %s3298_s2 = inlined_call_operand.vmem [shape: f32[1,8], index: 2, kind: input, shape index: {}]   ;;  %s3299_s3 = inlined_call_operand.vmem [shape: f32[768,10], index: 3, kind: input, shape index: {}]   ;;  %s3300_s4 = inlined_call_operand.vmem [shape: f32[8,8], index: 4, kind: output, shape index: {0}]   ;;  %s3301_s5 = inlined_call_operand.vmem [shape: f32[8,10], index: 5, kind: output, shape index: {1}]  }
   0x1 LB: > { %s2701_s19 = sadd.s32 4294967295, %s2659_s18   ;;  %p1906_p0 = scmp.ge.s32.totalorder %s2659_s18, 1  ;;  %s2659_s18 = sphi %s2695_s18, %s16_s18  }
   0x2   : > { %p192_p1 = scmp.lt.s32.totalorder %s2659_s18, 3 }
   0x4   : > { %p193_p2 = pnand %p1906_p0, %p192_p1 }
   0x5   : > { %s220_s20 = smul.u32 (!%p193_p2), 48, %s2701_s19  ;;  %p1909_p4 = scmp.ne.s32.totalorder (!%p193_p2), %s2701_s19, 0 }
   0x6   : > { %196 = sbr.rel (%p193_p2) target bundleno = 817 (0x331), region = 36 }
   0x7   : > { %p221_p3 = scmp.lt.s32.totalorder (!%p193_p2), %s220_s20, 95 }
   0xd   : > { %s3303_s20 = smov (!%p221_p3, %s220_s20), 95  ;;  %236 = sbr.rel (%p1909_p4) target bundleno = 20 (0x14), region = 40 }
   0xe   : > { %s1907_s21 = sshll.u32 %s3303_s20, 2  ;;  %s1908_s22 = sshll.u32 %s3303_s20, 3  ;;  %vm237_vm0 = vcmask (!%p1909_p4), 64512   ;;  %vm239_vm1 = vcmask (!%p1909_p4), 80896   ;;  %v2661_v0 = vmov (!%p1909_p4), 0.0  }
   0xf   : > { %s2709_s25 = scalar_lea.vmem %s3296_s0, %s1907_s21  ;;  %s2714_s28 = scalar_lea.vmem %s3299_s3, %s1908_s22  ;;  %238 = vst.msk [vmem:[%s3300_s4] sm:$0xff] (!%p1909_p4), %vm237_vm0, %v2661_v0 }
  0x10   : > { %240 = vst.msk [vmem:[%s3301_s5] sm:$0xff] (!%p1909_p4), %vm239_vm1, %v2661_v0 }
  0x14 PF: > { %v2396_v1 = vld [vmem:[%s3297_s1] sm:$0xff]   ;;  %v2397_v2 = vld [vmem:[%s3297_s1 + $0x8] sm:$0xff]   ;;  %v2398_v3 = vld [vmem:[%s3297_s1 + $0x10] sm:$0xff]   ;;  %vm448_vm2 = vcmask 523264   ;;  %vm1034_vm3 = vcmask 64512   ;;  %p2011_p5 = scmp.ne.s32.totalorder %s2701_s19, 1 }
  0x15   : > { %2146 = vmatprep.subr.bf16.mxu0 %v2396_v1  ;;  %v2400_v4 = vld [vmem:[%s2709_s25] sm:$0xff]   ;;  %v2399_v5 = vld [vmem:[%s3297_s1 + $0x18] sm:$0xff]   ;;  %v2401_v6 = vld [vmem:[%s2709_s25 + $0x8] sm:$0xff]   ;;  %s1087_s20 = smul.u32 (!%p2011_p5), 384, %s2701_s19 }
  0x16   : > { %2147 = vmatpush3.bf16.msra.mxu0 %v2396_v1  ;;  %2154 = vmatprep.mubr.msk.bf16.mxu0 %vm448_vm2, %v2400_v4  ;;  %v2402_v7 = vld [vmem:[%s2709_s25 + $0x10] sm:$0xff]   ;;  %v2403_v8 = vld [vmem:[%s2709_s25 + $0x18] sm:$0xff]   ;;  %v2404_v9 = vld [vmem:[%s2709_s25 + $0x20] sm:$0xff]  }
  0x17   : > { %2148 = vmatprep.subr.bf16.mxu0 %v2397_v2  ;;  %v2405_v10 = vld [vmem:[%s2709_s25 + $0x28] sm:$0xff]   ;;  %v2406_v11 = vld [vmem:[%s2709_s25 + $0x30] sm:$0xff]   ;;  %v2407_v12 = vld [vmem:[%s2709_s25 + $0x38] sm:$0xff]  }
  0x18   : > { %v2408_v13 = vld [vmem:[%s2709_s25 + $0x40] sm:$0xff]   ;;  %v2409_v14 = vld [vmem:[%s2709_s25 + $0x48] sm:$0xff]   ;;  %v2410_v15 = vld [vmem:[%s2709_s25 + $0x50] sm:$0xff]  }
  0x19   : > { %v2411_v16 = vld [vmem:[%s2709_s25 + $0x58] sm:$0xff]   ;;  %v2412_v17 = vld [vmem:[%s2709_s25 + $0x60] sm:$0xff]   ;;  %v2413_v18 = vld [vmem:[%s2709_s25 + $0x68] sm:$0xff]  }
  0x1a   : > { %2149 = vmatpush3.bf16.msra.mxu0 %v2397_v2  ;;  %v2414_v19 = vld [vmem:[%s2709_s25 + $0x70] sm:$0xff]   ;;  %v2415_v20 = vld [vmem:[%s2709_s25 + $0x78] sm:$0xff]   ;;  %v2416_v21 = vld [vmem:[%s2709_s25 + $0x80] sm:$0xff]  }
  0x1b   : > { %2150 = vmatprep.subr.bf16.mxu0 %v2398_v3  ;;  %v2417_v22 = vld [vmem:[%s2709_s25 + $0x88] sm:$0xff]   ;;  %v2418_v23 = vld [vmem:[%s2709_s25 + $0x90] sm:$0xff]   ;;  %v2419_v24 = vld [vmem:[%s2709_s25 + $0x98] sm:$0xff]  }
  0x1c   : > { %v2420_v25 = vld [vmem:[%s2709_s25 + $0xa0] sm:$0xff]   ;;  %v2421_v26 = vld [vmem:[%s2709_s25 + $0xa8] sm:$0xff]   ;;  %v2422_v27 = vld [vmem:[%s2709_s25 + $0xb0] sm:$0xff]  }
  0x1d   : > { %v2423_v28 = vld [vmem:[%s2709_s25 + $0xb8] sm:$0xff]   ;;  %v2786_v29 = vld [vmem:[%s3298_s2] ss:$0 sm:$0xff] }
  0x1e   : > { %2151 = vmatpush3.bf16.msra.mxu0 %v2398_v3 }
  0x1f   : > { %2152 = vmatprep.subr.bf16.mxu0 %v2399_v5 }
  0x22   : > { %2153 = vmatpush3.bf16.msra.mxu0 %v2399_v5 }
  0x25   : > { %2155 = vmatmul.mubr.msk.bf16.vlgmr.msra.gmra.mrb[0].mxu0 %vm448_vm2, %v2401_v6 }
  0x26   : > { %2158 = vmatprep.mubr.msk.bf16.mxu0 %vm448_vm2, %v2402_v7 }
  0x2d   : > { %2159 = vmatmul.mubr.msk.bf16.gmra.mrb[4].mxu0 %vm448_vm2, %v2403_v8 }
  0x2e   : > { %2162 = vmatprep.mubr.msk.bf16.mxu0 %vm448_vm2, %v2404_v9 }
  0x35   : > { %2163 = vmatmul.mubr.msk.bf16.gmra.mrb[8].mxu0 %vm448_vm2, %v2405_v10 }
  0x36   : > { %2166 = vmatprep.mubr.msk.bf16.mxu0 %vm448_vm2, %v2406_v11 }
  0x3d   : > { %2167 = vmatmul.mubr.msk.bf16.gmra.mrb[12].mxu0 %vm448_vm2, %v2407_v12 }
  0x3e   : > { %2170 = vmatprep.mubr.msk.bf16.mxu0 %vm448_vm2, %v2408_v13 }
  0x45   : > { %2171 = vmatmul.mubr.msk.bf16.gmra.mrb[16].mxu0 %vm448_vm2, %v2409_v14 }
  0x46   : > { %2174 = vmatprep.mubr.msk.bf16.mxu0 %vm448_vm2, %v2410_v15 }
  0x4d   : > { %2175 = vmatmul.mubr.msk.bf16.gmra.mrb[20].mxu0 %vm448_vm2, %v2411_v16 }
  0x4e   : > { %2178 = vmatprep.mubr.msk.bf16.mxu0 %vm448_vm2, %v2412_v17 }
  0x55   : > { %2179 = vmatmul.mubr.msk.bf16.gmra.mrb[24].mxu0 %vm448_vm2, %v2413_v18 }
  0x56   : > { %2182 = vmatprep.mubr.msk.bf16.mxu0 %vm448_vm2, %v2414_v19 }
  0x5d   : > { %2183 = vmatmul.mubr.msk.bf16.gmra.mrb[28].mxu0 %vm448_vm2, %v2415_v20 }
  0x5e   : > { %2186 = vmatprep.mubr.msk.bf16.mxu0 %vm448_vm2, %v2416_v21 }
  0x65   : > { %2187 = vmatmul.mubr.msk.bf16.gmra.mrb[32].mxu0 %vm448_vm2, %v2417_v22 }
  0x66   : > { %2190 = vmatprep.mubr.msk.bf16.mxu0 %vm448_vm2, %v2418_v23 }
  0x6d   : > { %2191 = vmatmul.mubr.msk.bf16.gmra.mrb[36].mxu0 %vm448_vm2, %v2419_v24 }
  0x6e   : > { %2194 = vmatprep.mubr.msk.bf16.mxu0 %vm448_vm2, %v2420_v25 }
  0x75   : > { %2195 = vmatmul.mubr.msk.bf16.gmra.mrb[40].mxu0 %vm448_vm2, %v2421_v26 }
  0x76   : > { %2198 = vmatprep.mubr.msk.bf16.mxu0 %vm448_vm2, %v2422_v27 }
  0x7d   : > { %2199 = vmatmul.mubr.msk.bf16.gmra.mrb[44].mxu0 %vm448_vm2, %v2423_v28 }
  0xf8   : > { %v2156_v30 = vpop.f32.mrb[0].mxu0 }
  0xf9   : > { %v564_v31 = vadd.f32 %v2156_v30, %v2786_v29  ;;  %v555_v32 = vpop.f32.mrb[1].mxu0 }
  0xfa   : > { %v556_v33 = vadd.f32 %v2786_v29, %v555_v32  ;;  %v2157_v34 = vpop.f32.mrb[2].mxu0 }
  0xfb   : > { %v1965_v35 = vmul.f32 -1.442695, %v564_v31  ;;  %v567_v36 = vadd.f32 %v2157_v34, %v2786_v29  ;;  %v558_v37 = vpop.f32.mrb[3].mxu0 }
  0xfc   : > { %v1963_v38 = vmul.f32 -1.442695, %v556_v33  ;;  %v559_v39 = vadd.f32 %v2786_v29, %v558_v37 }
  0xfd   : > { %2424 = vpow2.f32 %v1965_v35  ;;  %v1966_v40 = vmul.f32 -1.442695, %v567_v36 }
  0xfe   : > { %2426 = vpow2.f32 %v1963_v38  ;;  %v1964_v41 = vmul.f32 -1.442695, %v559_v39 }
  0xff   : > { %2428 = vpow2.f32 %v1966_v40 }
 0x100   : > { %2430 = vpow2.f32 %v1964_v41  ;;  %v2160_v42 = vpop.f32.mrb[4].mxu0 }
 0x101   : > { %v580_v43 = vadd.f32 %v2160_v42, %v2786_v29  ;;  %v571_v44 = vpop.f32.mrb[5].mxu0 }
 0x102   : > { %v572_v45 = vadd.f32 %v2786_v29, %v571_v44  ;;  %v2161_v46 = vpop.f32.mrb[6].mxu0 }
 0x103   : > { %v1969_v47 = vmul.f32 -1.442695, %v580_v43  ;;  %v583_v48 = vadd.f32 %v2161_v46, %v2786_v29  ;;  %v574_v49 = vpop.f32.mrb[7].mxu0 }
 0x104   : > { %v1967_v50 = vmul.f32 -1.442695, %v572_v45  ;;  %v575_v51 = vadd.f32 %v2786_v29, %v574_v49 }
 0x105   : > { %2432 = vpow2.f32 %v1969_v47  ;;  %v1970_v52 = vmul.f32 -1.442695, %v583_v48 }
 0x106   : > { %2434 = vpow2.f32 %v1967_v50  ;;  %v1968_v53 = vmul.f32 -1.442695, %v575_v51 }
 0x107   : > { %v2425_v54 = vpop.eup %2424  ;;  %2436 = vpow2.f32 %v1970_v52 }
 0x108   : > { %v2427_v55 = vpop.eup %2426  ;;  %v892_v56 = vadd.f32 1.0, %v2425_v54  ;;  %2438 = vpow2.f32 %v1968_v53  ;;  %v2164_v57 = vpop.f32.mrb[8].mxu0 }
 0x109   : > { %v2429_v58 = vpop.eup %2428  ;;  %v890_v59 = vadd.f32 1.0, %v2427_v55  ;;  %v596_v60 = vadd.f32 %v2164_v57, %v2786_v29  ;;  %v587_v61 = vpop.f32.mrb[9].mxu0 }
 0x10a   : > { %v2431_v62 = vpop.eup %2430  ;;  %2440 = vrcp.f32 %v892_v56  ;;  %v893_v63 = vadd.f32 1.0, %v2429_v58  ;;  %v588_v0 = vadd.f32 %v2786_v29, %v587_v61  ;;  %v2165_v1 = vpop.f32.mrb[10].mxu0 }
 0x10b   : > { %2442 = vrcp.f32 %v890_v59  ;;  %v891_v2 = vadd.f32 1.0, %v2431_v62  ;;  %v1973_v3 = vmul.f32 -1.442695, %v596_v60  ;;  %v599_v4 = vadd.f32 %v2165_v1, %v2786_v29  ;;  %v590_v5 = vpop.f32.mrb[11].mxu0 }
 0x10c   : > { %2444 = vrcp.f32 %v893_v63  ;;  %v1971_v6 = vmul.f32 -1.442695, %v588_v0  ;;  %v591_v7 = vadd.f32 %v2786_v29, %v590_v5 }
 0x10d   : > { %2446 = vrcp.f32 %v891_v2  ;;  %v1974_v8 = vmul.f32 -1.442695, %v599_v4 }
 0x10e   : > { %2448 = vpow2.f32 %v1973_v3  ;;  %v1972_v9 = vmul.f32 -1.442695, %v591_v7 }
 0x10f   : > { %v2433_v10 = vpop.eup %2432  ;;  %2450 = vpow2.f32 %v1971_v6 }
 0x110   : > { %v2435_v11 = vpop.eup %2434  ;;  %v896_v12 = vadd.f32 1.0, %v2433_v10  ;;  %2452 = vpow2.f32 %v1974_v8  ;;  %v2168_v13 = vpop.f32.mrb[12].mxu0 }
 0x111   : > { %v2437_v14 = vpop.eup %2436  ;;  %v894_v15 = vadd.f32 1.0, %v2435_v11  ;;  %2454 = vpow2.f32 %v1972_v9  ;;  %v612_v16 = vadd.f32 %v2168_v13, %v2786_v29  ;;  %v603_v17 = vpop.f32.mrb[13].mxu0 }
 0x112   : > { %v2439_v18 = vpop.eup %2438  ;;  %2456 = vrcp.f32 %v896_v12  ;;  %v897_v19 = vadd.f32 1.0, %v2437_v14  ;;  %v604_v20 = vadd.f32 %v2786_v29, %v603_v17  ;;  %v2169_v21 = vpop.f32.mrb[14].mxu0 }
 0x113   : > { %2458 = vrcp.f32 %v894_v15  ;;  %v895_v22 = vadd.f32 1.0, %v2439_v18  ;;  %v1977_v23 = vmul.f32 -1.442695, %v612_v16  ;;  %v615_v24 = vadd.f32 %v2169_v21, %v2786_v29  ;;  %v606_v25 = vpop.f32.mrb[15].mxu0 }
 0x114   : > { %v2441_v26 = vpop.eup %2440  ;;  %2460 = vrcp.f32 %v897_v19  ;;  %v1975_v27 = vmul.f32 -1.442695, %v604_v20  ;;  %v607_v28 = vadd.f32 %v2786_v29, %v606_v25 }
 0x115   : > { %v2443_v30 = vpop.eup %2442  ;;  %1037 = vst.msk [vmem:[#allocation2 + $0x10] sm:$0xff] %vm1034_vm3, %v2441_v26  ;;  %2462 = vrcp.f32 %v895_v22  ;;  %v1978_v31 = vmul.f32 -1.442695, %v615_v24 }
 0x116   : > { %v2445_v32 = vpop.eup %2444  ;;  %1035 = vst.msk [vmem:[#allocation2] sm:$0xff] %vm1034_vm3, %v2443_v30  ;;  %2464 = vpow2.f32 %v1977_v23  ;;  %v1976_v33 = vmul.f32 -1.442695, %v607_v28 }
 0x117   : > { %v2447_v34 = vpop.eup %2446  ;;  %1038 = vst.msk [vmem:[#allocation2 + $0x18] sm:$0xff] %vm1034_vm3, %v2445_v32  ;;  %2466 = vpow2.f32 %v1975_v27 }
 0x118   : > { %v2449_v35 = vpop.eup %2448  ;;  %1036 = vst.msk [vmem:[#allocation2 + $0x8] sm:$0xff] %vm1034_vm3, %v2447_v34  ;;  %2468 = vpow2.f32 %v1978_v31  ;;  %v2172_v36 = vpop.f32.mrb[16].mxu0 }
 0x119   : > { %v2451_v37 = vpop.eup %2450  ;;  %v900_v38 = vadd.f32 1.0, %v2449_v35  ;;  %2470 = vpow2.f32 %v1976_v33  ;;  %v628_v39 = vadd.f32 %v2172_v36, %v2786_v29  ;;  %v619_v40 = vpop.f32.mrb[17].mxu0 }
 0x11a   : > { %v2453_v41 = vpop.eup %2452  ;;  %v898_v42 = vadd.f32 1.0, %v2451_v37  ;;  %v620_v43 = vadd.f32 %v2786_v29, %v619_v40  ;;  %v2173_v44 = vpop.f32.mrb[18].mxu0 }
 0x11b   : > { %v2455_v45 = vpop.eup %2454  ;;  %2472 = vrcp.f32 %v900_v38  ;;  %v901_v46 = vadd.f32 1.0, %v2453_v41  ;;  %v1981_v47 = vmul.f32 -1.442695, %v628_v39  ;;  %v631_v48 = vadd.f32 %v2173_v44, %v2786_v29  ;;  %v622_v49 = vpop.f32.mrb[19].mxu0 }
 0x11c   : > { %v2457_v50 = vpop.eup %2456  ;;  %2474 = vrcp.f32 %v898_v42  ;;  %v899_v51 = vadd.f32 1.0, %v2455_v45  ;;  %v1979_v52 = vmul.f32 -1.442695, %v620_v43  ;;  %v623_v53 = vadd.f32 %v2786_v29, %v622_v49 }
 0x11d   : > { %v2459_v54 = vpop.eup %2458  ;;  %1041 = vst.msk [vmem:[#allocation2 + $0x30] sm:$0xff] %vm1034_vm3, %v2457_v50  ;;  %2476 = vrcp.f32 %v901_v46  ;;  %v1982_v55 = vmul.f32 -1.442695, %v631_v48 }
 0x11e   : > { %v2461_v56 = vpop.eup %2460  ;;  %1039 = vst.msk [vmem:[#allocation2 + $0x20] sm:$0xff] %vm1034_vm3, %v2459_v54  ;;  %2478 = vrcp.f32 %v899_v51  ;;  %v1980_v57 = vmul.f32 -1.442695, %v623_v53 }
 0x11f   : > { %v2463_v58 = vpop.eup %2462  ;;  %1042 = vst.msk [vmem:[#allocation2 + $0x38] sm:$0xff] %vm1034_vm3, %v2461_v56  ;;  %2480 = vpow2.f32 %v1981_v47 }
 0x120   : > { %v2465_v59 = vpop.eup %2464  ;;  %1040 = vst.msk [vmem:[#allocation2 + $0x28] sm:$0xff] %vm1034_vm3, %v2463_v58  ;;  %2482 = vpow2.f32 %v1979_v52  ;;  %v2176_v60 = vpop.f32.mrb[20].mxu0 }
 0x121   : > { %v2467_v61 = vpop.eup %2466  ;;  %v904_v62 = vadd.f32 1.0, %v2465_v59  ;;  %2484 = vpow2.f32 %v1982_v55  ;;  %v644_v63 = vadd.f32 %v2176_v60, %v2786_v29  ;;  %v635_v0 = vpop.f32.mrb[21].mxu0 }
 0x122   : > { %v2469_v1 = vpop.eup %2468  ;;  %v902_v2 = vadd.f32 1.0, %v2467_v61  ;;  %2486 = vpow2.f32 %v1980_v57  ;;  %v636_v3 = vadd.f32 %v2786_v29, %v635_v0  ;;  %v2177_v4 = vpop.f32.mrb[22].mxu0 }
 0x123   : > { %v2471_v5 = vpop.eup %2470  ;;  %2488 = vrcp.f32 %v904_v62  ;;  %v905_v6 = vadd.f32 1.0, %v2469_v1  ;;  %v1985_v7 = vmul.f32 -1.442695, %v644_v63  ;;  %v647_v8 = vadd.f32 %v2177_v4, %v2786_v29  ;;  %v638_v9 = vpop.f32.mrb[23].mxu0 }
 0x124   : > { %2490 = vrcp.f32 %v902_v2  ;;  %v903_v10 = vadd.f32 1.0, %v2471_v5  ;;  %v1983_v11 = vmul.f32 -1.442695, %v636_v3  ;;  %v639_v12 = vadd.f32 %v2786_v29, %v638_v9 }
 0x125   : > { %v2473_v13 = vpop.eup %2472  ;;  %2492 = vrcp.f32 %v905_v6  ;;  %v1986_v14 = vmul.f32 -1.442695, %v647_v8 }
 0x126   : > { %v2475_v15 = vpop.eup %2474  ;;  %1045 = vst.msk [vmem:[#allocation2 + $0x50] sm:$0xff] %vm1034_vm3, %v2473_v13  ;;  %2494 = vrcp.f32 %v903_v10  ;;  %v1984_v16 = vmul.f32 -1.442695, %v639_v12 }
 0x127   : > { %v2477_v17 = vpop.eup %2476  ;;  %1043 = vst.msk [vmem:[#allocation2 + $0x40] sm:$0xff] %vm1034_vm3, %v2475_v15  ;;  %2496 = vpow2.f32 %v1985_v7 }
 0x128   : > { %v2479_v18 = vpop.eup %2478  ;;  %1046 = vst.msk [vmem:[#allocation2 + $0x58] sm:$0xff] %vm1034_vm3, %v2477_v17  ;;  %2498 = vpow2.f32 %v1983_v11  ;;  %v2180_v19 = vpop.f32.mrb[24].mxu0 }
 0x129   : > { %v2481_v20 = vpop.eup %2480  ;;  %1044 = vst.msk [vmem:[#allocation2 + $0x48] sm:$0xff] %vm1034_vm3, %v2479_v18  ;;  %2500 = vpow2.f32 %v1986_v14  ;;  %v660_v21 = vadd.f32 %v2180_v19, %v2786_v29  ;;  %v651_v22 = vpop.f32.mrb[25].mxu0 }
 0x12a   : > { %v2483_v23 = vpop.eup %2482  ;;  %v908_v24 = vadd.f32 1.0, %v2481_v20  ;;  %2502 = vpow2.f32 %v1984_v16  ;;  %v652_v25 = vadd.f32 %v2786_v29, %v651_v22  ;;  %v2181_v26 = vpop.f32.mrb[26].mxu0 }
 0x12b   : > { %v2485_v27 = vpop.eup %2484  ;;  %v906_v28 = vadd.f32 1.0, %v2483_v23  ;;  %v663_v30 = vadd.f32 %v2181_v26, %v2786_v29  ;;  %v654_v31 = vpop.f32.mrb[27].mxu0  ;;  %v1989_v34 = vmul.f32 -1.442695, %v660_v21 }
 0x12c   : > { %v2487_v32 = vpop.eup %2486  ;;  %2504 = vrcp.f32 %v908_v24  ;;  %v909_v33 = vadd.f32 1.0, %v2485_v27  ;;  %v655_v35 = vadd.f32 %v2786_v29, %v654_v31  ;;  %v1987_v38 = vmul.f32 -1.442695, %v652_v25 }
 0x12d   : > { %v2489_v36 = vpop.eup %2488  ;;  %2506 = vrcp.f32 %v906_v28  ;;  %v907_v37 = vadd.f32 1.0, %v2487_v32  ;;  %v1990_v40 = vmul.f32 -1.442695, %v663_v30 }
 0x12e   : > { %v2491_v39 = vpop.eup %2490  ;;  %1049 = vst.msk [vmem:[#allocation2 + $0x70] sm:$0xff] %vm1034_vm3, %v2489_v36  ;;  %2508 = vrcp.f32 %v909_v33  ;;  %v1988_v42 = vmul.f32 -1.442695, %v655_v35 }
 0x12f   : > { %v2493_v41 = vpop.eup %2492  ;;  %1047 = vst.msk [vmem:[#allocation2 + $0x60] sm:$0xff] %vm1034_vm3, %v2491_v39  ;;  %2510 = vrcp.f32 %v907_v37 }
 0x130   : > { %v2495_v43 = vpop.eup %2494  ;;  %1050 = vst.msk [vmem:[#allocation2 + $0x78] sm:$0xff] %vm1034_vm3, %v2493_v41  ;;  %2512 = vpow2.f32 %v1989_v34  ;;  %v2184_v44 = vpop.f32.mrb[28].mxu0 }
 0x131   : > { %v2497_v45 = vpop.eup %2496  ;;  %1048 = vst.msk [vmem:[#allocation2 + $0x68] sm:$0xff] %vm1034_vm3, %v2495_v43  ;;  %2514 = vpow2.f32 %v1987_v38  ;;  %v676_v46 = vadd.f32 %v2184_v44, %v2786_v29  ;;  %v667_v47 = vpop.f32.mrb[29].mxu0 }
 0x132   : > { %v2499_v48 = vpop.eup %2498  ;;  %v912_v49 = vadd.f32 1.0, %v2497_v45  ;;  %2516 = vpow2.f32 %v1990_v40  ;;  %v668_v50 = vadd.f32 %v2786_v29, %v667_v47  ;;  %v2185_v51 = vpop.f32.mrb[30].mxu0 }
 0x133   : > { %v2501_v52 = vpop.eup %2500  ;;  %v910_v53 = vadd.f32 1.0, %v2499_v48  ;;  %2518 = vpow2.f32 %v1988_v42  ;;  %v679_v54 = vadd.f32 %v2185_v51, %v2786_v29  ;;  %v670_v55 = vpop.f32.mrb[31].mxu0  ;;  %v1993_v58 = vmul.f32 -1.442695, %v676_v46 }
 0x134   : > { %v2503_v56 = vpop.eup %2502  ;;  %2520 = vrcp.f32 %v912_v49  ;;  %v913_v57 = vadd.f32 1.0, %v2501_v52  ;;  %v671_v59 = vadd.f32 %v2786_v29, %v670_v55  ;;  %v1991_v61 = vmul.f32 -1.442695, %v668_v50 }
 0x135   : > { %2522 = vrcp.f32 %v910_v53  ;;  %v911_v60 = vadd.f32 1.0, %v2503_v56  ;;  %v1994_v63 = vmul.f32 -1.442695, %v679_v54 }
 0x136   : > { %v2505_v62 = vpop.eup %2504  ;;  %2524 = vrcp.f32 %v913_v57  ;;  %v1992_v1 = vmul.f32 -1.442695, %v671_v59 }
 0x137   : > { %v2507_v0 = vpop.eup %2506  ;;  %1053 = vst.msk [vmem:[#allocation2 + $0x90] sm:$0xff] %vm1034_vm3, %v2505_v62  ;;  %2526 = vrcp.f32 %v911_v60 }
 0x138   : > { %v2509_v2 = vpop.eup %2508  ;;  %1051 = vst.msk [vmem:[#allocation2 + $0x80] sm:$0xff] %vm1034_vm3, %v2507_v0  ;;  %2528 = vpow2.f32 %v1993_v58  ;;  %v2188_v3 = vpop.f32.mrb[32].mxu0 }
 0x139   : > { %v2511_v4 = vpop.eup %2510  ;;  %1054 = vst.msk [vmem:[#allocation2 + $0x98] sm:$0xff] %vm1034_vm3, %v2509_v2  ;;  %2530 = vpow2.f32 %v1991_v61  ;;  %v692_v5 = vadd.f32 %v2188_v3, %v2786_v29  ;;  %v683_v6 = vpop.f32.mrb[33].mxu0 }
 0x13a   : > { %v2513_v7 = vpop.eup %2512  ;;  %1052 = vst.msk [vmem:[#allocation2 + $0x88] sm:$0xff] %vm1034_vm3, %v2511_v4  ;;  %2532 = vpow2.f32 %v1994_v63  ;;  %v684_v8 = vadd.f32 %v2786_v29, %v683_v6  ;;  %v2189_v9 = vpop.f32.mrb[34].mxu0 }
 0x13b   : > { %v2515_v10 = vpop.eup %2514  ;;  %v916_v11 = vadd.f32 1.0, %v2513_v7  ;;  %2534 = vpow2.f32 %v1992_v1  ;;  %v695_v12 = vadd.f32 %v2189_v9, %v2786_v29  ;;  %v686_v13 = vpop.f32.mrb[35].mxu0  ;;  %v1997_v19 = vmul.f32 -1.442695, %v692_v5 }
 0x13c   : > { %v2517_v14 = vpop.eup %2516  ;;  %v914_v15 = vadd.f32 1.0, %v2515_v10  ;;  %v687_v16 = vadd.f32 %v2786_v29, %v686_v13  ;;  %v1995_v22 = vmul.f32 -1.442695, %v684_v8 }
 0x13d   : > { %v2519_v17 = vpop.eup %2518  ;;  %2536 = vrcp.f32 %v916_v11  ;;  %v917_v18 = vadd.f32 1.0, %v2517_v14  ;;  %v1998_v24 = vmul.f32 -1.442695, %v695_v12 }
 0x13e   : > { %v2521_v20 = vpop.eup %2520  ;;  %2538 = vrcp.f32 %v914_v15  ;;  %v915_v21 = vadd.f32 1.0, %v2519_v17  ;;  %v1996_v26 = vmul.f32 -1.442695, %v687_v16 }
 0x13f   : > { %v2523_v23 = vpop.eup %2522  ;;  %1057 = vst.msk [vmem:[#allocation2 + $0xb0] sm:$0xff] %vm1034_vm3, %v2521_v20  ;;  %2540 = vrcp.f32 %v917_v18 }
 0x140   : > { %v2525_v25 = vpop.eup %2524  ;;  %1055 = vst.msk [vmem:[#allocation2 + $0xa0] sm:$0xff] %vm1034_vm3, %v2523_v23  ;;  %2542 = vrcp.f32 %v915_v21  ;;  %v2192_v27 = vpop.f32.mrb[36].mxu0 }
 0x141   : > { %v2527_v28 = vpop.eup %2526  ;;  %1058 = vst.msk [vmem:[#allocation2 + $0xb8] sm:$0xff] %vm1034_vm3, %v2525_v25  ;;  %2544 = vpow2.f32 %v1997_v19  ;;  %v708_v30 = vadd.f32 %v2192_v27, %v2786_v29  ;;  %v699_v31 = vpop.f32.mrb[37].mxu0 }
 0x142   : > { %v2529_v32 = vpop.eup %2528  ;;  %1056 = vst.msk [vmem:[#allocation2 + $0xa8] sm:$0xff] %vm1034_vm3, %v2527_v28  ;;  %2546 = vpow2.f32 %v1995_v22  ;;  %v700_v33 = vadd.f32 %v2786_v29, %v699_v31  ;;  %v2193_v34 = vpop.f32.mrb[38].mxu0 }
 0x143   : > { %v2531_v35 = vpop.eup %2530  ;;  %v920_v36 = vadd.f32 1.0, %v2529_v32  ;;  %2548 = vpow2.f32 %v1998_v24  ;;  %v711_v37 = vadd.f32 %v2193_v34, %v2786_v29  ;;  %v702_v38 = vpop.f32.mrb[39].mxu0  ;;  %v2001_v44 = vmul.f32 -1.442695, %v708_v30 }
 0x144   : > { %v2533_v39 = vpop.eup %2532  ;;  %v918_v40 = vadd.f32 1.0, %v2531_v35  ;;  %2550 = vpow2.f32 %v1996_v26  ;;  %v703_v41 = vadd.f32 %v2786_v29, %v702_v38  ;;  %v1999_v46 = vmul.f32 -1.442695, %v700_v33 }
 0x145   : > { %v2535_v42 = vpop.eup %2534  ;;  %2552 = vrcp.f32 %v920_v36  ;;  %v921_v43 = vadd.f32 1.0, %v2533_v39  ;;  %v2002_v48 = vmul.f32 -1.442695, %v711_v37 }
 0x146   : > { %2554 = vrcp.f32 %v918_v40  ;;  %v919_v45 = vadd.f32 1.0, %v2535_v42  ;;  %v2000_v50 = vmul.f32 -1.442695, %v703_v41 }
 0x147   : > { %v2537_v47 = vpop.eup %2536  ;;  %2556 = vrcp.f32 %v921_v43 }
 0x148   : > { %v2539_v49 = vpop.eup %2538  ;;  %1061 = vst.msk [vmem:[#allocation2 + $0xd0] sm:$0xff] %vm1034_vm3, %v2537_v47  ;;  %2558 = vrcp.f32 %v919_v45  ;;  %v2196_v51 = vpop.f32.mrb[40].mxu0 }
 0x149   : > { %v2541_v52 = vpop.eup %2540  ;;  %1059 = vst.msk [vmem:[#allocation2 + $0xc0] sm:$0xff] %vm1034_vm3, %v2539_v49  ;;  %2560 = vpow2.f32 %v2001_v44  ;;  %v724_v53 = vadd.f32 %v2196_v51, %v2786_v29  ;;  %v715_v54 = vpop.f32.mrb[41].mxu0 }
 0x14a   : > { %v2543_v55 = vpop.eup %2542  ;;  %1062 = vst.msk [vmem:[#allocation2 + $0xd8] sm:$0xff] %vm1034_vm3, %v2541_v52  ;;  %2562 = vpow2.f32 %v1999_v46  ;;  %v716_v56 = vadd.f32 %v2786_v29, %v715_v54  ;;  %v2197_v57 = vpop.f32.mrb[42].mxu0 }
 0x14b   : > { %v2545_v58 = vpop.eup %2544  ;;  %1060 = vst.msk [vmem:[#allocation2 + $0xc8] sm:$0xff] %vm1034_vm3, %v2543_v55  ;;  %2564 = vpow2.f32 %v2002_v48  ;;  %v2005_v59 = vmul.f32 -1.442695, %v724_v53  ;;  %v727_v60 = vadd.f32 %v2197_v57, %v2786_v29  ;;  %v718_v61 = vpop.f32.mrb[43].mxu0 }
 0x14c   : > { %v2547_v62 = vpop.eup %2546  ;;  %v924_v63 = vadd.f32 1.0, %v2545_v58  ;;  %2566 = vpow2.f32 %v2000_v50  ;;  %v719_v0 = vadd.f32 %v2786_v29, %v718_v61  ;;  %v2003_v5 = vmul.f32 -1.442695, %v716_v56 }
 0x14d   : > { %v2549_v1 = vpop.eup %2548  ;;  %v922_v2 = vadd.f32 1.0, %v2547_v62  ;;  %2568 = vpow2.f32 %v2005_v59  ;;  %v2006_v8 = vmul.f32 -1.442695, %v727_v60 }
 0x14e   : > { %v2551_v3 = vpop.eup %2550  ;;  %2570 = vrcp.f32 %v924_v63  ;;  %v925_v4 = vadd.f32 1.0, %v2549_v1  ;;  %v2004_v10 = vmul.f32 -1.442695, %v719_v0  ;;  %v1088_v1 = vlaneseq (!%p2011_p5) }
 0x14f   : > { %v2553_v6 = vpop.eup %2552  ;;  %2572 = vrcp.f32 %v922_v2  ;;  %v923_v7 = vadd.f32 1.0, %v2551_v3  ;;  %v2888_v3 = vstv (!%p2011_p5), %s1087_s20 }
 0x150   : > { %v2555_v9 = vpop.eup %2554  ;;  %1065 = vst.msk [vmem:[#allocation2 + $0xf0] sm:$0xff] %vm1034_vm3, %v2553_v6  ;;  %2574 = vrcp.f32 %v925_v4  ;;  %v2200_v11 = vpop.f32.mrb[44].mxu0  ;;  %v2886_v2 = vshrl.u32 (!%p2011_p5), %v1088_v1, 7 }
 0x151   : > { %v2557_v12 = vpop.eup %2556  ;;  %1063 = vst.msk [vmem:[#allocation2 + $0xe0] sm:$0xff] %vm1034_vm3, %v2555_v9  ;;  %2576 = vrcp.f32 %v923_v7  ;;  %v740_v13 = vadd.f32 %v2200_v11, %v2786_v29  ;;  %v731_v14 = vpop.f32.mrb[45].mxu0 }
 0x152   : > { %v2559_v15 = vpop.eup %2558  ;;  %1066 = vst.msk [vmem:[#allocation2 + $0xf8] sm:$0xff] %vm1034_vm3, %v2557_v12  ;;  %2578 = vpow2.f32 %v2003_v5  ;;  %v2201_v16 = vpop.f32.mrb[46].mxu0  ;;  %v732_v19 = vadd.f32 %v2786_v29, %v731_v14  ;;  %v1138_v4 = vadd.s32 (!%p2011_p5), %v2888_v3, %v2886_v2  ;;  %v1234_v5 = vld [vmem:[#allocation2] sm:$0xff] (!%p2011_p5)  ;;  %v1090_v6 = vadd.s32 (!%p2011_p5), 8, %v2886_v2  ;;  %v1235_v14 = vld [vmem:[#allocation2 + $0x8] sm:$0xff] (!%p2011_p5) }
 0x153   : > { %v2561_v17 = vpop.eup %2560  ;;  %1064 = vst.msk [vmem:[#allocation2 + $0xe8] sm:$0xff] %vm1034_vm3, %v2559_v15  ;;  %2580 = vpow2.f32 %v2006_v8  ;;  %v2009_v18 = vmul.f32 -1.442695, %v740_v13  ;;  %v734_v20 = vpop.f32.mrb[47].mxu0  ;;  %v743_v23 = vadd.f32 %v2201_v16, %v2786_v29  ;;  %v1091_v7 = vadd.s32 (!%p2011_p5), 16, %v2886_v2  ;;  %v1236_v16 = vld [vmem:[#allocation2 + $0x10] sm:$0xff] (!%p2011_p5) }
 0x154   : > { %v2563_v21 = vpop.eup %2562  ;;  %v928_v22 = vadd.f32 1.0, %v2561_v17  ;;  %2582 = vpow2.f32 %v2004_v10  ;;  %v735_v26 = vadd.f32 %v2786_v29, %v734_v20  ;;  %v2007_v32 = vmul.f32 -1.442695, %v732_v19 }
 0x155   : > { %v2565_v24 = vpop.eup %2564  ;;  %v926_v25 = vadd.f32 1.0, %v2563_v21  ;;  %2584 = vpow2.f32 %v2009_v18  ;;  %v2010_v35 = vmul.f32 -1.442695, %v743_v23  ;;  %v1092_v8 = vadd.s32 (!%p2011_p5), 24, %v2886_v2  ;;  %v1237_v18 = vld [vmem:[#allocation2 + $0x18] sm:$0xff] (!%p2011_p5)  ;;  %v1238_v21 = vld [vmem:[#allocation2 + $0x20] sm:$0xff] (!%p2011_p5) }
 0x156   : > { %v2567_v27 = vpop.eup %2566  ;;  %2586 = vrcp.f32 %v928_v22  ;;  %v929_v28 = vadd.f32 1.0, %v2565_v24  ;;  %v2008_v37 = vmul.f32 -1.442695, %v735_v26  ;;  %v1093_v9 = vadd.s32 (!%p2011_p5), 32, %v2886_v2  ;;  %v1239_v24 = vld [vmem:[#allocation2 + $0x28] sm:$0xff] (!%p2011_p5) }
 0x157   : > { %v2569_v30 = vpop.eup %2568  ;;  %2588 = vrcp.f32 %v926_v25  ;;  %v927_v31 = vadd.f32 1.0, %v2567_v27  ;;  %v1094_v10 = vadd.s32 (!%p2011_p5), 40, %v2886_v2  ;;  %v1095_v11 = vadd.s32 (!%p2011_p5), 48, %v2886_v2  ;;  %v1240_v25 = vld [vmem:[#allocation2 + $0x30] sm:$0xff] (!%p2011_p5)  ;;  %v1241_v27 = vld [vmem:[#allocation2 + $0x38] sm:$0xff] (!%p2011_p5) }
 0x158   : > { %v2571_v33 = vpop.eup %2570  ;;  %2590 = vrcp.f32 %v929_v28  ;;  %v932_v34 = vadd.f32 1.0, %v2569_v30  ;;  %v1096_v12 = vadd.s32 (!%p2011_p5), 56, %v2886_v2  ;;  %vm1186_vm4 = vcmp.lt.s32.totalorder (!%p2011_p5), %v1138_v4, 600 }
 0x159   : > { %v2573_v36 = vpop.eup %2572  ;;  %1069 = vst.msk [vmem:[#allocation2 + $0x110] sm:$0xff] %vm1034_vm3, %v2571_v33  ;;  %2592 = vrcp.f32 %v927_v31  ;;  %v1139_v13 = vadd.s32 (!%p2011_p5), %v2888_v3, %v1090_v6  ;;  %v1140_v15 = vadd.s32 (!%p2011_p5), %v2888_v3, %v1091_v7  ;;  %v1141_v17 = vadd.s32 (!%p2011_p5), %v2888_v3, %v1092_v8 }
 0x15a   : > { %v2575_v38 = vpop.eup %2574  ;;  %1067 = vst.msk [vmem:[#allocation2 + $0x100] sm:$0xff] %vm1034_vm3, %v2573_v36  ;;  %2594 = vrcp.f32 %v932_v34  ;;  %v1282_v19 = vsel (!%p2011_p5), %vm1186_vm4, %v1234_v5, 0.0  ;;  %v1142_v20 = vadd.s32 (!%p2011_p5), %v2888_v3, %v1093_v9  ;;  %v1143_v22 = vadd.s32 (!%p2011_p5), %v2888_v3, %v1094_v10 }
 0x15b   : > { %v2577_v29 = vpop.eup %2576  ;;  %1070 = vst.msk [vmem:[#allocation2 + $0x118] sm:$0xff] %vm1034_vm3, %v2575_v38  ;;  %2596 = vpow2.f32 %v2007_v32  ;;  %v1144_v23 = vadd.s32 (!%p2011_p5), %v2888_v3, %v1095_v11  ;;  %1330 = vst.msk [vmem:[#allocation2] sm:$0xff] (!%p2011_p5), %vm1034_vm3, %v1282_v19  ;;  %vm1187_vm5 = vcmp.lt.s32.totalorder (!%p2011_p5), %v1139_v13, 600  ;;  %vm1188_vm6 = vcmp.lt.s32.totalorder (!%p2011_p5), %v1140_v15, 600  ;;  %v1250_v11 = vld [vmem:[#allocation2 + $0x80] sm:$0xff] (!%p2011_p5) }
 0x15c   : > { %v2579_v39 = vpop.eup %2578  ;;  %1068 = vst.msk [vmem:[#allocation2 + $0x108] sm:$0xff] %vm1034_vm3, %v2577_v29  ;;  %2598 = vpow2.f32 %v2010_v35  ;;  %vm1189_vm7 = vcmp.lt.s32.totalorder (!%p2011_p5), %v1141_v17, 600  ;;  %v1145_v26 = vadd.s32 (!%p2011_p5), %v2888_v3, %v1096_v12  ;;  %v1283_v28 = vsel (!%p2011_p5), %vm1187_vm5, %v1235_v14, 0.0 }
 0x15d   : > { %v2581_v40 = vpop.eup %2580  ;;  %v930_v41 = vadd.f32 1.0, %v2579_v39  ;;  %2600 = vpow2.f32 %v2008_v37  ;;  %v1284_v30 = vsel (!%p2011_p5), %vm1188_vm6, %v1236_v16, 0.0  ;;  %v1285_v31 = vsel (!%p2011_p5), %vm1189_vm7, %v1237_v18, 0.0  ;;  %1331 = vst.msk [vmem:[#allocation2 + $0x8] sm:$0xff] (!%p2011_p5), %vm1034_vm3, %v1283_v28  ;;  %v1251_v16 = vld [vmem:[#allocation2 + $0x88] sm:$0xff] (!%p2011_p5)  ;;  %v1252_v18 = vld [vmem:[#allocation2 + $0x90] sm:$0xff] (!%p2011_p5) }
 0x15e   : > { %v2583_v42 = vpop.eup %2582  ;;  %v933_v43 = vadd.f32 1.0, %v2581_v40  ;;  %vm1190_vm8 = vcmp.lt.s32.totalorder (!%p2011_p5), %v1142_v20, 600  ;;  %1332 = vst.msk [vmem:[#allocation2 + $0x10] sm:$0xff] (!%p2011_p5), %vm1034_vm3, %v1284_v30  ;;  %1333 = vst.msk [vmem:[#allocation2 + $0x18] sm:$0xff] (!%p2011_p5), %vm1034_vm3, %v1285_v31  ;;  %vm1191_vm9 = vcmp.lt.s32.totalorder (!%p2011_p5), %v1143_v22, 600  ;;  %vm1192_vm10 = vcmp.lt.s32.totalorder (!%p2011_p5), %v1144_v23, 600 }
 0x15f   : > { %v2585_v44 = vpop.eup %2584  ;;  %2602 = vrcp.f32 %v930_v41  ;;  %v931_v45 = vadd.f32 1.0, %v2583_v42  ;;  %v1286_v32 = vsel (!%p2011_p5), %vm1190_vm8, %v1238_v21, 0.0  ;;  %vm1193_vm11 = vcmp.lt.s32.totalorder (!%p2011_p5), %v1145_v26, 600  ;;  %v1242_v41 = vld [vmem:[#allocation2 + $0x40] sm:$0xff] (!%p2011_p5)  ;;  %v1253_v20 = vld [vmem:[#allocation2 + $0x98] sm:$0xff] (!%p2011_p5)  ;;  %v1256_v28 = vld [vmem:[#allocation2 + $0xb0] sm:$0xff] (!%p2011_p5) }
 0x160   : > { %v2587_v46 = vpop.eup %2586  ;;  %2604 = vrcp.f32 %v933_v43  ;;  %v936_v47 = vadd.f32 1.0, %v2585_v44  ;;  %1334 = vst.msk [vmem:[#allocation2 + $0x20] sm:$0xff] (!%p2011_p5), %vm1034_vm3, %v1286_v32  ;;  %v1287_v33 = vsel (!%p2011_p5), %vm1191_vm9, %v1239_v24, 0.0  ;;  %v1288_v34 = vsel (!%p2011_p5), %vm1192_vm10, %v1240_v25, 0.0  ;;  %v1254_v22 = vld [vmem:[#allocation2 + $0xa0] sm:$0xff] (!%p2011_p5)  ;;  %v1255_v24 = vld [vmem:[#allocation2 + $0xa8] sm:$0xff] (!%p2011_p5) }
 0x161   : > { %v2589_v48 = vpop.eup %2588  ;;  %1073 = vst.msk [vmem:[#allocation2 + $0x130] sm:$0xff] %vm1034_vm3, %v2587_v46  ;;  %2606 = vrcp.f32 %v931_v45  ;;  %v1289_v35 = vsel (!%p2011_p5), %vm1193_vm11, %v1241_v27, 0.0  ;;  %v1097_v36 = vadd.s32 (!%p2011_p5), 64, %v2886_v2  ;;  %1335 = vst.msk [vmem:[#allocation2 + $0x28] sm:$0xff] (!%p2011_p5), %vm1034_vm3, %v1287_v33  ;;  %v1098_v37 = vadd.s32 (!%p2011_p5), 72, %v2886_v2  ;;  %v1243_v46 = vld [vmem:[#allocation2 + $0x48] sm:$0xff] (!%p2011_p5) }
 0x162   : > { %v2591_v49 = vpop.eup %2590  ;;  %1071 = vst.msk [vmem:[#allocation2 + $0x120] sm:$0xff] %vm1034_vm3, %v2589_v48  ;;  %2608 = vrcp.f32 %v936_v47  ;;  %1336 = vst.msk [vmem:[#allocation2 + $0x30] sm:$0xff] (!%p2011_p5), %vm1034_vm3, %v1288_v34  ;;  %v1099_v38 = vadd.s32 (!%p2011_p5), 80, %v2886_v2  ;;  %v1100_v29 = vadd.s32 (!%p2011_p5), 88, %v2886_v2  ;;  %v1101_v39 = vadd.s32 (!%p2011_p5), 96, %v2886_v2  ;;  %v1244_v48 = vld [vmem:[#allocation2 + $0x50] sm:$0xff] (!%p2011_p5) }
 0x163   : > { %v2593_v50 = vpop.eup %2592  ;;  %1074 = vst.msk [vmem:[#allocation2 + $0x138] sm:$0xff] %vm1034_vm3, %v2591_v49  ;;  %1337 = vst.msk [vmem:[#allocation2 + $0x38] sm:$0xff] (!%p2011_p5), %vm1034_vm3, %v1289_v35  ;;  %v1146_v40 = vadd.s32 (!%p2011_p5), %v2888_v3, %v1097_v36  ;;  %v1102_v42 = vadd.s32 (!%p2011_p5), 104, %v2886_v2  ;;  %v1103_v43 = vadd.s32 (!%p2011_p5), 112, %v2886_v2  ;;  %v1104_v44 = vadd.s32 (!%p2011_p5), 120, %v2886_v2  ;;  %v1257_v30 = vld [vmem:[#allocation2 + $0xb8] sm:$0xff] (!%p2011_p5) }
 0x164   : > { %v2595_v51 = vpop.eup %2594  ;;  %1072 = vst.msk [vmem:[#allocation2 + $0x128] sm:$0xff] %vm1034_vm3, %v2593_v50  ;;  %v1147_v45 = vadd.s32 (!%p2011_p5), %v2888_v3, %v1098_v37  ;;  %v1148_v47 = vadd.s32 (!%p2011_p5), %v2888_v3, %v1099_v38  ;;  %v1149_v49 = vadd.s32 (!%p2011_p5), %v2888_v3, %v1100_v29  ;;  %v1245_v50 = vld [vmem:[#allocation2 + $0x58] sm:$0xff] (!%p2011_p5)  ;;  %v1105_v5 = vadd.s32 (!%p2011_p5), 128, %v2886_v2 }
 0x165   : > { %v2597_v52 = vpop.eup %2596  ;;  %1077 = vst.msk [vmem:[#allocation2 + $0x150] sm:$0xff] %vm1034_vm3, %v2595_v51  ;;  %v1150_v51 = vadd.s32 (!%p2011_p5), %v2888_v3, %v1101_v39  ;;  %vm1194_vm12 = vcmp.lt.s32.totalorder (!%p2011_p5), %v1146_v40, 600  ;;  %v1106_v6 = vadd.s32 (!%p2011_p5), 136, %v2886_v2  ;;  %v1107_v7 = vadd.s32 (!%p2011_p5), 144, %v2886_v2 }
 0x166   : > { %v2599_v53 = vpop.eup %2598  ;;  %v934_v54 = vadd.f32 1.0, %v2597_v52  ;;  %v1246_v52 = vld [vmem:[#allocation2 + $0x60] sm:$0xff] (!%p2011_p5)  ;;  %vm1195_vm13 = vcmp.lt.s32.totalorder (!%p2011_p5), %v1147_v45, 600  ;;  %vm1196_vm14 = vcmp.lt.s32.totalorder (!%p2011_p5), %v1148_v47, 600  ;;  %vm1197_vm15 = vcmp.lt.s32.totalorder (!%p2011_p5), %v1149_v49, 600 }
 0x167   : > { %v2601_v55 = vpop.eup %2600  ;;  %v937_v56 = vadd.f32 1.0, %v2599_v53  ;;  %v1151_v53 = vadd.s32 (!%p2011_p5), %v2888_v3, %v1102_v42  ;;  %vm1198_vm0 = vcmp.lt.s32.totalorder (!%p2011_p5), %v1150_v51, 600  ;;  %v1108_v8 = vadd.s32 (!%p2011_p5), 152, %v2886_v2 }
 0x168   : > { %2610 = vrcp.f32 %v934_v54  ;;  %v935_v57 = vadd.f32 1.0, %v2601_v55  ;;  %v1247_v54 = vld [vmem:[#allocation2 + $0x68] sm:$0xff] (!%p2011_p5)  ;;  %v1152_v55 = vadd.s32 (!%p2011_p5), %v2888_v3, %v1103_v43  ;;  %v1109_v9 = vadd.s32 (!%p2011_p5), 160, %v2886_v2  ;;  %v1258_v43 = vld [vmem:[#allocation2 + $0xc0] sm:$0xff] (!%p2011_p5) }
 0x169   : > { %v2603_v58 = vpop.eup %2602  ;;  %2612 = vrcp.f32 %v937_v56  ;;  %v1153_v56 = vadd.s32 (!%p2011_p5), %v2888_v3, %v1104_v44  ;;  %vm1199_vm1 = vcmp.lt.s32.totalorder (!%p2011_p5), %v1151_v53, 600  ;;  %v1154_v10 = vadd.s32 (!%p2011_p5), %v2888_v3, %v1105_v5 }
 0x16a   : > { %v2605_v59 = vpop.eup %2604  ;;  %1075 = vst.msk [vmem:[#allocation2 + $0x140] sm:$0xff] %vm1034_vm3, %v2603_v58  ;;  %2614 = vrcp.f32 %v935_v57  ;;  %v1290_v57 = vsel (!%p2011_p5), %vm1194_vm12, %v1242_v41, 0.0  ;;  %v1248_v58 = vld [vmem:[#allocation2 + $0x70] sm:$0xff] (!%p2011_p5)  ;;  %vm1200_vm2 = vcmp.lt.s32.totalorder (!%p2011_p5), %v1152_v55, 600  ;;  %v1110_v12 = vadd.s32 (!%p2011_p5), 168, %v2886_v2 }
 0x16b   : > { %v2607_v60 = vpop.eup %2606  ;;  %1078 = vst.msk [vmem:[#allocation2 + $0x158] sm:$0xff] %vm1034_vm3, %v2605_v59  ;;  %v1249_v59 = vld [vmem:[#allocation2 + $0x78] sm:$0xff] (!%p2011_p5)  ;;  %1338 = vst.msk [vmem:[#allocation2 + $0x40] sm:$0xff] (!%p2011_p5), %vm1034_vm3, %v1290_v57  ;;  %vm1201_vm4 = vcmp.lt.s32.totalorder (!%p2011_p5), %v1153_v56, 600  ;;  %v1296_v1 = vsel (!%p2011_p5), %vm1200_vm2, %v1248_v58, 0.0  ;;  %v1111_v13 = vadd.s32 (!%p2011_p5), 176, %v2886_v2  ;;  %v1155_v15 = vadd.s32 (!%p2011_p5), %v2888_v3, %v1106_v6 }
 0x16c   : > { %v2609_v61 = vpop.eup %2608  ;;  %1076 = vst.msk [vmem:[#allocation2 + $0x148] sm:$0xff] %vm1034_vm3, %v2607_v60  ;;  %v1291_v60 = vsel (!%p2011_p5), %vm1195_vm13, %v1243_v46, 0.0  ;;  %v1297_v4 = vsel (!%p2011_p5), %vm1201_vm4, %v1249_v59, 0.0  ;;  %1344 = vst.msk [vmem:[#allocation2 + $0x70] sm:$0xff] (!%p2011_p5), %vm1034_vm3, %v1296_v1  ;;  %v1112_v14 = vadd.s32 (!%p2011_p5), 184, %v2886_v2  ;;  %v1156_v17 = vadd.s32 (!%p2011_p5), %v2888_v3, %v1107_v7  ;;  %v1263_v56 = vld [vmem:[#allocation2 + $0xe8] sm:$0xff] (!%p2011_p5) }
 0x16d   : > { %1081 = vst.msk [vmem:[#allocation2 + $0x170] sm:$0xff] %vm1034_vm3, %v2609_v61  ;;  %v1292_v61 = vsel (!%p2011_p5), %vm1196_vm14, %v1244_v48, 0.0  ;;  %1339 = vst.msk [vmem:[#allocation2 + $0x48] sm:$0xff] (!%p2011_p5), %vm1034_vm3, %v1291_v60  ;;  %v1157_v19 = vadd.s32 (!%p2011_p5), %v2888_v3, %v1108_v8  ;;  %v1158_v21 = vadd.s32 (!%p2011_p5), %v2888_v3, %v1109_v9  ;;  %vm1202_vm5 = vcmp.lt.s32.totalorder (!%p2011_p5), %v1154_v10, 600  ;;  %v1259_v48 = vld [vmem:[#allocation2 + $0xc8] sm:$0xff] (!%p2011_p5)  ;;  %v1264_v60 = vld [vmem:[#allocation2 + $0xf0] sm:$0xff] (!%p2011_p5) }
 0x16e   : > { %1340 = vst.msk [vmem:[#allocation2 + $0x50] sm:$0xff] (!%p2011_p5), %vm1034_vm3, %v1292_v61  ;;  %1345 = vst.msk [vmem:[#allocation2 + $0x78] sm:$0xff] (!%p2011_p5), %vm1034_vm3, %v1297_v4  ;;  %v1159_v23 = vadd.s32 (!%p2011_p5), %v2888_v3, %v1110_v12  ;;  %v1160_v25 = vadd.s32 (!%p2011_p5), %v2888_v3, %v1111_v13  ;;  %v1161_v26 = vadd.s32 (!%p2011_p5), %v2888_v3, %v1112_v14  ;;  %v1298_v27 = vsel (!%p2011_p5), %vm1202_vm5, %v1250_v11, 0.0  ;;  %v1265_v61 = vld [vmem:[#allocation2 + $0xf8] sm:$0xff] (!%p2011_p5)  ;;  %v1266_v13 = vld [vmem:[#allocation2 + $0x100] sm:$0xff] (!%p2011_p5) }
 0x16f   : > { %1086 = sbr.rel (%p2011_p5) target bundleno = 397 (0x18d), region = 44  ;;  %vm1203_vm6 = vcmp.lt.s32.totalorder (!%p2011_p5), %v1155_v15, 600  ;;  %vm1204_vm7 = vcmp.lt.s32.totalorder (!%p2011_p5), %v1156_v17, 600  ;;  %vm1205_vm8 = vcmp.lt.s32.totalorder (!%p2011_p5), %v1157_v19, 600  ;;  %1346 = vst.msk [vmem:[#allocation2 + $0x80] sm:$0xff] (!%p2011_p5), %vm1034_vm3, %v1298_v27  ;;  %vm1206_vm9 = vcmp.lt.s32.totalorder (!%p2011_p5), %v1158_v21, 600 }
 0x170   : > { %v1299_v31 = vsel (!%p2011_p5), %vm1203_vm6, %v1251_v16, 0.0  ;;  %v1300_v32 = vsel (!%p2011_p5), %vm1204_vm7, %v1252_v18, 0.0  ;;  %v1301_v33 = vsel (!%p2011_p5), %vm1205_vm8, %v1253_v20, 0.0  ;;  %v1302_v34 = vsel (!%p2011_p5), %vm1206_vm9, %v1254_v22, 0.0  ;;  %v1267_v18 = vld [vmem:[#allocation2 + $0x108] sm:$0xff] (!%p2011_p5)  ;;  %v1268_v20 = vld [vmem:[#allocation2 + $0x110] sm:$0xff] (!%p2011_p5) }
 0x171   : > { %1347 = vst.msk [vmem:[#allocation2 + $0x88] sm:$0xff] (!%p2011_p5), %vm1034_vm3, %v1299_v31  ;;  %1348 = vst.msk [vmem:[#allocation2 + $0x90] sm:$0xff] (!%p2011_p5), %vm1034_vm3, %v1300_v32  ;;  %vm1207_vm10 = vcmp.lt.s32.totalorder (!%p2011_p5), %v1159_v23, 600  ;;  %vm1208_vm11 = vcmp.lt.s32.totalorder (!%p2011_p5), %v1160_v25, 600  ;;  %vm1209_vm12 = vcmp.lt.s32.totalorder (!%p2011_p5), %v1161_v26, 600  ;;  %v1113_v38 = vadd.s32 (!%p2011_p5), 192, %v2886_v2 }
 0x172   : > { %v2611_v62 = vpop.eup %2610  ;;  %1349 = vst.msk [vmem:[#allocation2 + $0x98] sm:$0xff] (!%p2011_p5), %vm1034_vm3, %v1301_v33  ;;  %1350 = vst.msk [vmem:[#allocation2 + $0xa0] sm:$0xff] (!%p2011_p5), %vm1034_vm3, %v1302_v34  ;;  %v1303_v35 = vsel (!%p2011_p5), %vm1207_vm10, %v1255_v24, 0.0  ;;  %v1304_v36 = vsel (!%p2011_p5), %vm1208_vm11, %v1256_v28, 0.0  ;;  %v1305_v37 = vsel (!%p2011_p5), %vm1209_vm12, %v1257_v30, 0.0  ;;  %v1114_v29 = vadd.s32 (!%p2011_p5), 200, %v2886_v2 }
 0x173   : > { %v2613_v63 = vpop.eup %2612  ;;  %1079 = vst.msk [vmem:[#allocation2 + $0x160] sm:$0xff] %vm1034_vm3, %v2611_v62  ;;  %v1293_v62 = vsel (!%p2011_p5), %vm1197_vm15, %v1245_v50, 0.0  ;;  %1351 = vst.msk [vmem:[#allocation2 + $0xa8] sm:$0xff] (!%p2011_p5), %vm1034_vm3, %v1303_v35  ;;  %v1115_v39 = vadd.s32 (!%p2011_p5), 208, %v2886_v2  ;;  %v1116_v40 = vadd.s32 (!%p2011_p5), 216, %v2886_v2  ;;  %v1117_v41 = vadd.s32 (!%p2011_p5), 224, %v2886_v2 }
 0x174   : > { %v2615_v0 = vpop.eup %2614  ;;  %1082 = vst.msk [vmem:[#allocation2 + $0x178] sm:$0xff] %vm1034_vm3, %v2613_v63  ;;  %1341 = vst.msk [vmem:[#allocation2 + $0x58] sm:$0xff] (!%p2011_p5), %vm1034_vm3, %v1293_v62  ;;  %v1294_v63 = vsel (!%p2011_p5), %vm1198_vm0, %v1246_v52, 0.0  ;;  %v1162_v42 = vadd.s32 (!%p2011_p5), %v2888_v3, %v1113_v38  ;;  %v1118_v44 = vadd.s32 (!%p2011_p5), 232, %v2886_v2  ;;  %v1119_v45 = vadd.s32 (!%p2011_p5), 240, %v2886_v2  ;;  %v1260_v50 = vld [vmem:[#allocation2 + $0xd0] sm:$0xff] (!%p2011_p5) }
 0x175   : > { %1080 = vst.msk [vmem:[#allocation2 + $0x168] sm:$0xff] %vm1034_vm3, %v2615_v0  ;;  %1342 = vst.msk [vmem:[#allocation2 + $0x60] sm:$0xff] (!%p2011_p5), %vm1034_vm3, %v1294_v63  ;;  %v1295_v0 = vsel (!%p2011_p5), %vm1199_vm1, %v1247_v54, 0.0  ;;  %v1120_v46 = vadd.s32 (!%p2011_p5), 248, %v2886_v2  ;;  %v1163_v47 = vadd.s32 (!%p2011_p5), %v2888_v3, %v1114_v29  ;;  %v1164_v49 = vadd.s32 (!%p2011_p5), %v2888_v3, %v1115_v39  ;;  %v1261_v52 = vld [vmem:[#allocation2 + $0xd8] sm:$0xff] (!%p2011_p5)  ;;  %v1262_v54 = vld [vmem:[#allocation2 + $0xe0] sm:$0xff] (!%p2011_p5) }
 0x176   : > { %1343 = vst.msk [vmem:[#allocation2 + $0x68] sm:$0xff] %vm1034_vm3, %v1295_v0  ;;  %1352 = vst.msk [vmem:[#allocation2 + $0xb0] sm:$0xff] %vm1034_vm3, %v1304_v36  ;;  %v1165_v51 = vadd.s32 %v2888_v3, %v1116_v40  ;;  %v1166_v53 = vadd.s32 %v2888_v3, %v1117_v41  ;;  %vm1210_vm13 = vcmp.lt.s32.totalorder %v1162_v42, 600  ;;  %v1167_v55 = vadd.s32 %v2888_v3, %v1118_v44  ;;  %v1269_v22 = vld [vmem:[#allocation2 + $0x118] sm:$0xff]  ;;  %v1270_v24 = vld [vmem:[#allocation2 + $0x120] sm:$0xff] }
 0x177   : > { %1353 = vst.msk [vmem:[#allocation2 + $0xb8] sm:$0xff] %vm1034_vm3, %v1305_v37  ;;  %v1168_v57 = vadd.s32 %v2888_v3, %v1119_v45  ;;  %v1169_v58 = vadd.s32 %v2888_v3, %v1120_v46  ;;  %v1306_v59 = vsel %vm1210_vm13, %v1258_v43, 0.0  ;;  %vm1211_vm14 = vcmp.lt.s32.totalorder %v1163_v47, 600  ;;  %v1271_v26 = vld [vmem:[#allocation2 + $0x128] sm:$0xff]  ;;  %v1272_v31 = vld [vmem:[#allocation2 + $0x130] sm:$0xff]  ;;  %v1273_v32 = vld [vmem:[#allocation2 + $0x138] sm:$0xff] }
 0x178   : > { %vm1212_vm15 = vcmp.lt.s32.totalorder %v1164_v49, 600  ;;  %vm1213_vm0 = vcmp.lt.s32.totalorder %v1165_v51, 600  ;;  %1354 = vst.msk [vmem:[#allocation2 + $0xc0] sm:$0xff] %vm1034_vm3, %v1306_v59  ;;  %v1307_v62 = vsel %vm1211_vm14, %v1259_v48, 0.0  ;;  %vm1214_vm1 = vcmp.lt.s32.totalorder %v1166_v53, 600  ;;  %v1274_v45 = vld [vmem:[#allocation2 + $0x140] sm:$0xff] }
 0x179   : > { %v1308_v63 = vsel %vm1212_vm15, %v1260_v50, 0.0  ;;  %v1309_v0 = vsel %vm1213_vm0, %v1261_v52, 0.0  ;;  %1355 = vst.msk [vmem:[#allocation2 + $0xc8] sm:$0xff] %vm1034_vm3, %v1307_v62  ;;  %v1310_v1 = vsel %vm1214_vm1, %v1262_v54, 0.0  ;;  %vm1215_vm2 = vcmp.lt.s32.totalorder %v1167_v55, 600  ;;  %v1275_v50 = vld [vmem:[#allocation2 + $0x148] sm:$0xff] }
 0x17a   : > { %1356 = vst.msk [vmem:[#allocation2 + $0xd0] sm:$0xff] %vm1034_vm3, %v1308_v63  ;;  %1357 = vst.msk [vmem:[#allocation2 + $0xd8] sm:$0xff] %vm1034_vm3, %v1309_v0  ;;  %vm1216_vm4 = vcmp.lt.s32.totalorder %v1168_v57, 600  ;;  %vm1217_vm5 = vcmp.lt.s32.totalorder %v1169_v58, 600  ;;  %v1311_v4 = vsel %vm1215_vm2, %v1263_v56, 0.0  ;;  %v1121_v7 = vadd.s32 256, %v2886_v2 }
 0x17b   : > { %1358 = vst.msk [vmem:[#allocation2 + $0xe0] sm:$0xff] %vm1034_vm3, %v1310_v1  ;;  %v1312_v5 = vsel %vm1216_vm4, %v1264_v60, 0.0  ;;  %v1313_v6 = vsel %vm1217_vm5, %v1265_v61, 0.0  ;;  %1359 = vst.msk [vmem:[#allocation2 + $0xe8] sm:$0xff] %vm1034_vm3, %v1311_v4  ;;  %v1122_v8 = vadd.s32 264, %v2886_v2  ;;  %v1123_v9 = vadd.s32 272, %v2886_v2 }
 0x17c   : > { %1360 = vst.msk [vmem:[#allocation2 + $0xf0] sm:$0xff] %vm1034_vm3, %v1312_v5  ;;  %1361 = vst.msk [vmem:[#allocation2 + $0xf8] sm:$0xff] %vm1034_vm3, %v1313_v6  ;;  %v1124_v10 = vadd.s32 280, %v2886_v2  ;;  %v1125_v11 = vadd.s32 288, %v2886_v2  ;;  %v1170_v12 = vadd.s32 %v2888_v3, %v1121_v7  ;;  %v1126_v14 = vadd.s32 296, %v2886_v2  ;;  %v1276_v52 = vld [vmem:[#allocation2 + $0x150] sm:$0xff] }
 0x17d   : > { %v1127_v15 = vadd.s32 304, %v2886_v2  ;;  %v1128_v16 = vadd.s32 312, %v2886_v2  ;;  %v1171_v17 = vadd.s32 %v2888_v3, %v1122_v8  ;;  %v1172_v19 = vadd.s32 %v2888_v3, %v1123_v9  ;;  %v1277_v54 = vld [vmem:[#allocation2 + $0x158] sm:$0xff]  ;;  %v1278_v56 = vld [vmem:[#allocation2 + $0x160] sm:$0xff]  ;;  %v1279_v58 = vld [vmem:[#allocation2 + $0x168] sm:$0xff] }
 0x17e   : > { %v1173_v21 = vadd.s32 %v2888_v3, %v1124_v10  ;;  %v1174_v23 = vadd.s32 %v2888_v3, %v1125_v11  ;;  %vm1218_vm6 = vcmp.lt.s32.totalorder %v1170_v12, 600  ;;  %v1175_v25 = vadd.s32 %v2888_v3, %v1126_v14  ;;  %v1280_v61 = vld [vmem:[#allocation2 + $0x170] sm:$0xff]  ;;  %v1281_v62 = vld [vmem:[#allocation2 + $0x178] sm:$0xff] }
 0x17f   : > { %v1176_v27 = vadd.s32 %v2888_v3, %v1127_v15  ;;  %v1177_v28 = vadd.s32 %v2888_v3, %v1128_v16  ;;  %v1314_v30 = vsel %vm1218_vm6, %v1266_v13, 0.0  ;;  %vm1219_vm7 = vcmp.lt.s32.totalorder %v1171_v17, 600 }
 0x180   : > { %vm1220_vm8 = vcmp.lt.s32.totalorder %v1172_v19, 600  ;;  %vm1221_vm9 = vcmp.lt.s32.totalorder %v1173_v21, 600  ;;  %1362 = vst.msk [vmem:[#allocation2 + $0x100] sm:$0xff] %vm1034_vm3, %v1314_v30  ;;  %v1315_v33 = vsel %vm1219_vm7, %v1267_v18, 0.0  ;;  %vm1222_vm10 = vcmp.lt.s32.totalorder %v1174_v23, 600 }
 0x181   : > { %v1316_v34 = vsel %vm1220_vm8, %v1268_v20, 0.0  ;;  %v1317_v35 = vsel %vm1221_vm9, %v1269_v22, 0.0  ;;  %1363 = vst.msk [vmem:[#allocation2 + $0x108] sm:$0xff] %vm1034_vm3, %v1315_v33  ;;  %v1318_v36 = vsel %vm1222_vm10, %v1270_v24, 0.0  ;;  %vm1223_vm11 = vcmp.lt.s32.totalorder %v1175_v25, 600 }
 0x182   : > { %1364 = vst.msk [vmem:[#allocation2 + $0x110] sm:$0xff] %vm1034_vm3, %v1316_v34  ;;  %1365 = vst.msk [vmem:[#allocation2 + $0x118] sm:$0xff] %vm1034_vm3, %v1317_v35  ;;  %vm1224_vm12 = vcmp.lt.s32.totalorder %v1176_v27, 600  ;;  %vm1225_vm13 = vcmp.lt.s32.totalorder %v1177_v28, 600  ;;  %v1319_v37 = vsel %vm1223_vm11, %v1271_v26, 0.0  ;;  %v1129_v39 = vadd.s32 320, %v2886_v2 }
 0x183   : > { %1366 = vst.msk [vmem:[#allocation2 + $0x120] sm:$0xff] %vm1034_vm3, %v1318_v36  ;;  %v1320_v38 = vsel %vm1224_vm12, %v1272_v31, 0.0  ;;  %v1321_v29 = vsel %vm1225_vm13, %v1273_v32, 0.0  ;;  %1367 = vst.msk [vmem:[#allocation2 + $0x128] sm:$0xff] %vm1034_vm3, %v1319_v37  ;;  %v1130_v40 = vadd.s32 328, %v2886_v2  ;;  %v1131_v41 = vadd.s32 336, %v2886_v2 }
 0x184   : > { %1368 = vst.msk [vmem:[#allocation2 + $0x130] sm:$0xff] %vm1034_vm3, %v1320_v38  ;;  %1369 = vst.msk [vmem:[#allocation2 + $0x138] sm:$0xff] %vm1034_vm3, %v1321_v29  ;;  %v1132_v42 = vadd.s32 344, %v2886_v2  ;;  %v1133_v43 = vadd.s32 352, %v2886_v2  ;;  %v1178_v44 = vadd.s32 %v2888_v3, %v1129_v39  ;;  %v1134_v46 = vadd.s32 360, %v2886_v2 }
 0x185   : > { %v1135_v47 = vadd.s32 368, %v2886_v2  ;;  %v1136_v48 = vadd.s32 376, %v2886_v2  ;;  %v1179_v49 = vadd.s32 %v2888_v3, %v1130_v40  ;;  %v1180_v51 = vadd.s32 %v2888_v3, %v1131_v41 }
 0x186   : > { %v1181_v53 = vadd.s32 %v2888_v3, %v1132_v42  ;;  %v1182_v55 = vadd.s32 %v2888_v3, %v1133_v43  ;;  %vm1226_vm14 = vcmp.lt.s32.totalorder %v1178_v44, 600  ;;  %v1183_v57 = vadd.s32 %v2888_v3, %v1134_v46 }
 0x187   : > { %v1184_v59 = vadd.s32 %v2888_v3, %v1135_v47  ;;  %v1185_v2 = vadd.s32 %v2888_v3, %v1136_v48  ;;  %v1322_v60 = vsel %vm1226_vm14, %v1274_v45, 0.0  ;;  %vm1227_vm15 = vcmp.lt.s32.totalorder %v1179_v49, 600 }
 0x188   : > { %vm1228_vm0 = vcmp.lt.s32.totalorder %v1180_v51, 600  ;;  %vm1229_vm1 = vcmp.lt.s32.totalorder %v1181_v53, 600  ;;  %1370 = vst.msk [vmem:[#allocation2 + $0x140] sm:$0xff] %vm1034_vm3, %v1322_v60  ;;  %v1323_v63 = vsel %vm1227_vm15, %v1275_v50, 0.0  ;;  %vm1230_vm2 = vcmp.lt.s32.totalorder %v1182_v55, 600 }
 0x189   : > { %v1324_v0 = vsel %vm1228_vm0, %v1276_v52, 0.0  ;;  %v1325_v1 = vsel %vm1229_vm1, %v1277_v54, 0.0  ;;  %1371 = vst.msk [vmem:[#allocation2 + $0x148] sm:$0xff] %vm1034_vm3, %v1323_v63  ;;  %v1326_v4 = vsel %vm1230_vm2, %v1278_v56, 0.0  ;;  %vm1231_vm4 = vcmp.lt.s32.totalorder %v1183_v57, 600 }
 0x18a   : > { %1372 = vst.msk [vmem:[#allocation2 + $0x150] sm:$0xff] %vm1034_vm3, %v1324_v0  ;;  %1373 = vst.msk [vmem:[#allocation2 + $0x158] sm:$0xff] %vm1034_vm3, %v1325_v1  ;;  %vm1232_vm5 = vcmp.lt.s32.totalorder %v1184_v59, 600  ;;  %vm1233_vm6 = vcmp.lt.s32.totalorder %v1185_v2, 600  ;;  %v1327_v3 = vsel %vm1231_vm4, %v1279_v58, 0.0 }
 0x18b   : > { %1374 = vst.msk [vmem:[#allocation2 + $0x160] sm:$0xff] %vm1034_vm3, %v1326_v4  ;;  %v1328_v5 = vsel %vm1232_vm5, %v1280_v61, 0.0  ;;  %v1329_v6 = vsel %vm1233_vm6, %v1281_v62, 0.0  ;;  %1375 = vst.msk [vmem:[#allocation2 + $0x168] sm:$0xff] %vm1034_vm3, %v1327_v3 }
 0x18c   : > { %1376 = vst.msk [vmem:[#allocation2 + $0x170] sm:$0xff] %vm1034_vm3, %v1328_v5  ;;  %1377 = vst.msk [vmem:[#allocation2 + $0x178] sm:$0xff] %vm1034_vm3, %v1329_v6 }
 0x18d PF: > { %v1378_v7 = vld [vmem:[#allocation2] sm:$0xff]  ;;  %v1379_v9 = vld [vmem:[#allocation2 + $0x8] sm:$0xff]  ;;  %v1380_v18 = vld [vmem:[#allocation2 + $0x10] sm:$0xff]  ;;  %v2662_v25 = vmov 0.0|0.0   ;;  %vm2663_vm7 = vmmov 0   ;;  %vm1855_vm8 = vcmask 80896  }
 0x18e   : > { %v1394_v8 = vld [vmem:[#allocation2 + $0x80] sm:$0xff]  ;;  %v2274_v12 = vpack.c.bf16 %v1379_v9, %v1378_v7  ;;  %v1381_v19 = vld [vmem:[#allocation2 + $0x18] sm:$0xff]  ;;  %2360 = vmatprep.subr.bf16.mxu0 %v2662_v25  ;;  %v3044_v27 = vld [vmem:[#allocation2 + $0x108] sm:$0xff] }
 0x18f   : > { %v2616_v10 = vpack.i.bf16 %v1378_v7, %v1394_v8  ;;  %v1395_v11 = vld [vmem:[#allocation2 + $0x88] sm:$0xff]  ;;  %v1396_v13 = vld [vmem:[#allocation2 + $0x90] sm:$0xff]  ;;  %v2278_v20 = vpack.c.bf16 %v1381_v19, %v1380_v18  ;;  %v3040_v24 = vld [vmem:[#allocation2 + $0x100] sm:$0xff] }
 0x190   : > { %v1397_v14 = vld [vmem:[#allocation2 + $0x98] sm:$0xff]  ;;  %v2272_v15 = vpack.c.bf16 %v1395_v11, %v1394_v8  ;;  %v2618_v16 = vpack.i.bf16 %v1379_v9, %v1395_v11  ;;  %v3034_v21 = vld [vmem:[#allocation2 + $0xa0] sm:$0xff]  ;;  %v2620_v26 = vpack.i.bf16 %v1380_v18, %v1396_v13  ;;  %1491 = vxpose.xlu1.b32.start [1/16] (narrow) %v3040_v24, 8  ;;  %v3046_v30 = vld [vmem:[#allocation2 + $0x28] sm:$0xff]  ;;  %v2305_v32 = vpack.c.bf16 %v3044_v27, %v3040_v24 }
 0x191   : > { %2617 = vxpose.xlu0.b32.start [1/16] (narrow) %v2616_v10, 8  ;;  %v2276_v17 = vpack.c.bf16 %v1397_v14, %v1396_v13  ;;  %v3036_v22 = vld [vmem:[#allocation2 + $0xa8] sm:$0xff]  ;;  %v1382_v28 = vld [vmem:[#allocation2 + $0x20] sm:$0xff]  ;;  %v3053_v34 = vld [vmem:[#allocation2 + $0xb8] sm:$0xff]  ;;  %v2622_v39 = vpack.i.bf16 %v1381_v19, %v1397_v14 }
 0x192   : > { %2273 = vmatprep.subr.bf16.mxu1 %v2272_v15  ;;  %v2280_v23 = vpack.c.bf16 %v3036_v22, %v3034_v21  ;;  %v2282_v33 = vpack.c.bf16 %v3046_v30, %v1382_v28  ;;  %v3055_v35 = vld [vmem:[#allocation2 + $0x110] sm:$0xff]  ;;  %v3057_v36 = vld [vmem:[#allocation2 + $0x118] sm:$0xff]  ;;  %v3068_v41 = vld [vmem:[#allocation2 + $0x120] sm:$0xff]  ;;  %v2624_v59 = vpack.i.bf16 %v1382_v28, %v3034_v21  ;;  %v2626_v11 = vpack.i.bf16 %v3046_v30, %v3036_v22 }
 0x193   : > { %2275 = vmatpush3.bf16.msra.mxu1 %v2274_v12  ;;  %v3059_v37 = vld [vmem:[#allocation2 + $0x30] sm:$0xff]  ;;  %v2308_v29 = vpack.c.bf16 %v3057_v36, %v3055_v35  ;;  %v3065_v40 = vld [vmem:[#allocation2 + $0x38] sm:$0xff]  ;;  %v3070_v42 = vld [vmem:[#allocation2 + $0x128] sm:$0xff] }
 0x194   : > { %2277 = vmatprep.subr.bf16.mxu1 %v2276_v17  ;;  %v3048_v31 = vld [vmem:[#allocation2 + $0xb0] sm:$0xff]  ;;  %1492 = vxpose.xlu1.b32.cont [2/16] (narrow) %v3044_v27, 8  ;;  %v3072_v43 = vld [vmem:[#allocation2 + $0xc0] sm:$0xff]  ;;  %v3074_v44 = vld [vmem:[#allocation2 + $0xc8] sm:$0xff]  ;;  %v2311_v45 = vpack.c.bf16 %v3070_v42, %v3068_v41  ;;  %v2286_v47 = vpack.c.bf16 %v3065_v40, %v3059_v37 }
 0x195   : > { %2619 = vxpose.xlu0.b32.cont [2/16] (narrow) %v2618_v16, 8  ;;  %v2284_v38 = vpack.c.bf16 %v3053_v34, %v3048_v31  ;;  %v3078_v46 = vld [vmem:[#allocation2 + $0x130] sm:$0xff]  ;;  %v3082_v48 = vld [vmem:[#allocation2 + $0x138] sm:$0xff]  ;;  %v3084_v49 = vld [vmem:[#allocation2 + $0x140] sm:$0xff]  ;;  %v2288_v53 = vpack.c.bf16 %v3074_v44, %v3072_v43  ;;  %v2628_v21 = vpack.i.bf16 %v3059_v37, %v3048_v31 }
 0x196   : > { %v3086_v50 = vld [vmem:[#allocation2 + $0x148] sm:$0xff]  ;;  %v3088_v51 = vld [vmem:[#allocation2 + $0x40] sm:$0xff]  ;;  %v2314_v54 = vpack.c.bf16 %v3082_v48, %v3078_v46  ;;  %v3098_v56 = vld [vmem:[#allocation2 + $0x150] sm:$0xff] }
 0x197   : > { %2279 = vmatpush3.bf16.msra.mxu1 %v2278_v20  ;;  %v3090_v52 = vld [vmem:[#allocation2 + $0x48] sm:$0xff]  ;;  %v2317_v55 = vpack.c.bf16 %v3086_v50, %v3084_v49  ;;  %v3100_v57 = vld [vmem:[#allocation2 + $0x158] sm:$0xff]  ;;  %v3102_v58 = vld [vmem:[#allocation2 + $0x160] sm:$0xff] }
 0x198   : > { %2281 = vmatprep.subr.bf16.mxu1 %v2280_v23  ;;  %1493 = vxpose.xlu1.b32.cont [3/16] (narrow) %v3055_v35, 8  ;;  %v2320_v2 = vpack.c.bf16 %v3100_v57, %v3098_v56  ;;  %v3108_v60 = vld [vmem:[#allocation2 + $0x168] sm:$0xff]  ;;  %v3110_v61 = vld [vmem:[#allocation2 + $0x170] sm:$0xff]  ;;  %v3112_v62 = vld [vmem:[#allocation2 + $0x178] sm:$0xff]  ;;  %v2290_v5 = vpack.c.bf16 %v3090_v52, %v3088_v51 }
 0x199   : > { %2621 = vxpose.xlu0.b32.cont [3/16] (narrow) %v2620_v26, 8  ;;  %v3114_v63 = vld [vmem:[#allocation2 + $0xd0] sm:$0xff]  ;;  %v2323_v0 = vpack.c.bf16 %v3108_v60, %v3102_v58  ;;  %v2326_v1 = vpack.c.bf16 %v3112_v62, %v3110_v61  ;;  %v1698_v4 = vld [vmem:[%s2714_s28 + $0x100] sm:$0xff]  ;;  %v1699_v3 = vld [vmem:[%s2714_s28 + $0x108] sm:$0xff] }
 0x19a   : > { %v3124_v6 = vld [vmem:[#allocation2 + $0xd8] sm:$0xff]  ;;  %v2361_v7 = vpack.c.bf16 %v1699_v3, %v1698_v4  ;;  %v1700_v8 = vld [vmem:[%s2714_s28 + $0x110] sm:$0xff]  ;;  %v3137_v14 = vld [vmem:[#allocation2 + $0xe0] sm:$0xff] }
 0x19b   : > { %2283 = vmatpush3.bf16.msra.mxu1 %v2282_v33  ;;  %v1701_v9 = vld [vmem:[%s2714_s28 + $0x118] sm:$0xff]  ;;  %v2292_v10 = vpack.c.bf16 %v3124_v6, %v3114_v63  ;;  %v3133_v12 = vld [vmem:[#allocation2 + $0x50] sm:$0xff]  ;;  %v3141_v17 = vld [vmem:[#allocation2 + $0xe8] sm:$0xff] }
 0x19c   : > { %2285 = vmatprep.subr.bf16.mxu1 %v2284_v38  ;;  %1494 = vxpose.xlu1.b32.cont [4/16] (narrow) %v3057_v36, 8  ;;  %v3135_v13 = vld [vmem:[#allocation2 + $0x58] sm:$0xff]  ;;  %v2364_v15 = vpack.c.bf16 %v1701_v9, %v1700_v8  ;;  %v1702_v18 = vld [vmem:[%s2714_s28 + $0x120] sm:$0xff]  ;;  %v1703_v19 = vld [vmem:[%s2714_s28 + $0x128] sm:$0xff]  ;;  %v2296_v20 = vpack.c.bf16 %v3141_v17, %v3137_v14  ;;  %v2634_v9 = vpack.i.bf16 %v3090_v52, %v3074_v44 }
 0x19d   : > { %2623 = vxpose.xlu0.b32.cont [4/16] (narrow) %v2622_v39, 8  ;;  %2362 = vmatpush3.bf16.msra.mxu0 %v2361_v7  ;;  %v2294_v16 = vpack.c.bf16 %v3135_v13, %v3133_v12  ;;  %v3151_v22 = vld [vmem:[#allocation2 + $0x60] sm:$0xff]  ;;  %v3153_v23 = vld [vmem:[#allocation2 + $0x68] sm:$0xff]  ;;  %v3155_v26 = vld [vmem:[#allocation2 + $0xf0] sm:$0xff]  ;;  %v2367_v28 = vpack.c.bf16 %v1703_v19, %v1702_v18  ;;  %v2630_v39 = vpack.i.bf16 %v3065_v40, %v3053_v34 }
 0x19e   : > { %2363 = vmatprep.subr.bf16.mxu0 %v2662_v25  ;;  %v2298_v30 = vpack.c.bf16 %v3153_v23, %v3151_v22  ;;  %v3159_v33 = vld [vmem:[#allocation2 + $0xf8] sm:$0xff]  ;;  %v1704_v31 = vld [vmem:[%s2714_s28 + $0x130] sm:$0xff]  ;;  %v1706_v3 = vld [vmem:[%s2714_s28 + $0x140] sm:$0xff]  ;;  %v2632_v34 = vpack.i.bf16 %v3088_v51, %v3072_v43  ;;  %v2638_v18 = vpack.i.bf16 %v3135_v13, %v3124_v6 }
 0x19f   : > { %2287 = vmatpush3.bf16.msra.mxu1 %v2286_v47  ;;  %v1705_v37 = vld [vmem:[%s2714_s28 + $0x138] sm:$0xff]  ;;  %v2300_v38 = vpack.c.bf16 %v3159_v33, %v3155_v26  ;;  %v1392_v47 = vld [vmem:[#allocation2 + $0x70] sm:$0xff]  ;;  %v1710_v51 = vld [vmem:[%s2714_s28 + $0x160] sm:$0xff] }
 0x1a0   : > { %2289 = vmatprep.subr.bf16.mxu1 %v2288_v53  ;;  %1495 = vxpose.xlu1.b32.cont [5/16] (narrow) %v3068_v41, 8  ;;  %v1393_v53 = vld [vmem:[#allocation2 + $0x78] sm:$0xff]  ;;  %v1708_v7 = vld [vmem:[%s2714_s28 + $0x150] sm:$0xff]  ;;  %v2644_v6 = vpack.i.bf16 %v1392_v47, %v3155_v26  ;;  %v1682_v24 = vld [vmem:[%s2714_s28 + $0x80] sm:$0xff] }
 0x1a1   : > { %2625 = vxpose.xlu0.b32.cont [5/16] (narrow) %v2624_v59, 8  ;;  %2365 = vmatpush3.bf16.msra.mxu0 %v2364_v15  ;;  %v2370_v59 = vpack.c.bf16 %v1705_v37, %v1704_v31  ;;  %v2302_v4 = vpack.c.bf16 %v1393_v53, %v1392_v47  ;;  %v1709_v8 = vld [vmem:[%s2714_s28 + $0x158] sm:$0xff]  ;;  %v2636_v15 = vpack.i.bf16 %v3133_v12, %v3114_v63  ;;  %v1712_v52 = vld [vmem:[%s2714_s28 + $0x170] sm:$0xff]  ;;  %v1683_v27 = vld [vmem:[%s2714_s28 + $0x88] sm:$0xff] }
 0x1a2   : > { %2366 = vmatprep.subr.bf16.mxu0 %v2662_v25  ;;  %v2376_v43 = vpack.c.bf16 %v1709_v8, %v1708_v7  ;;  %v2640_v63 = vpack.i.bf16 %v3151_v22, %v3137_v14  ;;  %v2642_v12 = vpack.i.bf16 %v3153_v23, %v3141_v17  ;;  %v2646_v13 = vpack.i.bf16 %v1393_v53, %v3159_v33  ;;  %v1666_v35 = vld [vmem:[%s2714_s28] sm:$0xff]  ;;  %v1667_v36 = vld [vmem:[%s2714_s28 + $0x8] sm:$0xff]  ;;  %v1685_v41 = vld [vmem:[%s2714_s28 + $0x98] sm:$0xff] }
 0x1a3   : > { %2291 = vmatpush3.bf16.msra.mxu1 %v2290_v5  ;;  %v1707_v5 = vld [vmem:[%s2714_s28 + $0x148] sm:$0xff]  ;;  %v1674_v26 = vld [vmem:[%s2714_s28 + $0x40] sm:$0xff]  ;;  %v1693_v33 = vld [vmem:[%s2714_s28 + $0xd8] sm:$0xff] }
 0x1a4   : > { %2293 = vmatprep.subr.bf16.mxu1 %v2292_v10  ;;  %1496 = vxpose.xlu1.b32.cont [6/16] (narrow) %v3070_v42, 8  ;;  %v2373_v40 = vpack.c.bf16 %v1707_v5, %v1706_v3  ;;  %v1711_v10 = vld [vmem:[%s2714_s28 + $0x168] sm:$0xff]  ;;  %v2330_v42 = vpack.c.bf16 %v1667_v36, %v1666_v35  ;;  %v1694_v47 = vld [vmem:[%s2714_s28 + $0xe0] sm:$0xff] }
 0x1a5   : > { %2627 = vxpose.xlu0.b32.cont [6/16] (narrow) %v2626_v11, 8  ;;  %2368 = vmatpush3.bf16.msra.mxu0 %v2367_v28  ;;  %v2664_v11 = vmov 0.0   ;;  %v2379_v44 = vpack.c.bf16 %v1711_v10, %v1710_v51  ;;  %v1675_v28 = vld [vmem:[%s2714_s28 + $0x48] sm:$0xff]  ;;  %v1678_v3 = vld [vmem:[%s2714_s28 + $0x60] sm:$0xff] }
 0x1a6   : > { %2369 = vmatprep.subr.bf16.mxu0 %v2662_v25  ;;  %2269 = vmatprep.mubr.msk.f32.mxu0 %vm2663_vm7, %v2664_v11  ;;  %v2346_v31 = vpack.c.bf16 %v1675_v28, %v1674_v26  ;;  %v1695_v53 = vld [vmem:[%s2714_s28 + $0xe8] sm:$0xff] }
 0x1a7   : > { %2295 = vmatpush3.bf16.msra.mxu1 %v2294_v16  ;;  %v1713_v16 = vld [vmem:[%s2714_s28 + $0x178] sm:$0xff]  ;;  %v1679_v5 = vld [vmem:[%s2714_s28 + $0x68] sm:$0xff] }
 0x1a8   : > { %2297 = vmatprep.subr.bf16.mxu1 %v2296_v20  ;;  %1497 = vxpose.xlu1.b32.cont [7/16] (narrow) %v3078_v46, 8  ;;  %v2382_v19 = vpack.c.bf16 %v1713_v16, %v1712_v52  ;;  %v1668_v46 = vld [vmem:[%s2714_s28 + $0x10] sm:$0xff]  ;;  %v2354_v7 = vpack.c.bf16 %v1679_v5, %v1678_v3  ;;  %v1426_v16 = vld [vmem:[%s3300_s4] sm:$0xff] }
 0x1a9   : > { %2629 = vxpose.xlu0.b32.cont [7/16] (narrow) %v2628_v21, 8  ;;  %2371 = vmatpush3.bf16.msra.mxu0 %v2370_v59 }
 0x1aa   : > { %2372 = vmatprep.subr.bf16.mxu0 %v2662_v25 }
 0x1ab   : > { %2299 = vmatpush3.bf16.msra.mxu1 %v2298_v30  ;;  %v1692_v30 = vld [vmem:[%s2714_s28 + $0xd0] sm:$0xff] }
 0x1ac   : > { %2301 = vmatprep.subr.bf16.mxu1 %v2300_v38  ;;  %1498 = vxpose.xlu1.b32.cont [8/16] (narrow) %v3082_v48, 8  ;;  %v1669_v48 = vld [vmem:[%s2714_s28 + $0x18] sm:$0xff]  ;;  %v2348_v37 = vpack.c.bf16 %v1693_v33, %v1692_v30  ;;  %v1676_v38 = vld [vmem:[%s2714_s28 + $0x50] sm:$0xff] }
 0x1ad   : > { %2631 = vxpose.xlu0.b32.cont [8/16] (narrow) %v2630_v39, 8  ;;  %2374 = vmatpush3.bf16.msra.mxu0 %v2373_v40  ;;  %v1677_v39 = vld [vmem:[%s2714_s28 + $0x58] sm:$0xff] }
 0x1ae   : > { %2375 = vmatprep.subr.bf16.mxu0 %v2662_v25  ;;  %v2350_v59 = vpack.c.bf16 %v1677_v39, %v1676_v38  ;;  %v1697_v40 = vld [vmem:[%s2714_s28 + $0xf8] sm:$0xff] }
 0x1af   : > { %2303 = vmatpush3.bf16.msra.mxu1 %v2302_v4  ;;  %v2352_v4 = vpack.c.bf16 %v1695_v53, %v1694_v47 }
 0x1b0   : > { %2304 = vmatprep.subr.bf16.mxu1 %v2662_v25  ;;  %1499 = vxpose.xlu1.b32.cont [9/16] (narrow) %v3084_v49, 8  ;;  %v1686_v49 = vld [vmem:[%s2714_s28 + $0xa0] sm:$0xff] }
 0x1b1   : > { %2633 = vxpose.xlu0.b32.cont [9/16] (narrow) %v2632_v34, 8  ;;  %2377 = vmatpush3.bf16.msra.mxu0 %v2376_v43  ;;  %v1696_v34 = vld [vmem:[%s2714_s28 + $0xf0] sm:$0xff]  ;;  %v1681_v43 = vld [vmem:[%s2714_s28 + $0x78] sm:$0xff] }
 0x1b2   : > { %2378 = vmatprep.subr.bf16.mxu0 %v2662_v25  ;;  %v2356_v8 = vpack.c.bf16 %v1697_v40, %v1696_v34 }
 0x1b4   : > { %1500 = vxpose.xlu1.b32.cont [10/16] (narrow) %v3086_v50, 8  ;;  %v2334_v50 = vpack.c.bf16 %v1669_v48, %v1668_v46 }
 0x1b5   : > { %2635 = vxpose.xlu0.b32.cont [10/16] (narrow) %v2634_v9, 8  ;;  %2380 = vmatpush3.bf16.msra.mxu0 %v2379_v44  ;;  %v1680_v9 = vld [vmem:[%s2714_s28 + $0x70] sm:$0xff] }
 0x1b6   : > { %2381 = vmatprep.subr.bf16.mxu0 %v2662_v25  ;;  %v2358_v51 = vpack.c.bf16 %v1681_v43, %v1680_v9 }
 0x1b8   : > { %1501 = vxpose.xlu1.b32.cont [11/16] (narrow) %v3098_v56, 8  ;;  %v1671_v56 = vld [vmem:[%s2714_s28 + $0x28] sm:$0xff] }
 0x1b9   : > { %2637 = vxpose.xlu0.b32.cont [11/16] (narrow) %v2636_v15, 8  ;;  %2383 = vmatpush3.bf16.msra.mxu0 %v2382_v19 }
 0x1bc   : > { %1502 = vxpose.xlu1.b32.cont [12/16] (narrow) %v3100_v57, 8  ;;  %v1688_v57 = vld [vmem:[%s2714_s28 + $0xb0] sm:$0xff] }
 0x1bd   : > { %2639 = vxpose.xlu0.b32.cont [12/16] (narrow) %v2638_v18, 8 }
 0x1c0   : > { %1503 = vxpose.xlu1.b32.cont [13/16] (narrow) %v3102_v58, 8  ;;  %v1689_v58 = vld [vmem:[%s2714_s28 + $0xb8] sm:$0xff] }
 0x1c1   : > { %2641 = vxpose.xlu0.b32.cont [13/16] (narrow) %v2640_v63, 8 }
 0x1c4   : > { %1504 = vxpose.xlu1.b32.cont [14/16] (narrow) %v3108_v60, 8  ;;  %v2340_v60 = vpack.c.bf16 %v1689_v58, %v1688_v57 }
 0x1c5   : > { %2643 = vxpose.xlu0.b32.cont [14/16] (narrow) %v2642_v12, 8 }
 0x1c8   : > { %1505 = vxpose.xlu1.b32.cont [15/16] (narrow) %v3110_v61, 8  ;;  %v1672_v61 = vld [vmem:[%s2714_s28 + $0x30] sm:$0xff] }
 0x1c9   : > { %2645 = vxpose.xlu0.b32.cont [15/16] (narrow) %v2644_v6, 8 }
 0x1cc   : > { %1506 = vxpose.xlu1.b32.end [16/16] (narrow) %v3112_v62, 8  ;;  %v1673_v62 = vld [vmem:[%s2714_s28 + $0x38] sm:$0xff] }
 0x1cd   : > { %2647 = vxpose.xlu0.b32.end [16/16] (narrow) %v2646_v13, 8  ;;  %v2342_v22 = vpack.c.bf16 %v1673_v62, %v1672_v61 }
 0x210   : > { %v1507_v21 = vpop.trf.xlu1 }
 0x211   : > { %v3208_v14 = vpop.trf.xlu0  ;;  %2270 = vmatmul.mubr.f32.vlgmr.msra.gmra.mrb[48].mxu0 %v1507_v21 }
 0x212   : > { %v2652_v17 = vunpack.i.h.bf16 %v3208_v14  ;;  %v2649_v20 = vunpack.i.l.bf16 %v3208_v14 }
 0x214   : > { %1587 = vmatprep.mubr.f32.mxu1 %v2649_v20 }
 0x215   : > { %1588 = vmatmul.mubr.f32.vlgmr.msra.gmra.mrb[0].mxu1 %v2652_v17 }
 0x216   : > { %2306 = vmatpush3.bf16.msra.mxu1 %v2305_v32  ;;  %2234 = vmatprep.mubr.msk.f32.mxu1 %vm2663_vm7, %v2664_v11  ;;  %v2328_v32 = vpack.c.bf16 %v1683_v27, %v1682_v24 }
 0x217   : > { %2307 = vmatprep.subr.bf16.mxu1 %v2662_v25 }
 0x21a   : > { %2309 = vmatpush3.bf16.msra.mxu1 %v2308_v29  ;;  %v1684_v29 = vld [vmem:[%s2714_s28 + $0x90] sm:$0xff] }
 0x21b   : > { %2310 = vmatprep.subr.bf16.mxu1 %v2662_v25 }
 0x21e   : > { %2312 = vmatpush3.bf16.msra.mxu1 %v2311_v45  ;;  %v2332_v45 = vpack.c.bf16 %v1685_v41, %v1684_v29 }
 0x21f   : > { %2313 = vmatprep.subr.bf16.mxu1 %v2662_v25 }
 0x222   : > { %2315 = vmatpush3.bf16.msra.mxu1 %v2314_v54 }
 0x223   : > { %2316 = vmatprep.subr.bf16.mxu1 %v2662_v25 }
 0x226   : > { %2318 = vmatpush3.bf16.msra.mxu1 %v2317_v55  ;;  %v1670_v55 = vld [vmem:[%s2714_s28 + $0x20] sm:$0xff] }
 0x227   : > { %2319 = vmatprep.subr.bf16.mxu1 %v2662_v25 }
 0x22a   : > { %2321 = vmatpush3.bf16.msra.mxu1 %v2320_v2  ;;  %v2338_v2 = vpack.c.bf16 %v1671_v56, %v1670_v55 }
 0x22b   : > { %2322 = vmatprep.subr.bf16.mxu1 %v2662_v25 }
 0x22e   : > { %2324 = vmatpush3.bf16.msra.mxu1 %v2323_v0  ;;  %v1690_v0 = vld [vmem:[%s2714_s28 + $0xc0] sm:$0xff] }
 0x22f   : > { %2325 = vmatprep.subr.bf16.mxu1 %v2662_v25  ;;  %v1687_v25 = vld [vmem:[%s2714_s28 + $0xa8] sm:$0xff] }
 0x230   : > { %v2336_v54 = vpack.c.bf16 %v1687_v25, %v1686_v49 }
 0x232   : > { %2327 = vmatpush3.bf16.msra.mxu1 %v2326_v1  ;;  %v1691_v1 = vld [vmem:[%s2714_s28 + $0xc8] sm:$0xff] }
 0x233   : > { %2329 = vmatprep.subr.bf16.mxu1 %v2328_v32  ;;  %v2344_v23 = vpack.c.bf16 %v1691_v1, %v1690_v0 }
 0x235   : > { %2235 = vmatmul.mubr.f32.vlgmr.msra.gmra.mrb[2].mxu1 %v1507_v21 }
 0x236   : > { %2331 = vmatpush3.bf16.msra.mxu1 %v2330_v42  ;;  %1778 = vmatprep.mubr.f32.mxu1 %v2649_v20 }
 0x237   : > { %2333 = vmatprep.subr.bf16.mxu1 %v2332_v45 }
 0x23a   : > { %2335 = vmatpush3.bf16.msra.mxu1 %v2334_v50 }
 0x23b   : > { %2337 = vmatprep.subr.bf16.mxu1 %v2336_v54 }
 0x23e   : > { %2339 = vmatpush3.bf16.msra.mxu1 %v2338_v2 }
 0x23f   : > { %2341 = vmatprep.subr.bf16.mxu1 %v2340_v60 }
 0x242   : > { %2343 = vmatpush3.bf16.msra.mxu1 %v2342_v22 }
 0x243   : > { %2345 = vmatprep.subr.bf16.mxu1 %v2344_v23 }
 0x246   : > { %2347 = vmatpush3.bf16.msra.mxu1 %v2346_v31 }
 0x247   : > { %2349 = vmatprep.subr.bf16.mxu1 %v2348_v37 }
 0x24a   : > { %2351 = vmatpush3.bf16.msra.mxu1 %v2350_v59 }
 0x24b   : > { %2353 = vmatprep.subr.bf16.mxu1 %v2352_v4 }
 0x24e   : > { %2355 = vmatpush3.bf16.msra.mxu1 %v2354_v7 }
 0x24f   : > { %2357 = vmatprep.subr.bf16.mxu1 %v2356_v8 }
 0x252   : > { %2359 = vmatpush3.bf16.msra.mxu1 %v2358_v51 }
 0x255   : > { %1779 = vmatmul.mubr.f32.vlgmr.msra.gmra.mrb[4].mxu1 %v2652_v17  ;;  %v1665_v17 = vld [vmem:[%s3301_s5] sm:$0xff] }
 0x2e4   : > { %v1850_v44 = vpop.f32.mrb[48].mxu0 }
 0x2e5   : > { %v2271_v52 = vpop.f32.mrb[49].mxu0 }
 0x2e8   : > { %v2074_v10 = vpop.f32.mrb[0].mxu1 }
 0x2e9   : > { %v2075_v11 = vpop.f32.mrb[1].mxu1 }
 0x2ea   : > { %v2076_v15 = vadd.f32 %v2075_v11, %v2074_v10 }
 0x308   : > { %v1659_v18 = vpop.f32.mrb[2].mxu1 }
 0x309   : > { %v1660_v19 = vadd.f32 %v2076_v15, %v1659_v18  ;;  %v2236_v63 = vpop.f32.mrb[3].mxu1 }
 0x30b   : > { %v1663_v12 = vadd.f32 %v1660_v19, %v1426_v16 }
 0x30d   : > { %1664 = vst.msk [vmem:[%s3300_s4] sm:$0xff] %vm1034_vm3, %v1663_v12 }
 0x328   : > { %v2126_v6 = vpop.f32.mrb[4].mxu1 }
 0x329   : > { %v2127_v13 = vpop.f32.mrb[5].mxu1 }
 0x32a   : > { %v2128_v14 = vadd.f32 %v2127_v13, %v2126_v6 }
 0x32c   : > { %v1851_v20 = vadd.f32 %v2128_v14, %v1850_v44 }
 0x32e   : > { %v1854_v21 = vadd.f32 %v1851_v20, %v1665_v17 }
 0x330   : > { %1856 = vst.msk [vmem:[%s3301_s5] sm:$0xff] %vm1855_vm8, %v1854_v21 }
 0x331 PF: > { %s16_s18 = sadd.s32 1, %s2659_s18  }
 0x332   : > { %p13_p6 = scmp.ge.s32.totalorder %s16_s18, 4  }
 0x334   :  { %15 = sbr.rel (!%p13_p6) target bundleno = 1 (0x1), region = 81 }

</bundles_post_ra>
